<compile_context>
chip_gen: v7x
topology: tpu7x:2x2x1
jax: 0.10.0
libtpu: 0.0.40
codegen_flags: <defaults>
</compile_context>

<pallas_src>
import functools

import jax
import jax.numpy as jnp
from jax.experimental import pallas as pl
from jax.experimental.pallas import tpu as pltpu

ALPHA = 0.05  # LeakyReLU negative slope used throughout the module


def _leaky(v):
    return jnp.where(v > 0, v, ALPHA * v)


# ----------------------------------------------------------------------------
# Fused kernel: conv00..conv03 + maxpool + LeakyReLU + channel-major flatten
# ----------------------------------------------------------------------------
def _fused_kernel(p0_ref, w0_ref, b0_ref, w1_ref, b1_ref,
                  w2_ref, b2_ref, w3_ref, b3_ref,
                  out_ref,
                  a0s_ref, a1p_ref, a2p_ref, *, batch):
    N = batch
    R1 = N * 16  # rows of the (n, h, w) slabs for the 4x4 feature maps

    # ---- conv00: ONE MXU matmul over the wrapper-built im2col patches --------
    # p0 rows are ordered (hr, wr, n, Hq, Wq) (h = 4*Hq + hr, w = 4*Wq + wr) so the
    # result scatters into conv01's stride-4 phase planes with contiguous stores.
    a0 = jnp.dot(p0_ref[...], w0_ref[...], preferred_element_type=jnp.float32)
    a0 = _leaky(a0 + jnp.broadcast_to(b0_ref[...], a0.shape))
    a0_blocks = a0.reshape(4, 4, N, 4, 4, 4)        # (hr, wr, n, Hq, Wq, C0=4)

    # ---- space-to-batch phase planes of conv01's zero-padded input -----------
    # Invariant: a0s[r, s, n, i, j, c] == zero_pad(conv00_out, 2)[n, 4*i + r, 4*j + s, c]
    # Zero only the never-written border block strips (4 wide stores), not the buffer.
    a0s_ref[0:2, :, :, 0:1, :, :] = jnp.zeros((2, 4, N, 1, 5, 4), jnp.float32)
    a0s_ref[2:4, :, :, 4:5, :, :] = jnp.zeros((2, 4, N, 1, 5, 4), jnp.float32)
    a0s_ref[:, 0:2, :, :, 0:1, :] = jnp.zeros((4, 2, N, 5, 1, 4), jnp.float32)
    a0s_ref[:, 2:4, :, :, 4:5, :] = jnp.zeros((4, 2, N, 5, 1, 4), jnp.float32)
    for hr in range(4):
        for wr in range(4):
            r, s = (hr + 2) % 4, (wr + 2) % 4
            i0 = 0 if hr < 2 else 1
            j0 = 0 if wr < 2 else 1
            a0s_ref[r, s, :, i0:i0 + 4, j0:j0 + 4, :] = a0_blocks[hr, wr]

    # ---- conv01: 25 per-tap MXU matmuls; every tap read is contiguous --------
    acc1 = jnp.broadcast_to(b1_ref[...], (R1, 16)).astype(jnp.float32)
    for kh in range(5):
        for kw in range(5):
            tap = a0s_ref[kh % 4, kw % 4, :,
                          kh // 4:kh // 4 + 4, kw // 4:kw // 4 + 4, :]   # (N,4,4,4)
            acc1 = acc1 + jnp.dot(tap.reshape(R1, 4), w1_ref[kh * 5 + kw],
                                  preferred_element_type=jnp.float32)
    a1 = _leaky(acc1)                                # (N*16, 16), rows = (n, h, w)

    # ---- conv02: 9 per-tap MXU matmuls over a padded NHWC scratch -------------
    a1p_ref[:, 0:1, :, :] = jnp.zeros((N, 1, 6, 16), jnp.float32)
    a1p_ref[:, 5:6, :, :] = jnp.zeros((N, 1, 6, 16), jnp.float32)
    a1p_ref[:, :, 0:1, :] = jnp.zeros((N, 6, 1, 16), jnp.float32)
    a1p_ref[:, :, 5:6, :] = jnp.zeros((N, 6, 1, 16), jnp.float32)
    a1p_ref[:, 1:5, 1:5, :] = a1.reshape(N, 4, 4, 16)
    acc2 = jnp.broadcast_to(b2_ref[...], (R1, 20)).astype(jnp.float32)
    for kh in range(3):
        for kw in range(3):
            tap = a1p_ref[:, kh:kh + 4, kw:kw + 4, :]                    # (N,4,4,16)
            acc2 = acc2 + jnp.dot(tap.reshape(R1, 16), w2_ref[kh * 3 + kw],
                                  preferred_element_type=jnp.float32)
    a2 = _leaky(acc2)                                # (N*16, 20)

    # ---- conv03 (no activation before the pool) -------------------------------
    a2p_ref[:, 0:1, :, :] = jnp.zeros((N, 1, 6, 20), jnp.float32)
    a2p_ref[:, 5:6, :, :] = jnp.zeros((N, 1, 6, 20), jnp.float32)
    a2p_ref[:, :, 0:1, :] = jnp.zeros((N, 6, 1, 20), jnp.float32)
    a2p_ref[:, :, 5:6, :] = jnp.zeros((N, 6, 1, 20), jnp.float32)
    a2p_ref[:, 1:5, 1:5, :] = a2.reshape(N, 4, 4, 20)
    acc3 = jnp.broadcast_to(b3_ref[...], (R1, 22)).astype(jnp.float32)
    for kh in range(3):
        for kw in range(3):
            tap = a2p_ref[:, kh:kh + 4, kw:kw + 4, :]                    # (N,4,4,20)
            acc3 = acc3 + jnp.dot(tap.reshape(R1, 20), w3_ref[kh * 3 + kw],
                                  preferred_element_type=jnp.float32)

    # ---- MaxPool2d(2) + LeakyReLU + NCHW flatten (channel-major) --------------
    a3 = acc3.reshape(N, 4, 4, 22)                   # conv03 output, NHWC
    pooled = []                                      # k = i*2 + j ordering
    for i in range(2):
        for j in range(2):
            m = jnp.maximum(
                jnp.maximum(a3[:, 2 * i, 2 * j, :], a3[:, 2 * i, 2 * j + 1, :]),
                jnp.maximum(a3[:, 2 * i + 1, 2 * j, :], a3[:, 2 * i + 1, 2 * j + 1, :]))
            pooled.append(m)                         # (N, 22)
    out = jnp.stack(pooled, axis=2)                  # (N, 22, 4): [n, c, i*2+j]
    # Single lane-dense store; layout matches torch.flatten of (N, 22, 2, 2) NCHW.
    out_ref[...] = _leaky(out.reshape(N, 88))


# ----------------------------------------------------------------------------
# Model: parameters + forward
# ----------------------------------------------------------------------------
_CONV_DEFS = [
    # name,    cout, cin, K, stride, pad
    ("conv00",    4,   1, 5,      4,   2),
    ("conv01",   16,   4, 5,      4,   2),
    ("conv02",   20,  16, 3,      1,   1),
    ("conv03",   22,  20, 3,      1,   1),
]


def init_params(key):
    """Mirrors reset_parameters(): weight ~ U(-1/sqrt(out_channels), +...), bias = 0
    (fan_in = weight.size()[0] == out_channels for torch Conv2d weights)."""
    params = {}
    for name, cout, cin, K, _, _ in _CONV_DEFS:
        key, sub = jax.random.split(key)
        lim = float(cout) ** -0.5
        w = jax.random.uniform(sub, (cout, cin, K, K), jnp.float32, -lim, lim)
        b = jnp.zeros((cout,), jnp.float32)
        params[name] = (w, b)
    return params


def _im2col_conv00(x_nchw):
    """(N,1,64,64) -> (4*4*N*4*4, 25) patch matrix for conv00 (5x5, s4, p2),
    rows ordered (hr, wr, n, Hq, Wq) to match the kernel's phase-plane scatter."""
    N = x_nchw.shape[0]
    x = x_nchw.reshape(N, 64, 64)
    xp = jnp.pad(x, ((0, 0), (2, 2), (2, 2)))                    # (N, 68, 68)
    taps = []
    for kh in range(5):
        for kw in range(5):
            taps.append(xp[:, kh:kh + 61:4, kw:kw + 61:4])       # (N, 16, 16)
    p = jnp.stack(taps, axis=-1)                                  # (N,16,16,25)
    p = p.reshape(N, 4, 4, 4, 4, 25).transpose(2, 4, 0, 1, 3, 5)  # (hr,wr,n,Hq,Wq,25)
    return p.reshape(16 * N * 16, 25)


def forward(params, x_nchw):
    N, Cin, H, W = x_nchw.shape
    assert (Cin, H, W) == (1, 64, 64), "kernel specialized for 1x64x64 inputs"

    p0 = _im2col_conv00(x_nchw)

    w0, b0 = params["conv00"]
    w1, b1 = params["conv01"]
    w2, b2 = params["conv02"]
    w3, b3 = params["conv03"]
    # (Cout, Cin, K, K) -> (K*K, Cin, Cout): tap-major, channels on lanes.
    ins = (
        p0,
        jnp.transpose(w0, (2, 3, 1, 0)).reshape(25, 4),      b0.reshape(1, 4),
        jnp.transpose(w1, (2, 3, 1, 0)).reshape(25, 4, 16),  b1.reshape(1, 16),
        jnp.transpose(w2, (2, 3, 1, 0)).reshape(9, 16, 20),  b2.reshape(1, 20),
        jnp.transpose(w3, (2, 3, 1, 0)).reshape(9, 20, 22),  b3.reshape(1, 22),
    )

    vmem = pl.BlockSpec(memory_space=pltpu.MemorySpace.VMEM)
    out = pl.pallas_call(
        functools.partial(_fused_kernel, batch=N),
        out_shape=jax.ShapeDtypeStruct((N, 88), jnp.float32),
        in_specs=[vmem] * len(ins),
        out_specs=vmem,
        scratch_shapes=[
            # stride-4 phase planes of padded conv00 output (conv01 input)
            pltpu.VMEM((4, 4, N, 5, 5, 4), jnp.float32),
            pltpu.VMEM((N, 6, 6, 16), jnp.float32),   # padded conv01 output
            pltpu.VMEM((N, 6, 6, 20), jnp.float32),   # padded conv02 output
        ],
    )(*ins)
    return out  # (N, 88), already in PyTorch NCHW-flatten order


# ----------------------------------------------------------------------------
# Pure-XLA reference (for a sanity check only; not on the hot path)
# ----------------------------------------------------------------------------
def _ref_forward(params, x):
    def conv(y, wb, stride, pad):
        w, b = wb
        y = jax.lax.conv_general_dilated(
            y, w, window_strides=(stride, stride),
            padding=((pad, pad), (pad, pad)),
            dimension_numbers=("NCHW", "OIHW", "NCHW"))
        return y + b.reshape(1, -1, 1, 1)

    y = _leaky(conv(x, params["conv00"], 4, 2))
    y = _leaky(conv(y, params["conv01"], 4, 2))
    y = _leaky(conv(y, params["conv02"], 1, 1))
    y = conv(y, params["conv03"], 1, 1)
    y = jax.lax.reduce_window(y, -jnp.inf, jax.lax.max,
                              (1, 1, 2, 2), (1, 1, 2, 2), "VALID")
    y = _leaky(y)
    return y.reshape(y.shape[0], -1)


# ----------------------------------------------------------------------------
# Entry point
# ----------------------------------------------------------------------------
if __name__ == "__main__":
    key = jax.random.PRNGKey(0)
    pkey, xkey = jax.random.split(key)

    params = init_params(pkey)
    # Input: batch=2, 1 channel, 64x64 image (NCHW, like the PyTorch module).
    x = jax.random.normal(xkey, (2, 1, 64, 64), jnp.float32)

    out = jax.jit(forward)(params, x)
    out = jax.block_until_ready(out)
    assert out.shape == (2, 22 * 2 * 2), out.shape

    # Sanity-check against the XLA reference (loose tol: matmul pass precision differs).
    ref = _ref_forward(params, x)
    err = float(jnp.max(jnp.abs(out - ref)))
    assert err < 2e-2, f"mismatch vs XLA reference: max abs err = {err}"

    print("KERNEL_OK")
</pallas_src>

<mosaic_0001>
module attributes {stable_mosaic.version = 11 : i64} {
  func.func @_fused_kernel(%arg0: memref<512x25xf32, #tpu.memory_space<vmem>>, %arg1: memref<25x4xf32, #tpu.memory_space<vmem>>, %arg2: memref<1x4xf32, #tpu.memory_space<vmem>>, %arg3: memref<25x4x16xf32, #tpu.memory_space<vmem>>, %arg4: memref<1x16xf32, #tpu.memory_space<vmem>>, %arg5: memref<9x16x20xf32, #tpu.memory_space<vmem>>, %arg6: memref<1x20xf32, #tpu.memory_space<vmem>>, %arg7: memref<9x20x22xf32, #tpu.memory_space<vmem>>, %arg8: memref<1x22xf32, #tpu.memory_space<vmem>>, %arg9: memref<2x88xf32, #tpu.memory_space<vmem>>, %arg10: memref<4x4x2x5x5x4xf32, #tpu.memory_space<vmem>>, %arg11: memref<2x6x6x16xf32, #tpu.memory_space<vmem>>, %arg12: memref<2x6x6x20xf32, #tpu.memory_space<vmem>>) attributes {dimension_semantics = [], scalar_prefetch = 0 : i64, scratch_operands = 3 : i64, tpu.core_type = #tpu.core_type<tc>} {
    %c0 = arith.constant 0 : index
    %c0_0 = arith.constant 0 : index
    %0 = vector.load %arg0[%c0, %c0_0] : memref<512x25xf32, #tpu.memory_space<vmem>>, vector<512x25xf32>
    %c0_1 = arith.constant 0 : index
    %c0_2 = arith.constant 0 : index
    %1 = vector.load %arg1[%c0_1, %c0_2] : memref<25x4xf32, #tpu.memory_space<vmem>>, vector<25x4xf32>
    %cst = arith.constant dense<0.000000e+00> : vector<512x4xf32>
    %2 = tpu.matmul %0, %1, %cst {dimension_numbers = #tpu.dot_dimension_numbers<[1], [0], [0], [1], [0, 0, 1, 1], [], []>} : vector<512x25xf32>, vector<25x4xf32>, vector<512x4xf32> -> vector<512x4xf32>
    %c0_3 = arith.constant 0 : index
    %c0_4 = arith.constant 0 : index
    %3 = vector.load %arg2[%c0_3, %c0_4] : memref<1x4xf32, #tpu.memory_space<vmem>>, vector<1x4xf32>
    %4 = vector.shape_cast %3 : vector<1x4xf32> to vector<1x4xf32>
    %5 = vector.broadcast %4 : vector<1x4xf32> to vector<512x4xf32>
    %6 = arith.addf %2, %5 : vector<512x4xf32>
    %cst_5 = arith.constant 0.000000e+00 : f32
    %7 = vector.broadcast %cst_5 : f32 to vector<512x4xf32>
    %8 = arith.cmpf ogt, %6, %7 : vector<512x4xf32>
    %cst_6 = arith.constant 5.000000e-02 : f32
    %9 = vector.broadcast %cst_6 : f32 to vector<512x4xf32>
    %10 = arith.mulf %9, %6 : vector<512x4xf32>
    %11 = arith.select %8, %6, %10 : vector<512x4xi1>, vector<512x4xf32>
    %12 = vector.shape_cast %11 : vector<512x4xf32> to vector<4x4x2x4x4x4xf32>
    %cst_7 = arith.constant 0.000000e+00 : f32
    %13 = vector.broadcast %cst_7 : f32 to vector<2x4x2x1x5x4xf32>
    %c0_8 = arith.constant 0 : index
    %c0_9 = arith.constant 0 : index
    %c0_10 = arith.constant 0 : index
    %c0_11 = arith.constant 0 : index
    %c0_12 = arith.constant 0 : index
    %c0_13 = arith.constant 0 : index
    %14 = vector.load %arg10[%c0_8, %c0_9, %c0_10, %c0_11, %c0_12, %c0_13] : memref<4x4x2x5x5x4xf32, #tpu.memory_space<vmem>>, vector<2x4x2x1x5x4xf32>
    tpu.vector_store %arg10[%c0_8, %c0_9, %c0_10, %c0_11, %c0_12, %c0_13], %13 {strides = array<i32>} : memref<4x4x2x5x5x4xf32, #tpu.memory_space<vmem>>, vector<2x4x2x1x5x4xf32>,
    %cst_14 = arith.constant 0.000000e+00 : f32
    %15 = vector.broadcast %cst_14 : f32 to vector<2x4x2x1x5x4xf32>
    %c2 = arith.constant 2 : index
    %c0_15 = arith.constant 0 : index
    %c0_16 = arith.constant 0 : index
    %c4 = arith.constant 4 : index
    %c0_17 = arith.constant 0 : index
    %c0_18 = arith.constant 0 : index
    %16 = vector.load %arg10[%c2, %c0_15, %c0_16, %c4, %c0_17, %c0_18] : memref<4x4x2x5x5x4xf32, #tpu.memory_space<vmem>>, vector<2x4x2x1x5x4xf32>
    tpu.vector_store %arg10[%c2, %c0_15, %c0_16, %c4, %c0_17, %c0_18], %15 {strides = array<i32>} : memref<4x4x2x5x5x4xf32, #tpu.memory_space<vmem>>, vector<2x4x2x1x5x4xf32>,
    %cst_19 = arith.constant 0.000000e+00 : f32
    %17 = vector.broadcast %cst_19 : f32 to vector<4x2x2x5x1x4xf32>
    %c0_20 = arith.constant 0 : index
    %c0_21 = arith.constant 0 : index
    %c0_22 = arith.constant 0 : index
    %c0_23 = arith.constant 0 : index
    %c0_24 = arith.constant 0 : index
    %c0_25 = arith.constant 0 : index
    %18 = vector.load %arg10[%c0_20, %c0_21, %c0_22, %c0_23, %c0_24, %c0_25] : memref<4x4x2x5x5x4xf32, #tpu.memory_space<vmem>>, vector<4x2x2x5x1x4xf32>
    tpu.vector_store %arg10[%c0_20, %c0_21, %c0_22, %c0_23, %c0_24, %c0_25], %17 {strides = array<i32>} : memref<4x4x2x5x5x4xf32, #tpu.memory_space<vmem>>, vector<4x2x2x5x1x4xf32>,
    %cst_26 = arith.constant 0.000000e+00 : f32
    %19 = vector.broadcast %cst_26 : f32 to vector<4x2x2x5x1x4xf32>
    %c0_27 = arith.constant 0 : index
    %c2_28 = arith.constant 2 : index
    %c0_29 = arith.constant 0 : index
    %c0_30 = arith.constant 0 : index
    %c4_31 = arith.constant 4 : index
    %c0_32 = arith.constant 0 : index
    %20 = vector.load %arg10[%c0_27, %c2_28, %c0_29, %c0_30, %c4_31, %c0_32] : memref<4x4x2x5x5x4xf32, #tpu.memory_space<vmem>>, vector<4x2x2x5x1x4xf32>
    tpu.vector_store %arg10[%c0_27, %c2_28, %c0_29, %c0_30, %c4_31, %c0_32], %19 {strides = array<i32>} : memref<4x4x2x5x5x4xf32, #tpu.memory_space<vmem>>, vector<4x2x2x5x1x4xf32>,
    %21 = vector.extract_strided_slice %12 {offsets = [0, 0, 0, 0, 0, 0], sizes = [1, 1, 2, 4, 4, 4], strides = [1, 1, 1, 1, 1, 1]} : vector<4x4x2x4x4x4xf32> to vector<1x1x2x4x4x4xf32>
    %22 = vector.shape_cast %21 : vector<1x1x2x4x4x4xf32> to vector<2x4x4x4xf32>
    %c2_33 = arith.constant 2 : index
    %c2_34 = arith.constant 2 : index
    %c0_35 = arith.constant 0 : index
    %c0_36 = arith.constant 0 : index
    %c0_37 = arith.constant 0 : index
    %c0_38 = arith.constant 0 : index
    %23 = vector.load %arg10[%c2_33, %c2_34, %c0_35, %c0_36, %c0_37, %c0_38] : memref<4x4x2x5x5x4xf32, #tpu.memory_space<vmem>>, vector<1x1x2x4x4x4xf32>
    %24 = vector.shape_cast %23 : vector<1x1x2x4x4x4xf32> to vector<2x4x4x4xf32>
    %25 = vector.shape_cast %22 : vector<2x4x4x4xf32> to vector<1x1x2x4x4x4xf32>
    tpu.vector_store %arg10[%c2_33, %c2_34, %c0_35, %c0_36, %c0_37, %c0_38], %25 {strides = array<i32>} : memref<4x4x2x5x5x4xf32, #tpu.memory_space<vmem>>, vector<1x1x2x4x4x4xf32>,
    %26 = vector.extract_strided_slice %12 {offsets = [0, 1, 0, 0, 0, 0], sizes = [1, 1, 2, 4, 4, 4], strides = [1, 1, 1, 1, 1, 1]} : vector<4x4x2x4x4x4xf32> to vector<1x1x2x4x4x4xf32>
    %27 = vector.shape_cast %26 : vector<1x1x2x4x4x4xf32> to vector<2x4x4x4xf32>
    %c2_39 = arith.constant 2 : index
    %c3 = arith.constant 3 : index
    %c0_40 = arith.constant 0 : index
    %c0_41 = arith.constant 0 : index
    %c0_42 = arith.constant 0 : index
    %c0_43 = arith.constant 0 : index
    %28 = vector.load %arg10[%c2_39, %c3, %c0_40, %c0_41, %c0_42, %c0_43] : memref<4x4x2x5x5x4xf32, #tpu.memory_space<vmem>>, vector<1x1x2x4x4x4xf32>
    %29 = vector.shape_cast %28 : vector<1x1x2x4x4x4xf32> to vector<2x4x4x4xf32>
    %30 = vector.shape_cast %27 : vector<2x4x4x4xf32> to vector<1x1x2x4x4x4xf32>
    tpu.vector_store %arg10[%c2_39, %c3, %c0_40, %c0_41, %c0_42, %c0_43], %30 {strides = array<i32>} : memref<4x4x2x5x5x4xf32, #tpu.memory_space<vmem>>, vector<1x1x2x4x4x4xf32>,
    %31 = vector.extract_strided_slice %12 {offsets = [0, 2, 0, 0, 0, 0], sizes = [1, 1, 2, 4, 4, 4], strides = [1, 1, 1, 1, 1, 1]} : vector<4x4x2x4x4x4xf32> to vector<1x1x2x4x4x4xf32>
    %32 = vector.shape_cast %31 : vector<1x1x2x4x4x4xf32> to vector<2x4x4x4xf32>
    %c2_44 = arith.constant 2 : index
    %c0_45 = arith.constant 0 : index
    %c0_46 = arith.constant 0 : index
    %c0_47 = arith.constant 0 : index
    %c1 = arith.constant 1 : index
    %c0_48 = arith.constant 0 : index
    %33 = vector.load %arg10[%c2_44, %c0_45, %c0_46, %c0_47, %c1, %c0_48] : memref<4x4x2x5x5x4xf32, #tpu.memory_space<vmem>>, vector<1x1x2x4x4x4xf32>
    %34 = vector.shape_cast %33 : vector<1x1x2x4x4x4xf32> to vector<2x4x4x4xf32>
    %35 = vector.shape_cast %32 : vector<2x4x4x4xf32> to vector<1x1x2x4x4x4xf32>
    tpu.vector_store %arg10[%c2_44, %c0_45, %c0_46, %c0_47, %c1, %c0_48], %35 {strides = array<i32>} : memref<4x4x2x5x5x4xf32, #tpu.memory_space<vmem>>, vector<1x1x2x4x4x4xf32>,
    %36 = vector.extract_strided_slice %12 {offsets = [0, 3, 0, 0, 0, 0], sizes = [1, 1, 2, 4, 4, 4], strides = [1, 1, 1, 1, 1, 1]} : vector<4x4x2x4x4x4xf32> to vector<1x1x2x4x4x4xf32>
    %37 = vector.shape_cast %36 : vector<1x1x2x4x4x4xf32> to vector<2x4x4x4xf32>
    %c2_49 = arith.constant 2 : index
    %c1_50 = arith.constant 1 : index
    %c0_51 = arith.constant 0 : index
    %c0_52 = arith.constant 0 : index
    %c1_53 = arith.constant 1 : index
    %c0_54 = arith.constant 0 : index
    %38 = vector.load %arg10[%c2_49, %c1_50, %c0_51, %c0_52, %c1_53, %c0_54] : memref<4x4x2x5x5x4xf32, #tpu.memory_space<vmem>>, vector<1x1x2x4x4x4xf32>
    %39 = vector.shape_cast %38 : vector<1x1x2x4x4x4xf32> to vector<2x4x4x4xf32>
    %40 = vector.shape_cast %37 : vector<2x4x4x4xf32> to vector<1x1x2x4x4x4xf32>
    tpu.vector_store %arg10[%c2_49, %c1_50, %c0_51, %c0_52, %c1_53, %c0_54], %40 {strides = array<i32>} : memref<4x4x2x5x5x4xf32, #tpu.memory_space<vmem>>, vector<1x1x2x4x4x4xf32>,
    %41 = vector.extract_strided_slice %12 {offsets = [1, 0, 0, 0, 0, 0], sizes = [1, 1, 2, 4, 4, 4], strides = [1, 1, 1, 1, 1, 1]} : vector<4x4x2x4x4x4xf32> to vector<1x1x2x4x4x4xf32>
    %42 = vector.shape_cast %41 : vector<1x1x2x4x4x4xf32> to vector<2x4x4x4xf32>
    %c3_55 = arith.constant 3 : index
    %c2_56 = arith.constant 2 : index
    %c0_57 = arith.constant 0 : index
    %c0_58 = arith.constant 0 : index
    %c0_59 = arith.constant 0 : index
    %c0_60 = arith.constant 0 : index
    %43 = vector.load %arg10[%c3_55, %c2_56, %c0_57, %c0_58, %c0_59, %c0_60] : memref<4x4x2x5x5x4xf32, #tpu.memory_space<vmem>>, vector<1x1x2x4x4x4xf32>
    %44 = vector.shape_cast %43 : vector<1x1x2x4x4x4xf32> to vector<2x4x4x4xf32>
    %45 = vector.shape_cast %42 : vector<2x4x4x4xf32> to vector<1x1x2x4x4x4xf32>
    tpu.vector_store %arg10[%c3_55, %c2_56, %c0_57, %c0_58, %c0_59, %c0_60], %45 {strides = array<i32>} : memref<4x4x2x5x5x4xf32, #tpu.memory_space<vmem>>, vector<1x1x2x4x4x4xf32>,
    %46 = vector.extract_strided_slice %12 {offsets = [1, 1, 0, 0, 0, 0], sizes = [1, 1, 2, 4, 4, 4], strides = [1, 1, 1, 1, 1, 1]} : vector<4x4x2x4x4x4xf32> to vector<1x1x2x4x4x4xf32>
    %47 = vector.shape_cast %46 : vector<1x1x2x4x4x4xf32> to vector<2x4x4x4xf32>
    %c3_61 = arith.constant 3 : index
    %c3_62 = arith.constant 3 : index
    %c0_63 = arith.constant 0 : index
    %c0_64 = arith.constant 0 : index
    %c0_65 = arith.constant 0 : index
    %c0_66 = arith.constant 0 : index
    %48 = vector.load %arg10[%c3_61, %c3_62, %c0_63, %c0_64, %c0_65, %c0_66] : memref<4x4x2x5x5x4xf32, #tpu.memory_space<vmem>>, vector<1x1x2x4x4x4xf32>
    %49 = vector.shape_cast %48 : vector<1x1x2x4x4x4xf32> to vector<2x4x4x4xf32>
    %50 = vector.shape_cast %47 : vector<2x4x4x4xf32> to vector<1x1x2x4x4x4xf32>
    tpu.vector_store %arg10[%c3_61, %c3_62, %c0_63, %c0_64, %c0_65, %c0_66], %50 {strides = array<i32>} : memref<4x4x2x5x5x4xf32, #tpu.memory_space<vmem>>, vector<1x1x2x4x4x4xf32>,
    %51 = vector.extract_strided_slice %12 {offsets = [1, 2, 0, 0, 0, 0], sizes = [1, 1, 2, 4, 4, 4], strides = [1, 1, 1, 1, 1, 1]} : vector<4x4x2x4x4x4xf32> to vector<1x1x2x4x4x4xf32>
    %52 = vector.shape_cast %51 : vector<1x1x2x4x4x4xf32> to vector<2x4x4x4xf32>
    %c3_67 = arith.constant 3 : index
    %c0_68 = arith.constant 0 : index
    %c0_69 = arith.constant 0 : index
    %c0_70 = arith.constant 0 : index
    %c1_71 = arith.constant 1 : index
    %c0_72 = arith.constant 0 : index
    %53 = vector.load %arg10[%c3_67, %c0_68, %c0_69, %c0_70, %c1_71, %c0_72] : memref<4x4x2x5x5x4xf32, #tpu.memory_space<vmem>>, vector<1x1x2x4x4x4xf32>
    %54 = vector.shape_cast %53 : vector<1x1x2x4x4x4xf32> to vector<2x4x4x4xf32>
    %55 = vector.shape_cast %52 : vector<2x4x4x4xf32> to vector<1x1x2x4x4x4xf32>
    tpu.vector_store %arg10[%c3_67, %c0_68, %c0_69, %c0_70, %c1_71, %c0_72], %55 {strides = array<i32>} : memref<4x4x2x5x5x4xf32, #tpu.memory_space<vmem>>, vector<1x1x2x4x4x4xf32>,
    %56 = vector.extract_strided_slice %12 {offsets = [1, 3, 0, 0, 0, 0], sizes = [1, 1, 2, 4, 4, 4], strides = [1, 1, 1, 1, 1, 1]} : vector<4x4x2x4x4x4xf32> to vector<1x1x2x4x4x4xf32>
    %57 = vector.shape_cast %56 : vector<1x1x2x4x4x4xf32> to vector<2x4x4x4xf32>
    %c3_73 = arith.constant 3 : index
    %c1_74 = arith.constant 1 : index
    %c0_75 = arith.constant 0 : index
    %c0_76 = arith.constant 0 : index
    %c1_77 = arith.constant 1 : index
    %c0_78 = arith.constant 0 : index
    %58 = vector.load %arg10[%c3_73, %c1_74, %c0_75, %c0_76, %c1_77, %c0_78] : memref<4x4x2x5x5x4xf32, #tpu.memory_space<vmem>>, vector<1x1x2x4x4x4xf32>
    %59 = vector.shape_cast %58 : vector<1x1x2x4x4x4xf32> to vector<2x4x4x4xf32>
    %60 = vector.shape_cast %57 : vector<2x4x4x4xf32> to vector<1x1x2x4x4x4xf32>
    tpu.vector_store %arg10[%c3_73, %c1_74, %c0_75, %c0_76, %c1_77, %c0_78], %60 {strides = array<i32>} : memref<4x4x2x5x5x4xf32, #tpu.memory_space<vmem>>, vector<1x1x2x4x4x4xf32>,
    %61 = vector.extract_strided_slice %12 {offsets = [2, 0, 0, 0, 0, 0], sizes = [1, 1, 2, 4, 4, 4], strides = [1, 1, 1, 1, 1, 1]} : vector<4x4x2x4x4x4xf32> to vector<1x1x2x4x4x4xf32>
    %62 = vector.shape_cast %61 : vector<1x1x2x4x4x4xf32> to vector<2x4x4x4xf32>
    %c0_79 = arith.constant 0 : index
    %c2_80 = arith.constant 2 : index
    %c0_81 = arith.constant 0 : index
    %c1_82 = arith.constant 1 : index
    %c0_83 = arith.constant 0 : index
    %c0_84 = arith.constant 0 : index
    %63 = vector.load %arg10[%c0_79, %c2_80, %c0_81, %c1_82, %c0_83, %c0_84] : memref<4x4x2x5x5x4xf32, #tpu.memory_space<vmem>>, vector<1x1x2x4x4x4xf32>
    %64 = vector.shape_cast %63 : vector<1x1x2x4x4x4xf32> to vector<2x4x4x4xf32>
    %65 = vector.shape_cast %62 : vector<2x4x4x4xf32> to vector<1x1x2x4x4x4xf32>
    tpu.vector_store %arg10[%c0_79, %c2_80, %c0_81, %c1_82, %c0_83, %c0_84], %65 {strides = array<i32>} : memref<4x4x2x5x5x4xf32, #tpu.memory_space<vmem>>, vector<1x1x2x4x4x4xf32>,
    %66 = vector.extract_strided_slice %12 {offsets = [2, 1, 0, 0, 0, 0], sizes = [1, 1, 2, 4, 4, 4], strides = [1, 1, 1, 1, 1, 1]} : vector<4x4x2x4x4x4xf32> to vector<1x1x2x4x4x4xf32>
    %67 = vector.shape_cast %66 : vector<1x1x2x4x4x4xf32> to vector<2x4x4x4xf32>
    %c0_85 = arith.constant 0 : index
    %c3_86 = arith.constant 3 : index
    %c0_87 = arith.constant 0 : index
    %c1_88 = arith.constant 1 : index
    %c0_89 = arith.constant 0 : index
    %c0_90 = arith.constant 0 : index
    %68 = vector.load %arg10[%c0_85, %c3_86, %c0_87, %c1_88, %c0_89, %c0_90] : memref<4x4x2x5x5x4xf32, #tpu.memory_space<vmem>>, vector<1x1x2x4x4x4xf32>
    %69 = vector.shape_cast %68 : vector<1x1x2x4x4x4xf32> to vector<2x4x4x4xf32>
    %70 = vector.shape_cast %67 : vector<2x4x4x4xf32> to vector<1x1x2x4x4x4xf32>
    tpu.vector_store %arg10[%c0_85, %c3_86, %c0_87, %c1_88, %c0_89, %c0_90], %70 {strides = array<i32>} : memref<4x4x2x5x5x4xf32, #tpu.memory_space<vmem>>, vector<1x1x2x4x4x4xf32>,
    %71 = vector.extract_strided_slice %12 {offsets = [2, 2, 0, 0, 0, 0], sizes = [1, 1, 2, 4, 4, 4], strides = [1, 1, 1, 1, 1, 1]} : vector<4x4x2x4x4x4xf32> to vector<1x1x2x4x4x4xf32>
    %72 = vector.shape_cast %71 : vector<1x1x2x4x4x4xf32> to vector<2x4x4x4xf32>
    %c0_91 = arith.constant 0 : index
    %c0_92 = arith.constant 0 : index
    %c0_93 = arith.constant 0 : index
    %c1_94 = arith.constant 1 : index
    %c1_95 = arith.constant 1 : index
    %c0_96 = arith.constant 0 : index
    %73 = vector.load %arg10[%c0_91, %c0_92, %c0_93, %c1_94, %c1_95, %c0_96] : memref<4x4x2x5x5x4xf32, #tpu.memory_space<vmem>>, vector<1x1x2x4x4x4xf32>
    %74 = vector.shape_cast %73 : vector<1x1x2x4x4x4xf32> to vector<2x4x4x4xf32>
    %75 = vector.shape_cast %72 : vector<2x4x4x4xf32> to vector<1x1x2x4x4x4xf32>
    tpu.vector_store %arg10[%c0_91, %c0_92, %c0_93, %c1_94, %c1_95, %c0_96], %75 {strides = array<i32>} : memref<4x4x2x5x5x4xf32, #tpu.memory_space<vmem>>, vector<1x1x2x4x4x4xf32>,
    %76 = vector.extract_strided_slice %12 {offsets = [2, 3, 0, 0, 0, 0], sizes = [1, 1, 2, 4, 4, 4], strides = [1, 1, 1, 1, 1, 1]} : vector<4x4x2x4x4x4xf32> to vector<1x1x2x4x4x4xf32>
    %77 = vector.shape_cast %76 : vector<1x1x2x4x4x4xf32> to vector<2x4x4x4xf32>
    %c0_97 = arith.constant 0 : index
    %c1_98 = arith.constant 1 : index
    %c0_99 = arith.constant 0 : index
    %c1_100 = arith.constant 1 : index
    %c1_101 = arith.constant 1 : index
    %c0_102 = arith.constant 0 : index
    %78 = vector.load %arg10[%c0_97, %c1_98, %c0_99, %c1_100, %c1_101, %c0_102] : memref<4x4x2x5x5x4xf32, #tpu.memory_space<vmem>>, vector<1x1x2x4x4x4xf32>
    %79 = vector.shape_cast %78 : vector<1x1x2x4x4x4xf32> to vector<2x4x4x4xf32>
    %80 = vector.shape_cast %77 : vector<2x4x4x4xf32> to vector<1x1x2x4x4x4xf32>
    tpu.vector_store %arg10[%c0_97, %c1_98, %c0_99, %c1_100, %c1_101, %c0_102], %80 {strides = array<i32>} : memref<4x4x2x5x5x4xf32, #tpu.memory_space<vmem>>, vector<1x1x2x4x4x4xf32>,
    %81 = vector.extract_strided_slice %12 {offsets = [3, 0, 0, 0, 0, 0], sizes = [1, 1, 2, 4, 4, 4], strides = [1, 1, 1, 1, 1, 1]} : vector<4x4x2x4x4x4xf32> to vector<1x1x2x4x4x4xf32>
    %82 = vector.shape_cast %81 : vector<1x1x2x4x4x4xf32> to vector<2x4x4x4xf32>
    %c1_103 = arith.constant 1 : index
    %c2_104 = arith.constant 2 : index
    %c0_105 = arith.constant 0 : index
    %c1_106 = arith.constant 1 : index
    %c0_107 = arith.constant 0 : index
    %c0_108 = arith.constant 0 : index
    %83 = vector.load %arg10[%c1_103, %c2_104, %c0_105, %c1_106, %c0_107, %c0_108] : memref<4x4x2x5x5x4xf32, #tpu.memory_space<vmem>>, vector<1x1x2x4x4x4xf32>
    %84 = vector.shape_cast %83 : vector<1x1x2x4x4x4xf32> to vector<2x4x4x4xf32>
    %85 = vector.shape_cast %82 : vector<2x4x4x4xf32> to vector<1x1x2x4x4x4xf32>
    tpu.vector_store %arg10[%c1_103, %c2_104, %c0_105, %c1_106, %c0_107, %c0_108], %85 {strides = array<i32>} : memref<4x4x2x5x5x4xf32, #tpu.memory_space<vmem>>, vector<1x1x2x4x4x4xf32>,
    %86 = vector.extract_strided_slice %12 {offsets = [3, 1, 0, 0, 0, 0], sizes = [1, 1, 2, 4, 4, 4], strides = [1, 1, 1, 1, 1, 1]} : vector<4x4x2x4x4x4xf32> to vector<1x1x2x4x4x4xf32>
    %87 = vector.shape_cast %86 : vector<1x1x2x4x4x4xf32> to vector<2x4x4x4xf32>
    %c1_109 = arith.constant 1 : index
    %c3_110 = arith.constant 3 : index
    %c0_111 = arith.constant 0 : index
    %c1_112 = arith.constant 1 : index
    %c0_113 = arith.constant 0 : index
    %c0_114 = arith.constant 0 : index
    %88 = vector.load %arg10[%c1_109, %c3_110, %c0_111, %c1_112, %c0_113, %c0_114] : memref<4x4x2x5x5x4xf32, #tpu.memory_space<vmem>>, vector<1x1x2x4x4x4xf32>
    %89 = vector.shape_cast %88 : vector<1x1x2x4x4x4xf32> to vector<2x4x4x4xf32>
    %90 = vector.shape_cast %87 : vector<2x4x4x4xf32> to vector<1x1x2x4x4x4xf32>
    tpu.vector_store %arg10[%c1_109, %c3_110, %c0_111, %c1_112, %c0_113, %c0_114], %90 {strides = array<i32>} : memref<4x4x2x5x5x4xf32, #tpu.memory_space<vmem>>, vector<1x1x2x4x4x4xf32>,
    %91 = vector.extract_strided_slice %12 {offsets = [3, 2, 0, 0, 0, 0], sizes = [1, 1, 2, 4, 4, 4], strides = [1, 1, 1, 1, 1, 1]} : vector<4x4x2x4x4x4xf32> to vector<1x1x2x4x4x4xf32>
    %92 = vector.shape_cast %91 : vector<1x1x2x4x4x4xf32> to vector<2x4x4x4xf32>
    %c1_115 = arith.constant 1 : index
    %c0_116 = arith.constant 0 : index
    %c0_117 = arith.constant 0 : index
    %c1_118 = arith.constant 1 : index
    %c1_119 = arith.constant 1 : index
    %c0_120 = arith.constant 0 : index
    %93 = vector.load %arg10[%c1_115, %c0_116, %c0_117, %c1_118, %c1_119, %c0_120] : memref<4x4x2x5x5x4xf32, #tpu.memory_space<vmem>>, vector<1x1x2x4x4x4xf32>
    %94 = vector.shape_cast %93 : vector<1x1x2x4x4x4xf32> to vector<2x4x4x4xf32>
    %95 = vector.shape_cast %92 : vector<2x4x4x4xf32> to vector<1x1x2x4x4x4xf32>
    tpu.vector_store %arg10[%c1_115, %c0_116, %c0_117, %c1_118, %c1_119, %c0_120], %95 {strides = array<i32>} : memref<4x4x2x5x5x4xf32, #tpu.memory_space<vmem>>, vector<1x1x2x4x4x4xf32>,
    %96 = vector.extract_strided_slice %12 {offsets = [3, 3, 0, 0, 0, 0], sizes = [1, 1, 2, 4, 4, 4], strides = [1, 1, 1, 1, 1, 1]} : vector<4x4x2x4x4x4xf32> to vector<1x1x2x4x4x4xf32>
    %97 = vector.shape_cast %96 : vector<1x1x2x4x4x4xf32> to vector<2x4x4x4xf32>
    %c1_121 = arith.constant 1 : index
    %c1_122 = arith.constant 1 : index
    %c0_123 = arith.constant 0 : index
    %c1_124 = arith.constant 1 : index
    %c1_125 = arith.constant 1 : index
    %c0_126 = arith.constant 0 : index
    %98 = vector.load %arg10[%c1_121, %c1_122, %c0_123, %c1_124, %c1_125, %c0_126] : memref<4x4x2x5x5x4xf32, #tpu.memory_space<vmem>>, vector<1x1x2x4x4x4xf32>
    %99 = vector.shape_cast %98 : vector<1x1x2x4x4x4xf32> to vector<2x4x4x4xf32>
    %100 = vector.shape_cast %97 : vector<2x4x4x4xf32> to vector<1x1x2x4x4x4xf32>
    tpu.vector_store %arg10[%c1_121, %c1_122, %c0_123, %c1_124, %c1_125, %c0_126], %100 {strides = array<i32>} : memref<4x4x2x5x5x4xf32, #tpu.memory_space<vmem>>, vector<1x1x2x4x4x4xf32>,
    %c0_127 = arith.constant 0 : index
    %c0_128 = arith.constant 0 : index
    %101 = vector.load %arg4[%c0_127, %c0_128] : memref<1x16xf32, #tpu.memory_space<vmem>>, vector<1x16xf32>
    %102 = vector.shape_cast %101 : vector<1x16xf32> to vector<1x16xf32>
    %103 = vector.broadcast %102 : vector<1x16xf32> to vector<32x16xf32>
    %c0_129 = arith.constant 0 : index
    %c0_130 = arith.constant 0 : index
    %c0_131 = arith.constant 0 : index
    %c0_132 = arith.constant 0 : index
    %c0_133 = arith.constant 0 : index
    %c0_134 = arith.constant 0 : index
    %104 = vector.load %arg10[%c0_129, %c0_130, %c0_131, %c0_132, %c0_133, %c0_134] : memref<4x4x2x5x5x4xf32, #tpu.memory_space<vmem>>, vector<1x1x2x4x4x4xf32>
    %105 = vector.shape_cast %104 : vector<1x1x2x4x4x4xf32> to vector<2x4x4x4xf32>
    %106 = vector.shape_cast %105 : vector<2x4x4x4xf32> to vector<32x4xf32>
    %c0_135 = arith.constant 0 : index
    %c0_136 = arith.constant 0 : index
    %c0_137 = arith.constant 0 : index
    %107 = vector.load %arg3[%c0_135, %c0_136, %c0_137] : memref<25x4x16xf32, #tpu.memory_space<vmem>>, vector<1x4x16xf32>
    %108 = vector.shape_cast %107 : vector<1x4x16xf32> to vector<4x16xf32>
    %cst_138 = arith.constant dense<0.000000e+00> : vector<32x16xf32>
    %109 = tpu.matmul %106, %108, %cst_138 {dimension_numbers = #tpu.dot_dimension_numbers<[1], [0], [0], [1], [0, 0, 1, 1], [], []>} : vector<32x4xf32>, vector<4x16xf32>, vector<32x16xf32> -> vector<32x16xf32>
    %110 = arith.addf %103, %109 : vector<32x16xf32>
    %c0_139 = arith.constant 0 : index
    %c1_140 = arith.constant 1 : index
    %c0_141 = arith.constant 0 : index
    %c0_142 = arith.constant 0 : index
    %c0_143 = arith.constant 0 : index
    %c0_144 = arith.constant 0 : index
    %111 = vector.load %arg10[%c0_139, %c1_140, %c0_141, %c0_142, %c0_143, %c0_144] : memref<4x4x2x5x5x4xf32, #tpu.memory_space<vmem>>, vector<1x1x2x4x4x4xf32>
    %112 = vector.shape_cast %111 : vector<1x1x2x4x4x4xf32> to vector<2x4x4x4xf32>
    %113 = vector.shape_cast %112 : vector<2x4x4x4xf32> to vector<32x4xf32>
    %c1_145 = arith.constant 1 : index
    %c0_146 = arith.constant 0 : index
    %c0_147 = arith.constant 0 : index
    %114 = vector.load %arg3[%c1_145, %c0_146, %c0_147] : memref<25x4x16xf32, #tpu.memory_space<vmem>>, vector<1x4x16xf32>
    %115 = vector.shape_cast %114 : vector<1x4x16xf32> to vector<4x16xf32>
    %cst_148 = arith.constant dense<0.000000e+00> : vector<32x16xf32>
    %116 = tpu.matmul %113, %115, %cst_148 {dimension_numbers = #tpu.dot_dimension_numbers<[1], [0], [0], [1], [0, 0, 1, 1], [], []>} : vector<32x4xf32>, vector<4x16xf32>, vector<32x16xf32> -> vector<32x16xf32>
    %117 = arith.addf %110, %116 : vector<32x16xf32>
    %c0_149 = arith.constant 0 : index
    %c2_150 = arith.constant 2 : index
    %c0_151 = arith.constant 0 : index
    %c0_152 = arith.constant 0 : index
    %c0_153 = arith.constant 0 : index
    %c0_154 = arith.constant 0 : index
    %118 = vector.load %arg10[%c0_149, %c2_150, %c0_151, %c0_152, %c0_153, %c0_154] : memref<4x4x2x5x5x4xf32, #tpu.memory_space<vmem>>, vector<1x1x2x4x4x4xf32>
    %119 = vector.shape_cast %118 : vector<1x1x2x4x4x4xf32> to vector<2x4x4x4xf32>
    %120 = vector.shape_cast %119 : vector<2x4x4x4xf32> to vector<32x4xf32>
    %c2_155 = arith.constant 2 : index
    %c0_156 = arith.constant 0 : index
    %c0_157 = arith.constant 0 : index
    %121 = vector.load %arg3[%c2_155, %c0_156, %c0_157] : memref<25x4x16xf32, #tpu.memory_space<vmem>>, vector<1x4x16xf32>
    %122 = vector.shape_cast %121 : vector<1x4x16xf32> to vector<4x16xf32>
    %cst_158 = arith.constant dense<0.000000e+00> : vector<32x16xf32>
    %123 = tpu.matmul %120, %122, %cst_158 {dimension_numbers = #tpu.dot_dimension_numbers<[1], [0], [0], [1], [0, 0, 1, 1], [], []>} : vector<32x4xf32>, vector<4x16xf32>, vector<32x16xf32> -> vector<32x16xf32>
    %124 = arith.addf %117, %123 : vector<32x16xf32>
    %c0_159 = arith.constant 0 : index
    %c3_160 = arith.constant 3 : index
    %c0_161 = arith.constant 0 : index
    %c0_162 = arith.constant 0 : index
    %c0_163 = arith.constant 0 : index
    %c0_164 = arith.constant 0 : index
    %125 = vector.load %arg10[%c0_159, %c3_160, %c0_161, %c0_162, %c0_163, %c0_164] : memref<4x4x2x5x5x4xf32, #tpu.memory_space<vmem>>, vector<1x1x2x4x4x4xf32>
    %126 = vector.shape_cast %125 : vector<1x1x2x4x4x4xf32> to vector<2x4x4x4xf32>
    %127 = vector.shape_cast %126 : vector<2x4x4x4xf32> to vector<32x4xf32>
    %c3_165 = arith.constant 3 : index
    %c0_166 = arith.constant 0 : index
    %c0_167 = arith.constant 0 : index
    %128 = vector.load %arg3[%c3_165, %c0_166, %c0_167] : memref<25x4x16xf32, #tpu.memory_space<vmem>>, vector<1x4x16xf32>
    %129 = vector.shape_cast %128 : vector<1x4x16xf32> to vector<4x16xf32>
    %cst_168 = arith.constant dense<0.000000e+00> : vector<32x16xf32>
    %130 = tpu.matmul %127, %129, %cst_168 {dimension_numbers = #tpu.dot_dimension_numbers<[1], [0], [0], [1], [0, 0, 1, 1], [], []>} : vector<32x4xf32>, vector<4x16xf32>, vector<32x16xf32> -> vector<32x16xf32>
    %131 = arith.addf %124, %130 : vector<32x16xf32>
    %c0_169 = arith.constant 0 : index
    %c0_170 = arith.constant 0 : index
    %c0_171 = arith.constant 0 : index
    %c0_172 = arith.constant 0 : index
    %c1_173 = arith.constant 1 : index
    %c0_174 = arith.constant 0 : index
    %132 = vector.load %arg10[%c0_169, %c0_170, %c0_171, %c0_172, %c1_173, %c0_174] : memref<4x4x2x5x5x4xf32, #tpu.memory_space<vmem>>, vector<1x1x2x4x4x4xf32>
    %133 = vector.shape_cast %132 : vector<1x1x2x4x4x4xf32> to vector<2x4x4x4xf32>
    %134 = vector.shape_cast %133 : vector<2x4x4x4xf32> to vector<32x4xf32>
    %c4_175 = arith.constant 4 : index
    %c0_176 = arith.constant 0 : index
    %c0_177 = arith.constant 0 : index
    %135 = vector.load %arg3[%c4_175, %c0_176, %c0_177] : memref<25x4x16xf32, #tpu.memory_space<vmem>>, vector<1x4x16xf32>
    %136 = vector.shape_cast %135 : vector<1x4x16xf32> to vector<4x16xf32>
    %cst_178 = arith.constant dense<0.000000e+00> : vector<32x16xf32>
    %137 = tpu.matmul %134, %136, %cst_178 {dimension_numbers = #tpu.dot_dimension_numbers<[1], [0], [0], [1], [0, 0, 1, 1], [], []>} : vector<32x4xf32>, vector<4x16xf32>, vector<32x16xf32> -> vector<32x16xf32>
    %138 = arith.addf %131, %137 : vector<32x16xf32>
    %c1_179 = arith.constant 1 : index
    %c0_180 = arith.constant 0 : index
    %c0_181 = arith.constant 0 : index
    %c0_182 = arith.constant 0 : index
    %c0_183 = arith.constant 0 : index
    %c0_184 = arith.constant 0 : index
    %139 = vector.load %arg10[%c1_179, %c0_180, %c0_181, %c0_182, %c0_183, %c0_184] : memref<4x4x2x5x5x4xf32, #tpu.memory_space<vmem>>, vector<1x1x2x4x4x4xf32>
    %140 = vector.shape_cast %139 : vector<1x1x2x4x4x4xf32> to vector<2x4x4x4xf32>
    %141 = vector.shape_cast %140 : vector<2x4x4x4xf32> to vector<32x4xf32>
    %c5 = arith.constant 5 : index
    %c0_185 = arith.constant 0 : index
    %c0_186 = arith.constant 0 : index
    %142 = vector.load %arg3[%c5, %c0_185, %c0_186] : memref<25x4x16xf32, #tpu.memory_space<vmem>>, vector<1x4x16xf32>
    %143 = vector.shape_cast %142 : vector<1x4x16xf32> to vector<4x16xf32>
    %cst_187 = arith.constant dense<0.000000e+00> : vector<32x16xf32>
    %144 = tpu.matmul %141, %143, %cst_187 {dimension_numbers = #tpu.dot_dimension_numbers<[1], [0], [0], [1], [0, 0, 1, 1], [], []>} : vector<32x4xf32>, vector<4x16xf32>, vector<32x16xf32> -> vector<32x16xf32>
    %145 = arith.addf %138, %144 : vector<32x16xf32>
    %c1_188 = arith.constant 1 : index
    %c1_189 = arith.constant 1 : index
    %c0_190 = arith.constant 0 : index
    %c0_191 = arith.constant 0 : index
    %c0_192 = arith.constant 0 : index
    %c0_193 = arith.constant 0 : index
    %146 = vector.load %arg10[%c1_188, %c1_189, %c0_190, %c0_191, %c0_192, %c0_193] : memref<4x4x2x5x5x4xf32, #tpu.memory_space<vmem>>, vector<1x1x2x4x4x4xf32>
    %147 = vector.shape_cast %146 : vector<1x1x2x4x4x4xf32> to vector<2x4x4x4xf32>
    %148 = vector.shape_cast %147 : vector<2x4x4x4xf32> to vector<32x4xf32>
    %c6 = arith.constant 6 : index
    %c0_194 = arith.constant 0 : index
    %c0_195 = arith.constant 0 : index
    %149 = vector.load %arg3[%c6, %c0_194, %c0_195] : memref<25x4x16xf32, #tpu.memory_space<vmem>>, vector<1x4x16xf32>
    %150 = vector.shape_cast %149 : vector<1x4x16xf32> to vector<4x16xf32>
    %cst_196 = arith.constant dense<0.000000e+00> : vector<32x16xf32>
    %151 = tpu.matmul %148, %150, %cst_196 {dimension_numbers = #tpu.dot_dimension_numbers<[1], [0], [0], [1], [0, 0, 1, 1], [], []>} : vector<32x4xf32>, vector<4x16xf32>, vector<32x16xf32> -> vector<32x16xf32>
    %152 = arith.addf %145, %151 : vector<32x16xf32>
    %c1_197 = arith.constant 1 : index
    %c2_198 = arith.constant 2 : index
    %c0_199 = arith.constant 0 : index
    %c0_200 = arith.constant 0 : index
    %c0_201 = arith.constant 0 : index
    %c0_202 = arith.constant 0 : index
    %153 = vector.load %arg10[%c1_197, %c2_198, %c0_199, %c0_200, %c0_201, %c0_202] : memref<4x4x2x5x5x4xf32, #tpu.memory_space<vmem>>, vector<1x1x2x4x4x4xf32>
    %154 = vector.shape_cast %153 : vector<1x1x2x4x4x4xf32> to vector<2x4x4x4xf32>
    %155 = vector.shape_cast %154 : vector<2x4x4x4xf32> to vector<32x4xf32>
    %c7 = arith.constant 7 : index
    %c0_203 = arith.constant 0 : index
    %c0_204 = arith.constant 0 : index
    %156 = vector.load %arg3[%c7, %c0_203, %c0_204] : memref<25x4x16xf32, #tpu.memory_space<vmem>>, vector<1x4x16xf32>
    %157 = vector.shape_cast %156 : vector<1x4x16xf32> to vector<4x16xf32>
    %cst_205 = arith.constant dense<0.000000e+00> : vector<32x16xf32>
    %158 = tpu.matmul %155, %157, %cst_205 {dimension_numbers = #tpu.dot_dimension_numbers<[1], [0], [0], [1], [0, 0, 1, 1], [], []>} : vector<32x4xf32>, vector<4x16xf32>, vector<32x16xf32> -> vector<32x16xf32>
    %159 = arith.addf %152, %158 : vector<32x16xf32>
    %c1_206 = arith.constant 1 : index
    %c3_207 = arith.constant 3 : index
    %c0_208 = arith.constant 0 : index
    %c0_209 = arith.constant 0 : index
    %c0_210 = arith.constant 0 : index
    %c0_211 = arith.constant 0 : index
    %160 = vector.load %arg10[%c1_206, %c3_207, %c0_208, %c0_209, %c0_210, %c0_211] : memref<4x4x2x5x5x4xf32, #tpu.memory_space<vmem>>, vector<1x1x2x4x4x4xf32>
    %161 = vector.shape_cast %160 : vector<1x1x2x4x4x4xf32> to vector<2x4x4x4xf32>
    %162 = vector.shape_cast %161 : vector<2x4x4x4xf32> to vector<32x4xf32>
    %c8 = arith.constant 8 : index
    %c0_212 = arith.constant 0 : index
    %c0_213 = arith.constant 0 : index
    %163 = vector.load %arg3[%c8, %c0_212, %c0_213] : memref<25x4x16xf32, #tpu.memory_space<vmem>>, vector<1x4x16xf32>
    %164 = vector.shape_cast %163 : vector<1x4x16xf32> to vector<4x16xf32>
    %cst_214 = arith.constant dense<0.000000e+00> : vector<32x16xf32>
    %165 = tpu.matmul %162, %164, %cst_214 {dimension_numbers = #tpu.dot_dimension_numbers<[1], [0], [0], [1], [0, 0, 1, 1], [], []>} : vector<32x4xf32>, vector<4x16xf32>, vector<32x16xf32> -> vector<32x16xf32>
    %166 = arith.addf %159, %165 : vector<32x16xf32>
    %c1_215 = arith.constant 1 : index
    %c0_216 = arith.constant 0 : index
    %c0_217 = arith.constant 0 : index
    %c0_218 = arith.constant 0 : index
    %c1_219 = arith.constant 1 : index
    %c0_220 = arith.constant 0 : index
    %167 = vector.load %arg10[%c1_215, %c0_216, %c0_217, %c0_218, %c1_219, %c0_220] : memref<4x4x2x5x5x4xf32, #tpu.memory_space<vmem>>, vector<1x1x2x4x4x4xf32>
    %168 = vector.shape_cast %167 : vector<1x1x2x4x4x4xf32> to vector<2x4x4x4xf32>
    %169 = vector.shape_cast %168 : vector<2x4x4x4xf32> to vector<32x4xf32>
    %c9 = arith.constant 9 : index
    %c0_221 = arith.constant 0 : index
    %c0_222 = arith.constant 0 : index
    %170 = vector.load %arg3[%c9, %c0_221, %c0_222] : memref<25x4x16xf32, #tpu.memory_space<vmem>>, vector<1x4x16xf32>
    %171 = vector.shape_cast %170 : vector<1x4x16xf32> to vector<4x16xf32>
    %cst_223 = arith.constant dense<0.000000e+00> : vector<32x16xf32>
    %172 = tpu.matmul %169, %171, %cst_223 {dimension_numbers = #tpu.dot_dimension_numbers<[1], [0], [0], [1], [0, 0, 1, 1], [], []>} : vector<32x4xf32>, vector<4x16xf32>, vector<32x16xf32> -> vector<32x16xf32>
    %173 = arith.addf %166, %172 : vector<32x16xf32>
    %c2_224 = arith.constant 2 : index
    %c0_225 = arith.constant 0 : index
    %c0_226 = arith.constant 0 : index
    %c0_227 = arith.constant 0 : index
    %c0_228 = arith.constant 0 : index
    %c0_229 = arith.constant 0 : index
    %174 = vector.load %arg10[%c2_224, %c0_225, %c0_226, %c0_227, %c0_228, %c0_229] : memref<4x4x2x5x5x4xf32, #tpu.memory_space<vmem>>, vector<1x1x2x4x4x4xf32>
    %175 = vector.shape_cast %174 : vector<1x1x2x4x4x4xf32> to vector<2x4x4x4xf32>
    %176 = vector.shape_cast %175 : vector<2x4x4x4xf32> to vector<32x4xf32>
    %c10 = arith.constant 10 : index
    %c0_230 = arith.constant 0 : index
    %c0_231 = arith.constant 0 : index
    %177 = vector.load %arg3[%c10, %c0_230, %c0_231] : memref<25x4x16xf32, #tpu.memory_space<vmem>>, vector<1x4x16xf32>
    %178 = vector.shape_cast %177 : vector<1x4x16xf32> to vector<4x16xf32>
    %cst_232 = arith.constant dense<0.000000e+00> : vector<32x16xf32>
    %179 = tpu.matmul %176, %178, %cst_232 {dimension_numbers = #tpu.dot_dimension_numbers<[1], [0], [0], [1], [0, 0, 1, 1], [], []>} : vector<32x4xf32>, vector<4x16xf32>, vector<32x16xf32> -> vector<32x16xf32>
    %180 = arith.addf %173, %179 : vector<32x16xf32>
    %c2_233 = arith.constant 2 : index
    %c1_234 = arith.constant 1 : index
    %c0_235 = arith.constant 0 : index
    %c0_236 = arith.constant 0 : index
    %c0_237 = arith.constant 0 : index
    %c0_238 = arith.constant 0 : index
    %181 = vector.load %arg10[%c2_233, %c1_234, %c0_235, %c0_236, %c0_237, %c0_238] : memref<4x4x2x5x5x4xf32, #tpu.memory_space<vmem>>, vector<1x1x2x4x4x4xf32>
    %182 = vector.shape_cast %181 : vector<1x1x2x4x4x4xf32> to vector<2x4x4x4xf32>
    %183 = vector.shape_cast %182 : vector<2x4x4x4xf32> to vector<32x4xf32>
    %c11 = arith.constant 11 : index
    %c0_239 = arith.constant 0 : index
    %c0_240 = arith.constant 0 : index
    %184 = vector.load %arg3[%c11, %c0_239, %c0_240] : memref<25x4x16xf32, #tpu.memory_space<vmem>>, vector<1x4x16xf32>
    %185 = vector.shape_cast %184 : vector<1x4x16xf32> to vector<4x16xf32>
    %cst_241 = arith.constant dense<0.000000e+00> : vector<32x16xf32>
    %186 = tpu.matmul %183, %185, %cst_241 {dimension_numbers = #tpu.dot_dimension_numbers<[1], [0], [0], [1], [0, 0, 1, 1], [], []>} : vector<32x4xf32>, vector<4x16xf32>, vector<32x16xf32> -> vector<32x16xf32>
    %187 = arith.addf %180, %186 : vector<32x16xf32>
    %c2_242 = arith.constant 2 : index
    %c2_243 = arith.constant 2 : index
    %c0_244 = arith.constant 0 : index
    %c0_245 = arith.constant 0 : index
    %c0_246 = arith.constant 0 : index
    %c0_247 = arith.constant 0 : index
    %188 = vector.load %arg10[%c2_242, %c2_243, %c0_244, %c0_245, %c0_246, %c0_247] : memref<4x4x2x5x5x4xf32, #tpu.memory_space<vmem>>, vector<1x1x2x4x4x4xf32>
    %189 = vector.shape_cast %188 : vector<1x1x2x4x4x4xf32> to vector<2x4x4x4xf32>
    %190 = vector.shape_cast %189 : vector<2x4x4x4xf32> to vector<32x4xf32>
    %c12 = arith.constant 12 : index
    %c0_248 = arith.constant 0 : index
    %c0_249 = arith.constant 0 : index
    %191 = vector.load %arg3[%c12, %c0_248, %c0_249] : memref<25x4x16xf32, #tpu.memory_space<vmem>>, vector<1x4x16xf32>
    %192 = vector.shape_cast %191 : vector<1x4x16xf32> to vector<4x16xf32>
    %cst_250 = arith.constant dense<0.000000e+00> : vector<32x16xf32>
    %193 = tpu.matmul %190, %192, %cst_250 {dimension_numbers = #tpu.dot_dimension_numbers<[1], [0], [0], [1], [0, 0, 1, 1], [], []>} : vector<32x4xf32>, vector<4x16xf32>, vector<32x16xf32> -> vector<32x16xf32>
    %194 = arith.addf %187, %193 : vector<32x16xf32>
    %c2_251 = arith.constant 2 : index
    %c3_252 = arith.constant 3 : index
    %c0_253 = arith.constant 0 : index
    %c0_254 = arith.constant 0 : index
    %c0_255 = arith.constant 0 : index
    %c0_256 = arith.constant 0 : index
    %195 = vector.load %arg10[%c2_251, %c3_252, %c0_253, %c0_254, %c0_255, %c0_256] : memref<4x4x2x5x5x4xf32, #tpu.memory_space<vmem>>, vector<1x1x2x4x4x4xf32>
    %196 = vector.shape_cast %195 : vector<1x1x2x4x4x4xf32> to vector<2x4x4x4xf32>
    %197 = vector.shape_cast %196 : vector<2x4x4x4xf32> to vector<32x4xf32>
    %c13 = arith.constant 13 : index
    %c0_257 = arith.constant 0 : index
    %c0_258 = arith.constant 0 : index
    %198 = vector.load %arg3[%c13, %c0_257, %c0_258] : memref<25x4x16xf32, #tpu.memory_space<vmem>>, vector<1x4x16xf32>
    %199 = vector.shape_cast %198 : vector<1x4x16xf32> to vector<4x16xf32>
    %cst_259 = arith.constant dense<0.000000e+00> : vector<32x16xf32>
    %200 = tpu.matmul %197, %199, %cst_259 {dimension_numbers = #tpu.dot_dimension_numbers<[1], [0], [0], [1], [0, 0, 1, 1], [], []>} : vector<32x4xf32>, vector<4x16xf32>, vector<32x16xf32> -> vector<32x16xf32>
    %201 = arith.addf %194, %200 : vector<32x16xf32>
    %c2_260 = arith.constant 2 : index
    %c0_261 = arith.constant 0 : index
    %c0_262 = arith.constant 0 : index
    %c0_263 = arith.constant 0 : index
    %c1_264 = arith.constant 1 : index
    %c0_265 = arith.constant 0 : index
    %202 = vector.load %arg10[%c2_260, %c0_261, %c0_262, %c0_263, %c1_264, %c0_265] : memref<4x4x2x5x5x4xf32, #tpu.memory_space<vmem>>, vector<1x1x2x4x4x4xf32>
    %203 = vector.shape_cast %202 : vector<1x1x2x4x4x4xf32> to vector<2x4x4x4xf32>
    %204 = vector.shape_cast %203 : vector<2x4x4x4xf32> to vector<32x4xf32>
    %c14 = arith.constant 14 : index
    %c0_266 = arith.constant 0 : index
    %c0_267 = arith.constant 0 : index
    %205 = vector.load %arg3[%c14, %c0_266, %c0_267] : memref<25x4x16xf32, #tpu.memory_space<vmem>>, vector<1x4x16xf32>
    %206 = vector.shape_cast %205 : vector<1x4x16xf32> to vector<4x16xf32>
    %cst_268 = arith.constant dense<0.000000e+00> : vector<32x16xf32>
    %207 = tpu.matmul %204, %206, %cst_268 {dimension_numbers = #tpu.dot_dimension_numbers<[1], [0], [0], [1], [0, 0, 1, 1], [], []>} : vector<32x4xf32>, vector<4x16xf32>, vector<32x16xf32> -> vector<32x16xf32>
    %208 = arith.addf %201, %207 : vector<32x16xf32>
    %c3_269 = arith.constant 3 : index
    %c0_270 = arith.constant 0 : index
    %c0_271 = arith.constant 0 : index
    %c0_272 = arith.constant 0 : index
    %c0_273 = arith.constant 0 : index
    %c0_274 = arith.constant 0 : index
    %209 = vector.load %arg10[%c3_269, %c0_270, %c0_271, %c0_272, %c0_273, %c0_274] : memref<4x4x2x5x5x4xf32, #tpu.memory_space<vmem>>, vector<1x1x2x4x4x4xf32>
    %210 = vector.shape_cast %209 : vector<1x1x2x4x4x4xf32> to vector<2x4x4x4xf32>
    %211 = vector.shape_cast %210 : vector<2x4x4x4xf32> to vector<32x4xf32>
    %c15 = arith.constant 15 : index
    %c0_275 = arith.constant 0 : index
    %c0_276 = arith.constant 0 : index
    %212 = vector.load %arg3[%c15, %c0_275, %c0_276] : memref<25x4x16xf32, #tpu.memory_space<vmem>>, vector<1x4x16xf32>
    %213 = vector.shape_cast %212 : vector<1x4x16xf32> to vector<4x16xf32>
    %cst_277 = arith.constant dense<0.000000e+00> : vector<32x16xf32>
    %214 = tpu.matmul %211, %213, %cst_277 {dimension_numbers = #tpu.dot_dimension_numbers<[1], [0], [0], [1], [0, 0, 1, 1], [], []>} : vector<32x4xf32>, vector<4x16xf32>, vector<32x16xf32> -> vector<32x16xf32>
    %215 = arith.addf %208, %214 : vector<32x16xf32>
    %c3_278 = arith.constant 3 : index
    %c1_279 = arith.constant 1 : index
    %c0_280 = arith.constant 0 : index
    %c0_281 = arith.constant 0 : index
    %c0_282 = arith.constant 0 : index
    %c0_283 = arith.constant 0 : index
    %216 = vector.load %arg10[%c3_278, %c1_279, %c0_280, %c0_281, %c0_282, %c0_283] : memref<4x4x2x5x5x4xf32, #tpu.memory_space<vmem>>, vector<1x1x2x4x4x4xf32>
    %217 = vector.shape_cast %216 : vector<1x1x2x4x4x4xf32> to vector<2x4x4x4xf32>
    %218 = vector.shape_cast %217 : vector<2x4x4x4xf32> to vector<32x4xf32>
    %c16 = arith.constant 16 : index
    %c0_284 = arith.constant 0 : index
    %c0_285 = arith.constant 0 : index
    %219 = vector.load %arg3[%c16, %c0_284, %c0_285] : memref<25x4x16xf32, #tpu.memory_space<vmem>>, vector<1x4x16xf32>
    %220 = vector.shape_cast %219 : vector<1x4x16xf32> to vector<4x16xf32>
    %cst_286 = arith.constant dense<0.000000e+00> : vector<32x16xf32>
    %221 = tpu.matmul %218, %220, %cst_286 {dimension_numbers = #tpu.dot_dimension_numbers<[1], [0], [0], [1], [0, 0, 1, 1], [], []>} : vector<32x4xf32>, vector<4x16xf32>, vector<32x16xf32> -> vector<32x16xf32>
    %222 = arith.addf %215, %221 : vector<32x16xf32>
    %c3_287 = arith.constant 3 : index
    %c2_288 = arith.constant 2 : index
    %c0_289 = arith.constant 0 : index
    %c0_290 = arith.constant 0 : index
    %c0_291 = arith.constant 0 : index
    %c0_292 = arith.constant 0 : index
    %223 = vector.load %arg10[%c3_287, %c2_288, %c0_289, %c0_290, %c0_291, %c0_292] : memref<4x4x2x5x5x4xf32, #tpu.memory_space<vmem>>, vector<1x1x2x4x4x4xf32>
    %224 = vector.shape_cast %223 : vector<1x1x2x4x4x4xf32> to vector<2x4x4x4xf32>
    %225 = vector.shape_cast %224 : vector<2x4x4x4xf32> to vector<32x4xf32>
    %c17 = arith.constant 17 : index
    %c0_293 = arith.constant 0 : index
    %c0_294 = arith.constant 0 : index
    %226 = vector.load %arg3[%c17, %c0_293, %c0_294] : memref<25x4x16xf32, #tpu.memory_space<vmem>>, vector<1x4x16xf32>
    %227 = vector.shape_cast %226 : vector<1x4x16xf32> to vector<4x16xf32>
    %cst_295 = arith.constant dense<0.000000e+00> : vector<32x16xf32>
    %228 = tpu.matmul %225, %227, %cst_295 {dimension_numbers = #tpu.dot_dimension_numbers<[1], [0], [0], [1], [0, 0, 1, 1], [], []>} : vector<32x4xf32>, vector<4x16xf32>, vector<32x16xf32> -> vector<32x16xf32>
    %229 = arith.addf %222, %228 : vector<32x16xf32>
    %c3_296 = arith.constant 3 : index
    %c3_297 = arith.constant 3 : index
    %c0_298 = arith.constant 0 : index
    %c0_299 = arith.constant 0 : index
    %c0_300 = arith.constant 0 : index
    %c0_301 = arith.constant 0 : index
    %230 = vector.load %arg10[%c3_296, %c3_297, %c0_298, %c0_299, %c0_300, %c0_301] : memref<4x4x2x5x5x4xf32, #tpu.memory_space<vmem>>, vector<1x1x2x4x4x4xf32>
    %231 = vector.shape_cast %230 : vector<1x1x2x4x4x4xf32> to vector<2x4x4x4xf32>
    %232 = vector.shape_cast %231 : vector<2x4x4x4xf32> to vector<32x4xf32>
    %c18 = arith.constant 18 : index
    %c0_302 = arith.constant 0 : index
    %c0_303 = arith.constant 0 : index
    %233 = vector.load %arg3[%c18, %c0_302, %c0_303] : memref<25x4x16xf32, #tpu.memory_space<vmem>>, vector<1x4x16xf32>
    %234 = vector.shape_cast %233 : vector<1x4x16xf32> to vector<4x16xf32>
    %cst_304 = arith.constant dense<0.000000e+00> : vector<32x16xf32>
    %235 = tpu.matmul %232, %234, %cst_304 {dimension_numbers = #tpu.dot_dimension_numbers<[1], [0], [0], [1], [0, 0, 1, 1], [], []>} : vector<32x4xf32>, vector<4x16xf32>, vector<32x16xf32> -> vector<32x16xf32>
    %236 = arith.addf %229, %235 : vector<32x16xf32>
    %c3_305 = arith.constant 3 : index
    %c0_306 = arith.constant 0 : index
    %c0_307 = arith.constant 0 : index
    %c0_308 = arith.constant 0 : index
    %c1_309 = arith.constant 1 : index
    %c0_310 = arith.constant 0 : index
    %237 = vector.load %arg10[%c3_305, %c0_306, %c0_307, %c0_308, %c1_309, %c0_310] : memref<4x4x2x5x5x4xf32, #tpu.memory_space<vmem>>, vector<1x1x2x4x4x4xf32>
    %238 = vector.shape_cast %237 : vector<1x1x2x4x4x4xf32> to vector<2x4x4x4xf32>
    %239 = vector.shape_cast %238 : vector<2x4x4x4xf32> to vector<32x4xf32>
    %c19 = arith.constant 19 : index
    %c0_311 = arith.constant 0 : index
    %c0_312 = arith.constant 0 : index
    %240 = vector.load %arg3[%c19, %c0_311, %c0_312] : memref<25x4x16xf32, #tpu.memory_space<vmem>>, vector<1x4x16xf32>
    %241 = vector.shape_cast %240 : vector<1x4x16xf32> to vector<4x16xf32>
    %cst_313 = arith.constant dense<0.000000e+00> : vector<32x16xf32>
    %242 = tpu.matmul %239, %241, %cst_313 {dimension_numbers = #tpu.dot_dimension_numbers<[1], [0], [0], [1], [0, 0, 1, 1], [], []>} : vector<32x4xf32>, vector<4x16xf32>, vector<32x16xf32> -> vector<32x16xf32>
    %243 = arith.addf %236, %242 : vector<32x16xf32>
    %c0_314 = arith.constant 0 : index
    %c0_315 = arith.constant 0 : index
    %c0_316 = arith.constant 0 : index
    %c1_317 = arith.constant 1 : index
    %c0_318 = arith.constant 0 : index
    %c0_319 = arith.constant 0 : index
    %244 = vector.load %arg10[%c0_314, %c0_315, %c0_316, %c1_317, %c0_318, %c0_319] : memref<4x4x2x5x5x4xf32, #tpu.memory_space<vmem>>, vector<1x1x2x4x4x4xf32>
    %245 = vector.shape_cast %244 : vector<1x1x2x4x4x4xf32> to vector<2x4x4x4xf32>
    %246 = vector.shape_cast %245 : vector<2x4x4x4xf32> to vector<32x4xf32>
    %c20 = arith.constant 20 : index
    %c0_320 = arith.constant 0 : index
    %c0_321 = arith.constant 0 : index
    %247 = vector.load %arg3[%c20, %c0_320, %c0_321] : memref<25x4x16xf32, #tpu.memory_space<vmem>>, vector<1x4x16xf32>
    %248 = vector.shape_cast %247 : vector<1x4x16xf32> to vector<4x16xf32>
    %cst_322 = arith.constant dense<0.000000e+00> : vector<32x16xf32>
    %249 = tpu.matmul %246, %248, %cst_322 {dimension_numbers = #tpu.dot_dimension_numbers<[1], [0], [0], [1], [0, 0, 1, 1], [], []>} : vector<32x4xf32>, vector<4x16xf32>, vector<32x16xf32> -> vector<32x16xf32>
    %250 = arith.addf %243, %249 : vector<32x16xf32>
    %c0_323 = arith.constant 0 : index
    %c1_324 = arith.constant 1 : index
    %c0_325 = arith.constant 0 : index
    %c1_326 = arith.constant 1 : index
    %c0_327 = arith.constant 0 : index
    %c0_328 = arith.constant 0 : index
    %251 = vector.load %arg10[%c0_323, %c1_324, %c0_325, %c1_326, %c0_327, %c0_328] : memref<4x4x2x5x5x4xf32, #tpu.memory_space<vmem>>, vector<1x1x2x4x4x4xf32>
    %252 = vector.shape_cast %251 : vector<1x1x2x4x4x4xf32> to vector<2x4x4x4xf32>
    %253 = vector.shape_cast %252 : vector<2x4x4x4xf32> to vector<32x4xf32>
    %c21 = arith.constant 21 : index
    %c0_329 = arith.constant 0 : index
    %c0_330 = arith.constant 0 : index
    %254 = vector.load %arg3[%c21, %c0_329, %c0_330] : memref<25x4x16xf32, #tpu.memory_space<vmem>>, vector<1x4x16xf32>
    %255 = vector.shape_cast %254 : vector<1x4x16xf32> to vector<4x16xf32>
    %cst_331 = arith.constant dense<0.000000e+00> : vector<32x16xf32>
    %256 = tpu.matmul %253, %255, %cst_331 {dimension_numbers = #tpu.dot_dimension_numbers<[1], [0], [0], [1], [0, 0, 1, 1], [], []>} : vector<32x4xf32>, vector<4x16xf32>, vector<32x16xf32> -> vector<32x16xf32>
    %257 = arith.addf %250, %256 : vector<32x16xf32>
    %c0_332 = arith.constant 0 : index
    %c2_333 = arith.constant 2 : index
    %c0_334 = arith.constant 0 : index
    %c1_335 = arith.constant 1 : index
    %c0_336 = arith.constant 0 : index
    %c0_337 = arith.constant 0 : index
    %258 = vector.load %arg10[%c0_332, %c2_333, %c0_334, %c1_335, %c0_336, %c0_337] : memref<4x4x2x5x5x4xf32, #tpu.memory_space<vmem>>, vector<1x1x2x4x4x4xf32>
    %259 = vector.shape_cast %258 : vector<1x1x2x4x4x4xf32> to vector<2x4x4x4xf32>
    %260 = vector.shape_cast %259 : vector<2x4x4x4xf32> to vector<32x4xf32>
    %c22 = arith.constant 22 : index
    %c0_338 = arith.constant 0 : index
    %c0_339 = arith.constant 0 : index
    %261 = vector.load %arg3[%c22, %c0_338, %c0_339] : memref<25x4x16xf32, #tpu.memory_space<vmem>>, vector<1x4x16xf32>
    %262 = vector.shape_cast %261 : vector<1x4x16xf32> to vector<4x16xf32>
    %cst_340 = arith.constant dense<0.000000e+00> : vector<32x16xf32>
    %263 = tpu.matmul %260, %262, %cst_340 {dimension_numbers = #tpu.dot_dimension_numbers<[1], [0], [0], [1], [0, 0, 1, 1], [], []>} : vector<32x4xf32>, vector<4x16xf32>, vector<32x16xf32> -> vector<32x16xf32>
    %264 = arith.addf %257, %263 : vector<32x16xf32>
    %c0_341 = arith.constant 0 : index
    %c3_342 = arith.constant 3 : index
    %c0_343 = arith.constant 0 : index
    %c1_344 = arith.constant 1 : index
    %c0_345 = arith.constant 0 : index
    %c0_346 = arith.constant 0 : index
    %265 = vector.load %arg10[%c0_341, %c3_342, %c0_343, %c1_344, %c0_345, %c0_346] : memref<4x4x2x5x5x4xf32, #tpu.memory_space<vmem>>, vector<1x1x2x4x4x4xf32>
    %266 = vector.shape_cast %265 : vector<1x1x2x4x4x4xf32> to vector<2x4x4x4xf32>
    %267 = vector.shape_cast %266 : vector<2x4x4x4xf32> to vector<32x4xf32>
    %c23 = arith.constant 23 : index
    %c0_347 = arith.constant 0 : index
    %c0_348 = arith.constant 0 : index
    %268 = vector.load %arg3[%c23, %c0_347, %c0_348] : memref<25x4x16xf32, #tpu.memory_space<vmem>>, vector<1x4x16xf32>
    %269 = vector.shape_cast %268 : vector<1x4x16xf32> to vector<4x16xf32>
    %cst_349 = arith.constant dense<0.000000e+00> : vector<32x16xf32>
    %270 = tpu.matmul %267, %269, %cst_349 {dimension_numbers = #tpu.dot_dimension_numbers<[1], [0], [0], [1], [0, 0, 1, 1], [], []>} : vector<32x4xf32>, vector<4x16xf32>, vector<32x16xf32> -> vector<32x16xf32>
    %271 = arith.addf %264, %270 : vector<32x16xf32>
    %c0_350 = arith.constant 0 : index
    %c0_351 = arith.constant 0 : index
    %c0_352 = arith.constant 0 : index
    %c1_353 = arith.constant 1 : index
    %c1_354 = arith.constant 1 : index
    %c0_355 = arith.constant 0 : index
    %272 = vector.load %arg10[%c0_350, %c0_351, %c0_352, %c1_353, %c1_354, %c0_355] : memref<4x4x2x5x5x4xf32, #tpu.memory_space<vmem>>, vector<1x1x2x4x4x4xf32>
    %273 = vector.shape_cast %272 : vector<1x1x2x4x4x4xf32> to vector<2x4x4x4xf32>
    %274 = vector.shape_cast %273 : vector<2x4x4x4xf32> to vector<32x4xf32>
    %c24 = arith.constant 24 : index
    %c0_356 = arith.constant 0 : index
    %c0_357 = arith.constant 0 : index
    %275 = vector.load %arg3[%c24, %c0_356, %c0_357] : memref<25x4x16xf32, #tpu.memory_space<vmem>>, vector<1x4x16xf32>
    %276 = vector.shape_cast %275 : vector<1x4x16xf32> to vector<4x16xf32>
    %cst_358 = arith.constant dense<0.000000e+00> : vector<32x16xf32>
    %277 = tpu.matmul %274, %276, %cst_358 {dimension_numbers = #tpu.dot_dimension_numbers<[1], [0], [0], [1], [0, 0, 1, 1], [], []>} : vector<32x4xf32>, vector<4x16xf32>, vector<32x16xf32> -> vector<32x16xf32>
    %278 = arith.addf %271, %277 : vector<32x16xf32>
    %cst_359 = arith.constant 0.000000e+00 : f32
    %279 = vector.broadcast %cst_359 : f32 to vector<32x16xf32>
    %280 = arith.cmpf ogt, %278, %279 : vector<32x16xf32>
    %cst_360 = arith.constant 5.000000e-02 : f32
    %281 = vector.broadcast %cst_360 : f32 to vector<32x16xf32>
    %282 = arith.mulf %281, %278 : vector<32x16xf32>
    %283 = arith.select %280, %278, %282 : vector<32x16xi1>, vector<32x16xf32>
    %cst_361 = arith.constant 0.000000e+00 : f32
    %284 = vector.broadcast %cst_361 : f32 to vector<2x1x6x16xf32>
    %c0_362 = arith.constant 0 : index
    %c0_363 = arith.constant 0 : index
    %c0_364 = arith.constant 0 : index
    %c0_365 = arith.constant 0 : index
    %285 = vector.load %arg11[%c0_362, %c0_363, %c0_364, %c0_365] : memref<2x6x6x16xf32, #tpu.memory_space<vmem>>, vector<2x1x6x16xf32>
    tpu.vector_store %arg11[%c0_362, %c0_363, %c0_364, %c0_365], %284 {strides = array<i32>} : memref<2x6x6x16xf32, #tpu.memory_space<vmem>>, vector<2x1x6x16xf32>,
    %cst_366 = arith.constant 0.000000e+00 : f32
    %286 = vector.broadcast %cst_366 : f32 to vector<2x1x6x16xf32>
    %c0_367 = arith.constant 0 : index
    %c5_368 = arith.constant 5 : index
    %c0_369 = arith.constant 0 : index
    %c0_370 = arith.constant 0 : index
    %287 = vector.load %arg11[%c0_367, %c5_368, %c0_369, %c0_370] : memref<2x6x6x16xf32, #tpu.memory_space<vmem>>, vector<2x1x6x16xf32>
    tpu.vector_store %arg11[%c0_367, %c5_368, %c0_369, %c0_370], %286 {strides = array<i32>} : memref<2x6x6x16xf32, #tpu.memory_space<vmem>>, vector<2x1x6x16xf32>,
    %cst_371 = arith.constant 0.000000e+00 : f32
    %288 = vector.broadcast %cst_371 : f32 to vector<2x6x1x16xf32>
    %c0_372 = arith.constant 0 : index
    %c0_373 = arith.constant 0 : index
    %c0_374 = arith.constant 0 : index
    %c0_375 = arith.constant 0 : index
    %289 = vector.load %arg11[%c0_372, %c0_373, %c0_374, %c0_375] : memref<2x6x6x16xf32, #tpu.memory_space<vmem>>, vector<2x6x1x16xf32>
    tpu.vector_store %arg11[%c0_372, %c0_373, %c0_374, %c0_375], %288 {strides = array<i32>} : memref<2x6x6x16xf32, #tpu.memory_space<vmem>>, vector<2x6x1x16xf32>,
    %cst_376 = arith.constant 0.000000e+00 : f32
    %290 = vector.broadcast %cst_376 : f32 to vector<2x6x1x16xf32>
    %c0_377 = arith.constant 0 : index
    %c0_378 = arith.constant 0 : index
    %c5_379 = arith.constant 5 : index
    %c0_380 = arith.constant 0 : index
    %291 = vector.load %arg11[%c0_377, %c0_378, %c5_379, %c0_380] : memref<2x6x6x16xf32, #tpu.memory_space<vmem>>, vector<2x6x1x16xf32>
    tpu.vector_store %arg11[%c0_377, %c0_378, %c5_379, %c0_380], %290 {strides = array<i32>} : memref<2x6x6x16xf32, #tpu.memory_space<vmem>>, vector<2x6x1x16xf32>,
    %292 = vector.shape_cast %283 : vector<32x16xf32> to vector<2x4x4x16xf32>
    %c0_381 = arith.constant 0 : index
    %c1_382 = arith.constant 1 : index
    %c1_383 = arith.constant 1 : index
    %c0_384 = arith.constant 0 : index
    %293 = vector.load %arg11[%c0_381, %c1_382, %c1_383, %c0_384] : memref<2x6x6x16xf32, #tpu.memory_space<vmem>>, vector<2x4x4x16xf32>
    tpu.vector_store %arg11[%c0_381, %c1_382, %c1_383, %c0_384], %292 {strides = array<i32>} : memref<2x6x6x16xf32, #tpu.memory_space<vmem>>, vector<2x4x4x16xf32>,
    %c0_385 = arith.constant 0 : index
    %c0_386 = arith.constant 0 : index
    %294 = vector.load %arg6[%c0_385, %c0_386] : memref<1x20xf32, #tpu.memory_space<vmem>>, vector<1x20xf32>
    %295 = vector.shape_cast %294 : vector<1x20xf32> to vector<1x20xf32>
    %296 = vector.broadcast %295 : vector<1x20xf32> to vector<32x20xf32>
    %c0_387 = arith.constant 0 : index
    %c0_388 = arith.constant 0 : index
    %c0_389 = arith.constant 0 : index
    %c0_390 = arith.constant 0 : index
    %297 = vector.load %arg11[%c0_387, %c0_388, %c0_389, %c0_390] : memref<2x6x6x16xf32, #tpu.memory_space<vmem>>, vector<2x4x4x16xf32>
    %298 = vector.shape_cast %297 : vector<2x4x4x16xf32> to vector<32x16xf32>
    %c0_391 = arith.constant 0 : index
    %c0_392 = arith.constant 0 : index
    %c0_393 = arith.constant 0 : index
    %299 = vector.load %arg5[%c0_391, %c0_392, %c0_393] : memref<9x16x20xf32, #tpu.memory_space<vmem>>, vector<1x16x20xf32>
    %300 = vector.shape_cast %299 : vector<1x16x20xf32> to vector<16x20xf32>
    %cst_394 = arith.constant dense<0.000000e+00> : vector<32x20xf32>
    %301 = tpu.matmul %298, %300, %cst_394 {dimension_numbers = #tpu.dot_dimension_numbers<[1], [0], [0], [1], [0, 0, 1, 1], [], []>} : vector<32x16xf32>, vector<16x20xf32>, vector<32x20xf32> -> vector<32x20xf32>
    %302 = arith.addf %296, %301 : vector<32x20xf32>
    %c0_395 = arith.constant 0 : index
    %c0_396 = arith.constant 0 : index
    %c1_397 = arith.constant 1 : index
    %c0_398 = arith.constant 0 : index
    %303 = vector.load %arg11[%c0_395, %c0_396, %c1_397, %c0_398] : memref<2x6x6x16xf32, #tpu.memory_space<vmem>>, vector<2x4x4x16xf32>
    %304 = vector.shape_cast %303 : vector<2x4x4x16xf32> to vector<32x16xf32>
    %c1_399 = arith.constant 1 : index
    %c0_400 = arith.constant 0 : index
    %c0_401 = arith.constant 0 : index
    %305 = vector.load %arg5[%c1_399, %c0_400, %c0_401] : memref<9x16x20xf32, #tpu.memory_space<vmem>>, vector<1x16x20xf32>
    %306 = vector.shape_cast %305 : vector<1x16x20xf32> to vector<16x20xf32>
    %cst_402 = arith.constant dense<0.000000e+00> : vector<32x20xf32>
    %307 = tpu.matmul %304, %306, %cst_402 {dimension_numbers = #tpu.dot_dimension_numbers<[1], [0], [0], [1], [0, 0, 1, 1], [], []>} : vector<32x16xf32>, vector<16x20xf32>, vector<32x20xf32> -> vector<32x20xf32>
    %308 = arith.addf %302, %307 : vector<32x20xf32>
    %c0_403 = arith.constant 0 : index
    %c0_404 = arith.constant 0 : index
    %c2_405 = arith.constant 2 : index
    %c0_406 = arith.constant 0 : index
    %309 = vector.load %arg11[%c0_403, %c0_404, %c2_405, %c0_406] : memref<2x6x6x16xf32, #tpu.memory_space<vmem>>, vector<2x4x4x16xf32>
    %310 = vector.shape_cast %309 : vector<2x4x4x16xf32> to vector<32x16xf32>
    %c2_407 = arith.constant 2 : index
    %c0_408 = arith.constant 0 : index
    %c0_409 = arith.constant 0 : index
    %311 = vector.load %arg5[%c2_407, %c0_408, %c0_409] : memref<9x16x20xf32, #tpu.memory_space<vmem>>, vector<1x16x20xf32>
    %312 = vector.shape_cast %311 : vector<1x16x20xf32> to vector<16x20xf32>
    %cst_410 = arith.constant dense<0.000000e+00> : vector<32x20xf32>
    %313 = tpu.matmul %310, %312, %cst_410 {dimension_numbers = #tpu.dot_dimension_numbers<[1], [0], [0], [1], [0, 0, 1, 1], [], []>} : vector<32x16xf32>, vector<16x20xf32>, vector<32x20xf32> -> vector<32x20xf32>
    %314 = arith.addf %308, %313 : vector<32x20xf32>
    %c0_411 = arith.constant 0 : index
    %c1_412 = arith.constant 1 : index
    %c0_413 = arith.constant 0 : index
    %c0_414 = arith.constant 0 : index
    %315 = vector.load %arg11[%c0_411, %c1_412, %c0_413, %c0_414] : memref<2x6x6x16xf32, #tpu.memory_space<vmem>>, vector<2x4x4x16xf32>
    %316 = vector.shape_cast %315 : vector<2x4x4x16xf32> to vector<32x16xf32>
    %c3_415 = arith.constant 3 : index
    %c0_416 = arith.constant 0 : index
    %c0_417 = arith.constant 0 : index
    %317 = vector.load %arg5[%c3_415, %c0_416, %c0_417] : memref<9x16x20xf32, #tpu.memory_space<vmem>>, vector<1x16x20xf32>
    %318 = vector.shape_cast %317 : vector<1x16x20xf32> to vector<16x20xf32>
    %cst_418 = arith.constant dense<0.000000e+00> : vector<32x20xf32>
    %319 = tpu.matmul %316, %318, %cst_418 {dimension_numbers = #tpu.dot_dimension_numbers<[1], [0], [0], [1], [0, 0, 1, 1], [], []>} : vector<32x16xf32>, vector<16x20xf32>, vector<32x20xf32> -> vector<32x20xf32>
    %320 = arith.addf %314, %319 : vector<32x20xf32>
    %c0_419 = arith.constant 0 : index
    %c1_420 = arith.constant 1 : index
    %c1_421 = arith.constant 1 : index
    %c0_422 = arith.constant 0 : index
    %321 = vector.load %arg11[%c0_419, %c1_420, %c1_421, %c0_422] : memref<2x6x6x16xf32, #tpu.memory_space<vmem>>, vector<2x4x4x16xf32>
    %322 = vector.shape_cast %321 : vector<2x4x4x16xf32> to vector<32x16xf32>
    %c4_423 = arith.constant 4 : index
    %c0_424 = arith.constant 0 : index
    %c0_425 = arith.constant 0 : index
    %323 = vector.load %arg5[%c4_423, %c0_424, %c0_425] : memref<9x16x20xf32, #tpu.memory_space<vmem>>, vector<1x16x20xf32>
    %324 = vector.shape_cast %323 : vector<1x16x20xf32> to vector<16x20xf32>
    %cst_426 = arith.constant dense<0.000000e+00> : vector<32x20xf32>
    %325 = tpu.matmul %322, %324, %cst_426 {dimension_numbers = #tpu.dot_dimension_numbers<[1], [0], [0], [1], [0, 0, 1, 1], [], []>} : vector<32x16xf32>, vector<16x20xf32>, vector<32x20xf32> -> vector<32x20xf32>
    %326 = arith.addf %320, %325 : vector<32x20xf32>
    %c0_427 = arith.constant 0 : index
    %c1_428 = arith.constant 1 : index
    %c2_429 = arith.constant 2 : index
    %c0_430 = arith.constant 0 : index
    %327 = vector.load %arg11[%c0_427, %c1_428, %c2_429, %c0_430] : memref<2x6x6x16xf32, #tpu.memory_space<vmem>>, vector<2x4x4x16xf32>
    %328 = vector.shape_cast %327 : vector<2x4x4x16xf32> to vector<32x16xf32>
    %c5_431 = arith.constant 5 : index
    %c0_432 = arith.constant 0 : index
    %c0_433 = arith.constant 0 : index
    %329 = vector.load %arg5[%c5_431, %c0_432, %c0_433] : memref<9x16x20xf32, #tpu.memory_space<vmem>>, vector<1x16x20xf32>
    %330 = vector.shape_cast %329 : vector<1x16x20xf32> to vector<16x20xf32>
    %cst_434 = arith.constant dense<0.000000e+00> : vector<32x20xf32>
    %331 = tpu.matmul %328, %330, %cst_434 {dimension_numbers = #tpu.dot_dimension_numbers<[1], [0], [0], [1], [0, 0, 1, 1], [], []>} : vector<32x16xf32>, vector<16x20xf32>, vector<32x20xf32> -> vector<32x20xf32>
    %332 = arith.addf %326, %331 : vector<32x20xf32>
    %c0_435 = arith.constant 0 : index
    %c2_436 = arith.constant 2 : index
    %c0_437 = arith.constant 0 : index
    %c0_438 = arith.constant 0 : index
    %333 = vector.load %arg11[%c0_435, %c2_436, %c0_437, %c0_438] : memref<2x6x6x16xf32, #tpu.memory_space<vmem>>, vector<2x4x4x16xf32>
    %334 = vector.shape_cast %333 : vector<2x4x4x16xf32> to vector<32x16xf32>
    %c6_439 = arith.constant 6 : index
    %c0_440 = arith.constant 0 : index
    %c0_441 = arith.constant 0 : index
    %335 = vector.load %arg5[%c6_439, %c0_440, %c0_441] : memref<9x16x20xf32, #tpu.memory_space<vmem>>, vector<1x16x20xf32>
    %336 = vector.shape_cast %335 : vector<1x16x20xf32> to vector<16x20xf32>
    %cst_442 = arith.constant dense<0.000000e+00> : vector<32x20xf32>
    %337 = tpu.matmul %334, %336, %cst_442 {dimension_numbers = #tpu.dot_dimension_numbers<[1], [0], [0], [1], [0, 0, 1, 1], [], []>} : vector<32x16xf32>, vector<16x20xf32>, vector<32x20xf32> -> vector<32x20xf32>
    %338 = arith.addf %332, %337 : vector<32x20xf32>
    %c0_443 = arith.constant 0 : index
    %c2_444 = arith.constant 2 : index
    %c1_445 = arith.constant 1 : index
    %c0_446 = arith.constant 0 : index
    %339 = vector.load %arg11[%c0_443, %c2_444, %c1_445, %c0_446] : memref<2x6x6x16xf32, #tpu.memory_space<vmem>>, vector<2x4x4x16xf32>
    %340 = vector.shape_cast %339 : vector<2x4x4x16xf32> to vector<32x16xf32>
    %c7_447 = arith.constant 7 : index
    %c0_448 = arith.constant 0 : index
    %c0_449 = arith.constant 0 : index
    %341 = vector.load %arg5[%c7_447, %c0_448, %c0_449] : memref<9x16x20xf32, #tpu.memory_space<vmem>>, vector<1x16x20xf32>
    %342 = vector.shape_cast %341 : vector<1x16x20xf32> to vector<16x20xf32>
    %cst_450 = arith.constant dense<0.000000e+00> : vector<32x20xf32>
    %343 = tpu.matmul %340, %342, %cst_450 {dimension_numbers = #tpu.dot_dimension_numbers<[1], [0], [0], [1], [0, 0, 1, 1], [], []>} : vector<32x16xf32>, vector<16x20xf32>, vector<32x20xf32> -> vector<32x20xf32>
    %344 = arith.addf %338, %343 : vector<32x20xf32>
    %c0_451 = arith.constant 0 : index
    %c2_452 = arith.constant 2 : index
    %c2_453 = arith.constant 2 : index
    %c0_454 = arith.constant 0 : index
    %345 = vector.load %arg11[%c0_451, %c2_452, %c2_453, %c0_454] : memref<2x6x6x16xf32, #tpu.memory_space<vmem>>, vector<2x4x4x16xf32>
    %346 = vector.shape_cast %345 : vector<2x4x4x16xf32> to vector<32x16xf32>
    %c8_455 = arith.constant 8 : index
    %c0_456 = arith.constant 0 : index
    %c0_457 = arith.constant 0 : index
    %347 = vector.load %arg5[%c8_455, %c0_456, %c0_457] : memref<9x16x20xf32, #tpu.memory_space<vmem>>, vector<1x16x20xf32>
    %348 = vector.shape_cast %347 : vector<1x16x20xf32> to vector<16x20xf32>
    %cst_458 = arith.constant dense<0.000000e+00> : vector<32x20xf32>
    %349 = tpu.matmul %346, %348, %cst_458 {dimension_numbers = #tpu.dot_dimension_numbers<[1], [0], [0], [1], [0, 0, 1, 1], [], []>} : vector<32x16xf32>, vector<16x20xf32>, vector<32x20xf32> -> vector<32x20xf32>
    %350 = arith.addf %344, %349 : vector<32x20xf32>
    %cst_459 = arith.constant 0.000000e+00 : f32
    %351 = vector.broadcast %cst_459 : f32 to vector<32x20xf32>
    %352 = arith.cmpf ogt, %350, %351 : vector<32x20xf32>
    %cst_460 = arith.constant 5.000000e-02 : f32
    %353 = vector.broadcast %cst_460 : f32 to vector<32x20xf32>
    %354 = arith.mulf %353, %350 : vector<32x20xf32>
    %355 = arith.select %352, %350, %354 : vector<32x20xi1>, vector<32x20xf32>
    %cst_461 = arith.constant 0.000000e+00 : f32
    %356 = vector.broadcast %cst_461 : f32 to vector<2x1x6x20xf32>
    %c0_462 = arith.constant 0 : index
    %c0_463 = arith.constant 0 : index
    %c0_464 = arith.constant 0 : index
    %c0_465 = arith.constant 0 : index
    %357 = vector.load %arg12[%c0_462, %c0_463, %c0_464, %c0_465] : memref<2x6x6x20xf32, #tpu.memory_space<vmem>>, vector<2x1x6x20xf32>
    tpu.vector_store %arg12[%c0_462, %c0_463, %c0_464, %c0_465], %356 {strides = array<i32>} : memref<2x6x6x20xf32, #tpu.memory_space<vmem>>, vector<2x1x6x20xf32>,
    %cst_466 = arith.constant 0.000000e+00 : f32
    %358 = vector.broadcast %cst_466 : f32 to vector<2x1x6x20xf32>
    %c0_467 = arith.constant 0 : index
    %c5_468 = arith.constant 5 : index
    %c0_469 = arith.constant 0 : index
    %c0_470 = arith.constant 0 : index
    %359 = vector.load %arg12[%c0_467, %c5_468, %c0_469, %c0_470] : memref<2x6x6x20xf32, #tpu.memory_space<vmem>>, vector<2x1x6x20xf32>
    tpu.vector_store %arg12[%c0_467, %c5_468, %c0_469, %c0_470], %358 {strides = array<i32>} : memref<2x6x6x20xf32, #tpu.memory_space<vmem>>, vector<2x1x6x20xf32>,
    %cst_471 = arith.constant 0.000000e+00 : f32
    %360 = vector.broadcast %cst_471 : f32 to vector<2x6x1x20xf32>
    %c0_472 = arith.constant 0 : index
    %c0_473 = arith.constant 0 : index
    %c0_474 = arith.constant 0 : index
    %c0_475 = arith.constant 0 : index
    %361 = vector.load %arg12[%c0_472, %c0_473, %c0_474, %c0_475] : memref<2x6x6x20xf32, #tpu.memory_space<vmem>>, vector<2x6x1x20xf32>
    tpu.vector_store %arg12[%c0_472, %c0_473, %c0_474, %c0_475], %360 {strides = array<i32>} : memref<2x6x6x20xf32, #tpu.memory_space<vmem>>, vector<2x6x1x20xf32>,
    %cst_476 = arith.constant 0.000000e+00 : f32
    %362 = vector.broadcast %cst_476 : f32 to vector<2x6x1x20xf32>
    %c0_477 = arith.constant 0 : index
    %c0_478 = arith.constant 0 : index
    %c5_479 = arith.constant 5 : index
    %c0_480 = arith.constant 0 : index
    %363 = vector.load %arg12[%c0_477, %c0_478, %c5_479, %c0_480] : memref<2x6x6x20xf32, #tpu.memory_space<vmem>>, vector<2x6x1x20xf32>
    tpu.vector_store %arg12[%c0_477, %c0_478, %c5_479, %c0_480], %362 {strides = array<i32>} : memref<2x6x6x20xf32, #tpu.memory_space<vmem>>, vector<2x6x1x20xf32>,
    %364 = vector.shape_cast %355 : vector<32x20xf32> to vector<2x4x4x20xf32>
    %c0_481 = arith.constant 0 : index
    %c1_482 = arith.constant 1 : index
    %c1_483 = arith.constant 1 : index
    %c0_484 = arith.constant 0 : index
    %365 = vector.load %arg12[%c0_481, %c1_482, %c1_483, %c0_484] : memref<2x6x6x20xf32, #tpu.memory_space<vmem>>, vector<2x4x4x20xf32>
    tpu.vector_store %arg12[%c0_481, %c1_482, %c1_483, %c0_484], %364 {strides = array<i32>} : memref<2x6x6x20xf32, #tpu.memory_space<vmem>>, vector<2x4x4x20xf32>,
    %c0_485 = arith.constant 0 : index
    %c0_486 = arith.constant 0 : index
    %366 = vector.load %arg8[%c0_485, %c0_486] : memref<1x22xf32, #tpu.memory_space<vmem>>, vector<1x22xf32>
    %367 = vector.shape_cast %366 : vector<1x22xf32> to vector<1x22xf32>
    %368 = vector.broadcast %367 : vector<1x22xf32> to vector<32x22xf32>
    %c0_487 = arith.constant 0 : index
    %c0_488 = arith.constant 0 : index
    %c0_489 = arith.constant 0 : index
    %c0_490 = arith.constant 0 : index
    %369 = vector.load %arg12[%c0_487, %c0_488, %c0_489, %c0_490] : memref<2x6x6x20xf32, #tpu.memory_space<vmem>>, vector<2x4x4x20xf32>
    %370 = vector.shape_cast %369 : vector<2x4x4x20xf32> to vector<32x20xf32>
    %c0_491 = arith.constant 0 : index
    %c0_492 = arith.constant 0 : index
    %c0_493 = arith.constant 0 : index
    %371 = vector.load %arg7[%c0_491, %c0_492, %c0_493] : memref<9x20x22xf32, #tpu.memory_space<vmem>>, vector<1x20x22xf32>
    %372 = vector.shape_cast %371 : vector<1x20x22xf32> to vector<20x22xf32>
    %cst_494 = arith.constant dense<0.000000e+00> : vector<32x22xf32>
    %373 = tpu.matmul %370, %372, %cst_494 {dimension_numbers = #tpu.dot_dimension_numbers<[1], [0], [0], [1], [0, 0, 1, 1], [], []>} : vector<32x20xf32>, vector<20x22xf32>, vector<32x22xf32> -> vector<32x22xf32>
    %374 = arith.addf %368, %373 : vector<32x22xf32>
    %c0_495 = arith.constant 0 : index
    %c0_496 = arith.constant 0 : index
    %c1_497 = arith.constant 1 : index
    %c0_498 = arith.constant 0 : index
    %375 = vector.load %arg12[%c0_495, %c0_496, %c1_497, %c0_498] : memref<2x6x6x20xf32, #tpu.memory_space<vmem>>, vector<2x4x4x20xf32>
    %376 = vector.shape_cast %375 : vector<2x4x4x20xf32> to vector<32x20xf32>
    %c1_499 = arith.constant 1 : index
    %c0_500 = arith.constant 0 : index
    %c0_501 = arith.constant 0 : index
    %377 = vector.load %arg7[%c1_499, %c0_500, %c0_501] : memref<9x20x22xf32, #tpu.memory_space<vmem>>, vector<1x20x22xf32>
    %378 = vector.shape_cast %377 : vector<1x20x22xf32> to vector<20x22xf32>
    %cst_502 = arith.constant dense<0.000000e+00> : vector<32x22xf32>
    %379 = tpu.matmul %376, %378, %cst_502 {dimension_numbers = #tpu.dot_dimension_numbers<[1], [0], [0], [1], [0, 0, 1, 1], [], []>} : vector<32x20xf32>, vector<20x22xf32>, vector<32x22xf32> -> vector<32x22xf32>
    %380 = arith.addf %374, %379 : vector<32x22xf32>
    %c0_503 = arith.constant 0 : index
    %c0_504 = arith.constant 0 : index
    %c2_505 = arith.constant 2 : index
    %c0_506 = arith.constant 0 : index
    %381 = vector.load %arg12[%c0_503, %c0_504, %c2_505, %c0_506] : memref<2x6x6x20xf32, #tpu.memory_space<vmem>>, vector<2x4x4x20xf32>
    %382 = vector.shape_cast %381 : vector<2x4x4x20xf32> to vector<32x20xf32>
    %c2_507 = arith.constant 2 : index
    %c0_508 = arith.constant 0 : index
    %c0_509 = arith.constant 0 : index
    %383 = vector.load %arg7[%c2_507, %c0_508, %c0_509] : memref<9x20x22xf32, #tpu.memory_space<vmem>>, vector<1x20x22xf32>
    %384 = vector.shape_cast %383 : vector<1x20x22xf32> to vector<20x22xf32>
    %cst_510 = arith.constant dense<0.000000e+00> : vector<32x22xf32>
    %385 = tpu.matmul %382, %384, %cst_510 {dimension_numbers = #tpu.dot_dimension_numbers<[1], [0], [0], [1], [0, 0, 1, 1], [], []>} : vector<32x20xf32>, vector<20x22xf32>, vector<32x22xf32> -> vector<32x22xf32>
    %386 = arith.addf %380, %385 : vector<32x22xf32>
    %c0_511 = arith.constant 0 : index
    %c1_512 = arith.constant 1 : index
    %c0_513 = arith.constant 0 : index
    %c0_514 = arith.constant 0 : index
    %387 = vector.load %arg12[%c0_511, %c1_512, %c0_513, %c0_514] : memref<2x6x6x20xf32, #tpu.memory_space<vmem>>, vector<2x4x4x20xf32>
    %388 = vector.shape_cast %387 : vector<2x4x4x20xf32> to vector<32x20xf32>
    %c3_515 = arith.constant 3 : index
    %c0_516 = arith.constant 0 : index
    %c0_517 = arith.constant 0 : index
    %389 = vector.load %arg7[%c3_515, %c0_516, %c0_517] : memref<9x20x22xf32, #tpu.memory_space<vmem>>, vector<1x20x22xf32>
    %390 = vector.shape_cast %389 : vector<1x20x22xf32> to vector<20x22xf32>
    %cst_518 = arith.constant dense<0.000000e+00> : vector<32x22xf32>
    %391 = tpu.matmul %388, %390, %cst_518 {dimension_numbers = #tpu.dot_dimension_numbers<[1], [0], [0], [1], [0, 0, 1, 1], [], []>} : vector<32x20xf32>, vector<20x22xf32>, vector<32x22xf32> -> vector<32x22xf32>
    %392 = arith.addf %386, %391 : vector<32x22xf32>
    %c0_519 = arith.constant 0 : index
    %c1_520 = arith.constant 1 : index
    %c1_521 = arith.constant 1 : index
    %c0_522 = arith.constant 0 : index
    %393 = vector.load %arg12[%c0_519, %c1_520, %c1_521, %c0_522] : memref<2x6x6x20xf32, #tpu.memory_space<vmem>>, vector<2x4x4x20xf32>
    %394 = vector.shape_cast %393 : vector<2x4x4x20xf32> to vector<32x20xf32>
    %c4_523 = arith.constant 4 : index
    %c0_524 = arith.constant 0 : index
    %c0_525 = arith.constant 0 : index
    %395 = vector.load %arg7[%c4_523, %c0_524, %c0_525] : memref<9x20x22xf32, #tpu.memory_space<vmem>>, vector<1x20x22xf32>
    %396 = vector.shape_cast %395 : vector<1x20x22xf32> to vector<20x22xf32>
    %cst_526 = arith.constant dense<0.000000e+00> : vector<32x22xf32>
    %397 = tpu.matmul %394, %396, %cst_526 {dimension_numbers = #tpu.dot_dimension_numbers<[1], [0], [0], [1], [0, 0, 1, 1], [], []>} : vector<32x20xf32>, vector<20x22xf32>, vector<32x22xf32> -> vector<32x22xf32>
    %398 = arith.addf %392, %397 : vector<32x22xf32>
    %c0_527 = arith.constant 0 : index
    %c1_528 = arith.constant 1 : index
    %c2_529 = arith.constant 2 : index
    %c0_530 = arith.constant 0 : index
    %399 = vector.load %arg12[%c0_527, %c1_528, %c2_529, %c0_530] : memref<2x6x6x20xf32, #tpu.memory_space<vmem>>, vector<2x4x4x20xf32>
    %400 = vector.shape_cast %399 : vector<2x4x4x20xf32> to vector<32x20xf32>
    %c5_531 = arith.constant 5 : index
    %c0_532 = arith.constant 0 : index
    %c0_533 = arith.constant 0 : index
    %401 = vector.load %arg7[%c5_531, %c0_532, %c0_533] : memref<9x20x22xf32, #tpu.memory_space<vmem>>, vector<1x20x22xf32>
    %402 = vector.shape_cast %401 : vector<1x20x22xf32> to vector<20x22xf32>
    %cst_534 = arith.constant dense<0.000000e+00> : vector<32x22xf32>
    %403 = tpu.matmul %400, %402, %cst_534 {dimension_numbers = #tpu.dot_dimension_numbers<[1], [0], [0], [1], [0, 0, 1, 1], [], []>} : vector<32x20xf32>, vector<20x22xf32>, vector<32x22xf32> -> vector<32x22xf32>
    %404 = arith.addf %398, %403 : vector<32x22xf32>
    %c0_535 = arith.constant 0 : index
    %c2_536 = arith.constant 2 : index
    %c0_537 = arith.constant 0 : index
    %c0_538 = arith.constant 0 : index
    %405 = vector.load %arg12[%c0_535, %c2_536, %c0_537, %c0_538] : memref<2x6x6x20xf32, #tpu.memory_space<vmem>>, vector<2x4x4x20xf32>
    %406 = vector.shape_cast %405 : vector<2x4x4x20xf32> to vector<32x20xf32>
    %c6_539 = arith.constant 6 : index
    %c0_540 = arith.constant 0 : index
    %c0_541 = arith.constant 0 : index
    %407 = vector.load %arg7[%c6_539, %c0_540, %c0_541] : memref<9x20x22xf32, #tpu.memory_space<vmem>>, vector<1x20x22xf32>
    %408 = vector.shape_cast %407 : vector<1x20x22xf32> to vector<20x22xf32>
    %cst_542 = arith.constant dense<0.000000e+00> : vector<32x22xf32>
    %409 = tpu.matmul %406, %408, %cst_542 {dimension_numbers = #tpu.dot_dimension_numbers<[1], [0], [0], [1], [0, 0, 1, 1], [], []>} : vector<32x20xf32>, vector<20x22xf32>, vector<32x22xf32> -> vector<32x22xf32>
    %410 = arith.addf %404, %409 : vector<32x22xf32>
    %c0_543 = arith.constant 0 : index
    %c2_544 = arith.constant 2 : index
    %c1_545 = arith.constant 1 : index
    %c0_546 = arith.constant 0 : index
    %411 = vector.load %arg12[%c0_543, %c2_544, %c1_545, %c0_546] : memref<2x6x6x20xf32, #tpu.memory_space<vmem>>, vector<2x4x4x20xf32>
    %412 = vector.shape_cast %411 : vector<2x4x4x20xf32> to vector<32x20xf32>
    %c7_547 = arith.constant 7 : index
    %c0_548 = arith.constant 0 : index
    %c0_549 = arith.constant 0 : index
    %413 = vector.load %arg7[%c7_547, %c0_548, %c0_549] : memref<9x20x22xf32, #tpu.memory_space<vmem>>, vector<1x20x22xf32>
    %414 = vector.shape_cast %413 : vector<1x20x22xf32> to vector<20x22xf32>
    %cst_550 = arith.constant dense<0.000000e+00> : vector<32x22xf32>
    %415 = tpu.matmul %412, %414, %cst_550 {dimension_numbers = #tpu.dot_dimension_numbers<[1], [0], [0], [1], [0, 0, 1, 1], [], []>} : vector<32x20xf32>, vector<20x22xf32>, vector<32x22xf32> -> vector<32x22xf32>
    %416 = arith.addf %410, %415 : vector<32x22xf32>
    %c0_551 = arith.constant 0 : index
    %c2_552 = arith.constant 2 : index
    %c2_553 = arith.constant 2 : index
    %c0_554 = arith.constant 0 : index
    %417 = vector.load %arg12[%c0_551, %c2_552, %c2_553, %c0_554] : memref<2x6x6x20xf32, #tpu.memory_space<vmem>>, vector<2x4x4x20xf32>
    %418 = vector.shape_cast %417 : vector<2x4x4x20xf32> to vector<32x20xf32>
    %c8_555 = arith.constant 8 : index
    %c0_556 = arith.constant 0 : index
    %c0_557 = arith.constant 0 : index
    %419 = vector.load %arg7[%c8_555, %c0_556, %c0_557] : memref<9x20x22xf32, #tpu.memory_space<vmem>>, vector<1x20x22xf32>
    %420 = vector.shape_cast %419 : vector<1x20x22xf32> to vector<20x22xf32>
    %cst_558 = arith.constant dense<0.000000e+00> : vector<32x22xf32>
    %421 = tpu.matmul %418, %420, %cst_558 {dimension_numbers = #tpu.dot_dimension_numbers<[1], [0], [0], [1], [0, 0, 1, 1], [], []>} : vector<32x20xf32>, vector<20x22xf32>, vector<32x22xf32> -> vector<32x22xf32>
    %422 = arith.addf %416, %421 : vector<32x22xf32>
    %423 = vector.shape_cast %422 : vector<32x22xf32> to vector<2x4x4x22xf32>
    %424 = vector.extract_strided_slice %423 {offsets = [0, 0, 0, 0], sizes = [2, 1, 1, 22], strides = [1, 1, 1, 1]} : vector<2x4x4x22xf32> to vector<2x1x1x22xf32>
    %425 = vector.shape_cast %424 : vector<2x1x1x22xf32> to vector<2x22xf32>
    %426 = vector.extract_strided_slice %423 {offsets = [0, 0, 1, 0], sizes = [2, 1, 1, 22], strides = [1, 1, 1, 1]} : vector<2x4x4x22xf32> to vector<2x1x1x22xf32>
    %427 = vector.shape_cast %426 : vector<2x1x1x22xf32> to vector<2x22xf32>
    %428 = arith.maximumf %425, %427 : vector<2x22xf32>
    %429 = vector.extract_strided_slice %423 {offsets = [0, 1, 0, 0], sizes = [2, 1, 1, 22], strides = [1, 1, 1, 1]} : vector<2x4x4x22xf32> to vector<2x1x1x22xf32>
    %430 = vector.shape_cast %429 : vector<2x1x1x22xf32> to vector<2x22xf32>
    %431 = vector.extract_strided_slice %423 {offsets = [0, 1, 1, 0], sizes = [2, 1, 1, 22], strides = [1, 1, 1, 1]} : vector<2x4x4x22xf32> to vector<2x1x1x22xf32>
    %432 = vector.shape_cast %431 : vector<2x1x1x22xf32> to vector<2x22xf32>
    %433 = arith.maximumf %430, %432 : vector<2x22xf32>
    %434 = arith.maximumf %428, %433 : vector<2x22xf32>
    %435 = vector.extract_strided_slice %423 {offsets = [0, 0, 2, 0], sizes = [2, 1, 1, 22], strides = [1, 1, 1, 1]} : vector<2x4x4x22xf32> to vector<2x1x1x22xf32>
    %436 = vector.shape_cast %435 : vector<2x1x1x22xf32> to vector<2x22xf32>
    %437 = vector.extract_strided_slice %423 {offsets = [0, 0, 3, 0], sizes = [2, 1, 1, 22], strides = [1, 1, 1, 1]} : vector<2x4x4x22xf32> to vector<2x1x1x22xf32>
    %438 = vector.shape_cast %437 : vector<2x1x1x22xf32> to vector<2x22xf32>
    %439 = arith.maximumf %436, %438 : vector<2x22xf32>
    %440 = vector.extract_strided_slice %423 {offsets = [0, 1, 2, 0], sizes = [2, 1, 1, 22], strides = [1, 1, 1, 1]} : vector<2x4x4x22xf32> to vector<2x1x1x22xf32>
    %441 = vector.shape_cast %440 : vector<2x1x1x22xf32> to vector<2x22xf32>
    %442 = vector.extract_strided_slice %423 {offsets = [0, 1, 3, 0], sizes = [2, 1, 1, 22], strides = [1, 1, 1, 1]} : vector<2x4x4x22xf32> to vector<2x1x1x22xf32>
    %443 = vector.shape_cast %442 : vector<2x1x1x22xf32> to vector<2x22xf32>
    %444 = arith.maximumf %441, %443 : vector<2x22xf32>
    %445 = arith.maximumf %439, %444 : vector<2x22xf32>
    %446 = vector.extract_strided_slice %423 {offsets = [0, 2, 0, 0], sizes = [2, 1, 1, 22], strides = [1, 1, 1, 1]} : vector<2x4x4x22xf32> to vector<2x1x1x22xf32>
    %447 = vector.shape_cast %446 : vector<2x1x1x22xf32> to vector<2x22xf32>
    %448 = vector.extract_strided_slice %423 {offsets = [0, 2, 1, 0], sizes = [2, 1, 1, 22], strides = [1, 1, 1, 1]} : vector<2x4x4x22xf32> to vector<2x1x1x22xf32>
    %449 = vector.shape_cast %448 : vector<2x1x1x22xf32> to vector<2x22xf32>
    %450 = arith.maximumf %447, %449 : vector<2x22xf32>
    %451 = vector.extract_strided_slice %423 {offsets = [0, 3, 0, 0], sizes = [2, 1, 1, 22], strides = [1, 1, 1, 1]} : vector<2x4x4x22xf32> to vector<2x1x1x22xf32>
    %452 = vector.shape_cast %451 : vector<2x1x1x22xf32> to vector<2x22xf32>
    %453 = vector.extract_strided_slice %423 {offsets = [0, 3, 1, 0], sizes = [2, 1, 1, 22], strides = [1, 1, 1, 1]} : vector<2x4x4x22xf32> to vector<2x1x1x22xf32>
    %454 = vector.shape_cast %453 : vector<2x1x1x22xf32> to vector<2x22xf32>
    %455 = arith.maximumf %452, %454 : vector<2x22xf32>
    %456 = arith.maximumf %450, %455 : vector<2x22xf32>
    %457 = vector.extract_strided_slice %423 {offsets = [0, 2, 2, 0], sizes = [2, 1, 1, 22], strides = [1, 1, 1, 1]} : vector<2x4x4x22xf32> to vector<2x1x1x22xf32>
    %458 = vector.shape_cast %457 : vector<2x1x1x22xf32> to vector<2x22xf32>
    %459 = vector.extract_strided_slice %423 {offsets = [0, 2, 3, 0], sizes = [2, 1, 1, 22], strides = [1, 1, 1, 1]} : vector<2x4x4x22xf32> to vector<2x1x1x22xf32>
    %460 = vector.shape_cast %459 : vector<2x1x1x22xf32> to vector<2x22xf32>
    %461 = arith.maximumf %458, %460 : vector<2x22xf32>
    %462 = vector.extract_strided_slice %423 {offsets = [0, 3, 2, 0], sizes = [2, 1, 1, 22], strides = [1, 1, 1, 1]} : vector<2x4x4x22xf32> to vector<2x1x1x22xf32>
    %463 = vector.shape_cast %462 : vector<2x1x1x22xf32> to vector<2x22xf32>
    %464 = vector.extract_strided_slice %423 {offsets = [0, 3, 3, 0], sizes = [2, 1, 1, 22], strides = [1, 1, 1, 1]} : vector<2x4x4x22xf32> to vector<2x1x1x22xf32>
    %465 = vector.shape_cast %464 : vector<2x1x1x22xf32> to vector<2x22xf32>
    %466 = arith.maximumf %463, %465 : vector<2x22xf32>
    %467 = arith.maximumf %461, %466 : vector<2x22xf32>
    %468 = vector.shape_cast %434 : vector<2x22xf32> to vector<2x22x1xf32>
    %469 = vector.shape_cast %445 : vector<2x22xf32> to vector<2x22x1xf32>
    %470 = vector.shape_cast %456 : vector<2x22xf32> to vector<2x22x1xf32>
    %471 = vector.shape_cast %467 : vector<2x22xf32> to vector<2x22x1xf32>
    %472 = tpu.concatenate %468, %469, %470, %471 in 2 : vector<2x22x1xf32>, vector<2x22x1xf32>, vector<2x22x1xf32>, vector<2x22x1xf32> -> vector<2x22x4xf32>
    %473 = vector.shape_cast %472 : vector<2x22x4xf32> to vector<2x88xf32>
    %cst_559 = arith.constant 0.000000e+00 : f32
    %474 = vector.broadcast %cst_559 : f32 to vector<2x88xf32>
    %475 = arith.cmpf ogt, %473, %474 : vector<2x88xf32>
    %cst_560 = arith.constant 5.000000e-02 : f32
    %476 = vector.broadcast %cst_560 : f32 to vector<2x88xf32>
    %477 = arith.mulf %476, %473 : vector<2x88xf32>
    %478 = arith.select %475, %473, %477 : vector<2x88xi1>, vector<2x88xf32>
    %c0_561 = arith.constant 0 : index
    %c0_562 = arith.constant 0 : index
    %479 = vector.load %arg9[%c0_561, %c0_562] : memref<2x88xf32, #tpu.memory_space<vmem>>, vector<2x88xf32>
    tpu.vector_store %arg9[%c0_561, %c0_562], %478 {strides = array<i32>} : memref<2x88xf32, #tpu.memory_space<vmem>>, vector<2x88xf32>,
    return
  }
}

</mosaic_0001>

<bundles_post_ra>
// kernel: forward.1
= control target key start
LH: loop header
LB: loop body
LE: loop exit
PB: predicated region body
PF: predicated region fallthrough
CT: control target
= control target key end

     0   :  { %vm301_vm0 = vcmask 1040384   ;;  %vm108_vm1 = vcmask 203776   ;;  %vm8964_vm2 = vmmov 1   ;;  %s10351_s0 = inlined_call_operand.vmem [shape: f32[512,25], index: 0, kind: input, shape index: {}]   ;;  %s10352_s1 = inlined_call_operand.vmem [shape: f32[25,4], index: 1, kind: input, shape index: {}]   ;;  %s10353_s2 = inlined_call_operand.vmem [shape: f32[1,4], index: 2, kind: input, shape index: {}]   ;;  %s10354_s3 = inlined_call_operand.vmem [shape: f32[25,4,16], index: 3, kind: input, shape index: {}]   ;;  %s10355_s4 = inlined_call_operand.vmem [shape: f32[1,16], index: 4, kind: input, shape index: {}]   ;;  %s10356_s5 = inlined_call_operand.vmem [shape: f32[9,16,20], index: 5, kind: input, shape index: {}]   ;;  %s10357_s6 = inlined_call_operand.vmem [shape: f32[1,20], index: 6, kind: input, shape index: {}]   ;;  %s10358_s7 = inlined_call_operand.vmem [shape: f32[9,20,22], index: 7, kind: input, shape index: {}]   ;;  %s10359_s8 = inlined_call_operand.vmem [shape: f32[1,22], index: 8, kind: input, shape index: {}]   ;;  %s10360_s9 = inlined_call_operand.hbm [shape: f32[2,88], index: 9, kind: output, shape index: {}]  }
   0x1   :  { %v97_v0 = vld [vmem:[%s10352_s1] sm:$0xff]  ;;  %v98_v1 = vld [vmem:[%s10352_s1 + $0x8] sm:$0xff]  ;;  %v99_v2 = vld [vmem:[%s10352_s1 + $0x10] sm:$0xff] }
   0x2   :  { %v8487_v3 = vpack.c.bf16 %v98_v1, %v97_v0  ;;  %v100_v4 = vld [vmem:[%s10352_s1 + $0x18] sm:$0x1]  ;;  %v33_v5 = vld [vmem:[%s10351_s0] sm:$0xff]  ;;  %vm8492_vm3 = vmpackc.low %vm301_vm0, %vm8964_vm2 }
   0x3   :  { %v8491_v6 = vpack.c.bf16 %v100_v4, %v99_v2  ;;  %7993 = vmatprep.mubr.msk.f32.mxu0 %vm108_vm1, %v33_v5  ;;  %v34_v7 = vld [vmem:[%s10351_s0 + $0x8] sm:$0xff]  ;;  %v35_v8 = vld [vmem:[%s10351_s0 + $0x10] sm:$0xff]  ;;  %v36_v9 = vld [vmem:[%s10351_s0 + $0x18] sm:$0xff] }
   0x4   :  { %8488 = vmatprep.subr.bf16.mxu0 %v8487_v3  ;;  %v37_v10 = vld [vmem:[%s10351_s0 + $0x20] sm:$0xff]  ;;  %v38_v11 = vld [vmem:[%s10351_s0 + $0x28] sm:$0xff]  ;;  %v39_v12 = vld [vmem:[%s10351_s0 + $0x30] sm:$0xff] }
   0x5   :  { %8490 = vmatpush3.bf16.msra.mxu0 %v8487_v3  ;;  %v40_v13 = vld [vmem:[%s10351_s0 + $0x38] sm:$0xff]  ;;  %v41_v14 = vld [vmem:[%s10351_s0 + $0x40] sm:$0xff] }
   0x6   :  { %8493 = vmatprep.subr.msk.bf16.mxu0 %vm8492_vm3, %v8491_v6 }
   0x9   :  { %8496 = vmatpush3.bf16.msk.msra.mxu0 %vm8492_vm3, %v8491_v6 }
   0xc   :  { %7994 = vmatmul.mubr.msk.f32.vlgmr.msra.gmra.mrb[0].mxu0 %vm108_vm1, %v34_v7 }
   0xd   :  { %7996 = vmatprep.mubr.msk.f32.mxu0 %vm108_vm1, %v35_v8 }
  0x10   :  { %7997 = vmatmul.mubr.msk.f32.gmra.mrb[2].mxu0 %vm108_vm1, %v36_v9 }
  0x11   :  { %7999 = vmatprep.mubr.msk.f32.mxu0 %vm108_vm1, %v37_v10 }
  0x14   :  { %8000 = vmatmul.mubr.msk.f32.gmra.mrb[4].mxu0 %vm108_vm1, %v38_v11 }
  0x15   :  { %8002 = vmatprep.mubr.msk.f32.mxu0 %vm108_vm1, %v39_v12 }
  0x18   :  { %8003 = vmatmul.mubr.msk.f32.gmra.mrb[6].mxu0 %vm108_vm1, %v40_v13 }
  0x19   :  { %14 = vsyncpa [#allocation6], 0  ;;  %8005 = vmatprep.mubr.msk.f32.mxu0 %vm108_vm1, %v41_v14  ;;  %v42_v15 = vld [vmem:[%s10351_s0 + $0x48] sm:$0xff]  ;;  %v43_v16 = vld [vmem:[%s10351_s0 + $0x50] sm:$0xff]  ;;  %vm1108_vm4 = vcmask 24576   ;;  %v8965_v62 = vmov 0.0  }
  0x1a   :  { %v44_v17 = vld [vmem:[%s10351_s0 + $0x58] sm:$0xff]  ;;  %v45_v18 = vld [vmem:[%s10351_s0 + $0x60] sm:$0xff]  ;;  %v46_v19 = vld [vmem:[%s10351_s0 + $0x68] sm:$0xff]  ;;  %1110 = vst.msk [vmem:[#allocation2 + $0x8] sm:$0x1] %vm1108_vm4, %v8965_v62  ;;  %vm1074_vm5 = vcmask 28672  }
  0x1b   :  { %v47_v20 = vld [vmem:[%s10351_s0 + $0x70] sm:$0xff]  ;;  %v48_v21 = vld [vmem:[%s10351_s0 + $0x78] sm:$0xff]  ;;  %v49_v22 = vld [vmem:[%s10351_s0 + $0x80] sm:$0xff]  ;;  %1111 = vst.msk [vmem:[#allocation2 + $0x10] sm:$0x1] %vm1108_vm4, %v8965_v62  ;;  %vm1452_vm6 = vcmask 1043456  }
  0x1c   :  { %8006 = vmatmul.mubr.msk.f32.gmra.mrb[8].mxu0 %vm108_vm1, %v42_v15  ;;  %v50_v23 = vld [vmem:[%s10351_s0 + $0x88] sm:$0xff]  ;;  %v51_v24 = vld [vmem:[%s10351_s0 + $0x90] sm:$0xff]  ;;  %v52_v25 = vld [vmem:[%s10351_s0 + $0x98] sm:$0xff]  ;;  %1112 = vst.msk [vmem:[#allocation2 + $0x18] sm:$0x1] %vm1108_vm4, %v8965_v62  ;;  %vm1271_vm8 = vcmask 27648  }
  0x1d   :  { %8008 = vmatprep.mubr.msk.f32.mxu0 %vm108_vm1, %v43_v16  ;;  %v53_v26 = vld [vmem:[%s10351_s0 + $0xa0] sm:$0xff]  ;;  %v54_v27 = vld [vmem:[%s10351_s0 + $0xa8] sm:$0xff]  ;;  %v55_v28 = vld [vmem:[%s10351_s0 + $0xb0] sm:$0xff]  ;;  %1113 = vst.msk [vmem:[#allocation2 + $0x20] sm:$0x1] %vm1108_vm4, %v8965_v62  ;;  %s8970_s27 = smov 12  }
  0x1e   :  { %v56_v29 = vld [vmem:[%s10351_s0 + $0xb8] sm:$0xff]  ;;  %v57_v30 = vld [vmem:[%s10351_s0 + $0xc0] sm:$0xff]  ;;  %v58_v31 = vld [vmem:[%s10351_s0 + $0xc8] sm:$0xff]  ;;  %1115 = vst.msk [vmem:[#allocation2 + $0x30] sm:$0x1] %vm1108_vm4, %v8965_v62  ;;  %s8971_s28 = smov 32  }
  0x1f   :  { %v59_v32 = vld [vmem:[%s10351_s0 + $0xd0] sm:$0xff]  ;;  %v60_v33 = vld [vmem:[%s10351_s0 + $0xd8] sm:$0xff]  ;;  %v61_v34 = vld [vmem:[%s10351_s0 + $0xe0] sm:$0xff]  ;;  %1116 = vst.msk [vmem:[#allocation2 + $0x38] sm:$0x1] %vm1108_vm4, %v8965_v62  ;;  %s8972_s29 = smov 36  }
  0x20   :  { %8009 = vmatmul.mubr.msk.f32.gmra.mrb[10].mxu0 %vm108_vm1, %v44_v17  ;;  %v62_v35 = vld [vmem:[%s10351_s0 + $0xe8] sm:$0xff]  ;;  %v63_v36 = vld [vmem:[%s10351_s0 + $0xf0] sm:$0xff]  ;;  %v64_v37 = vld [vmem:[%s10351_s0 + $0xf8] sm:$0xff]  ;;  %1117 = vst.msk [vmem:[#allocation2 + $0x40] sm:$0x1] %vm1108_vm4, %v8965_v62  ;;  %s8973_s30 = smov 40  }
  0x21   :  { %8011 = vmatprep.mubr.msk.f32.mxu0 %vm108_vm1, %v45_v18  ;;  %v65_v38 = vld [vmem:[%s10351_s0 + $0x100] sm:$0xff]  ;;  %v66_v39 = vld [vmem:[%s10351_s0 + $0x108] sm:$0xff]  ;;  %v67_v40 = vld [vmem:[%s10351_s0 + $0x110] sm:$0xff]  ;;  %1118 = vst.msk [vmem:[#allocation2 + $0x48] sm:$0x1] %vm1108_vm4, %v8965_v62  ;;  %s8974_s10 = smov 44  }
  0x22   :  { %v68_v41 = vld [vmem:[%s10351_s0 + $0x118] sm:$0xff]  ;;  %v69_v42 = vld [vmem:[%s10351_s0 + $0x120] sm:$0xff]  ;;  %v70_v43 = vld [vmem:[%s10351_s0 + $0x128] sm:$0xff]  ;;  %1120 = vst.msk [vmem:[#allocation2 + $0x58] sm:$0x1] %vm1108_vm4, %v8965_v62  ;;  %s8975_s11 = smov 64  }
  0x23   :  { %v71_v44 = vld [vmem:[%s10351_s0 + $0x130] sm:$0xff]  ;;  %v72_v45 = vld [vmem:[%s10351_s0 + $0x138] sm:$0xff]  ;;  %v73_v46 = vld [vmem:[%s10351_s0 + $0x140] sm:$0xff]  ;;  %1121 = vst.msk [vmem:[#allocation2 + $0x60] sm:$0x1] %vm1108_vm4, %v8965_v62  ;;  %s8976_s12 = smov 68  }
  0x24   :  { %8012 = vmatmul.mubr.msk.f32.gmra.mrb[12].mxu0 %vm108_vm1, %v46_v19  ;;  %v74_v47 = vld [vmem:[%s10351_s0 + $0x148] sm:$0xff]  ;;  %v75_v48 = vld [vmem:[%s10351_s0 + $0x150] sm:$0xff]  ;;  %v76_v49 = vld [vmem:[%s10351_s0 + $0x158] sm:$0xff]  ;;  %1122 = vst.msk [vmem:[#allocation2 + $0x68] sm:$0x1] %vm1108_vm4, %v8965_v62  ;;  %s8978_s13 = smov 20  }
  0x25   :  { %8014 = vmatprep.mubr.msk.f32.mxu0 %vm108_vm1, %v47_v20  ;;  %v77_v50 = vld [vmem:[%s10351_s0 + $0x160] sm:$0xff]  ;;  %v78_v51 = vld [vmem:[%s10351_s0 + $0x168] sm:$0xff]  ;;  %v79_v52 = vld [vmem:[%s10351_s0 + $0x170] sm:$0xff]  ;;  %1123 = vst.msk [vmem:[#allocation2 + $0x70] sm:$0x1] %vm1108_vm4, %v8965_v62  ;;  %s8979_s14 = smov 24  }
  0x26   :  { %v80_v53 = vld [vmem:[%s10351_s0 + $0x178] sm:$0xff]  ;;  %v81_v54 = vld [vmem:[%s10351_s0 + $0x180] sm:$0xff]  ;;  %v82_v55 = vld [vmem:[%s10351_s0 + $0x188] sm:$0xff]  ;;  %1125 = vst.msk [vmem:[#allocation2 + $0x80] sm:$0x1] %vm1108_vm4, %v8965_v62  ;;  %s8981_s15 = smov 48  }
  0x27   :  { %v83_v56 = vld [vmem:[%s10351_s0 + $0x190] sm:$0xff]  ;;  %v84_v57 = vld [vmem:[%s10351_s0 + $0x198] sm:$0xff]  ;;  %v85_v58 = vld [vmem:[%s10351_s0 + $0x1a0] sm:$0xff]  ;;  %1126 = vst.msk [vmem:[#allocation2 + $0x88] sm:$0x1] %vm1108_vm4, %v8965_v62  ;;  %s8982_s16 = smov 52  }
  0x28   :  { %8015 = vmatmul.mubr.msk.f32.gmra.mrb[14].mxu0 %vm108_vm1, %v48_v21  ;;  %v86_v59 = vld [vmem:[%s10351_s0 + $0x1a8] sm:$0xff]  ;;  %v87_v60 = vld [vmem:[%s10351_s0 + $0x1b0] sm:$0xff]  ;;  %v9275_v61 = vld [vmem:[%s10351_s0 + $0x1b8] sm:$0xff]  ;;  %1127 = vst.msk [vmem:[#allocation2 + $0x90] sm:$0x1] %vm1108_vm4, %v8965_v62  ;;  %s8983_s17 = smov 56  }
  0x29   :  { %8017 = vmatprep.mubr.msk.f32.mxu0 %vm108_vm1, %v49_v22  ;;  %1128 = vst.msk [vmem:[#allocation2 + $0x98] sm:$0x1] %vm1108_vm4, %v8965_v62  ;;  %1130 = vst.msk [vmem:[#allocation2 + $0x148] sm:$0x1] %vm1108_vm4, %v8965_v62  ;;  %v89_v63 = vld [vmem:[%s10351_s0 + $0x1c0] sm:$0xff]  ;;  %v90_v0 = vld [vmem:[%s10351_s0 + $0x1c8] sm:$0xff] }
  0x2a   :  { %1131 = vst.msk [vmem:[#allocation2 + $0x150] sm:$0x1] %vm1108_vm4, %v8965_v62  ;;  %1132 = vst.msk [vmem:[#allocation2 + $0x158] sm:$0x1] %vm1108_vm4, %v8965_v62  ;;  %v91_v1 = vld [vmem:[%s10351_s0 + $0x1d0] sm:$0xff]  ;;  %v92_v2 = vld [vmem:[%s10351_s0 + $0x1d8] sm:$0xff] }
  0x2b   :  { %1135 = vst.msk [vmem:[#allocation2 + $0x170] sm:$0x1] %vm1108_vm4, %v8965_v62  ;;  %1136 = vst.msk [vmem:[#allocation2 + $0x178] sm:$0x1] %vm1108_vm4, %v8965_v62  ;;  %v93_v3 = vld [vmem:[%s10351_s0 + $0x1e0] sm:$0xff]  ;;  %v94_v4 = vld [vmem:[%s10351_s0 + $0x1e8] sm:$0xff] }
  0x2c   :  { %8018 = vmatmul.mubr.msk.f32.gmra.mrb[16].mxu0 %vm108_vm1, %v50_v23  ;;  %1137 = vst.msk [vmem:[#allocation2 + $0x180] sm:$0x1] %vm1108_vm4, %v8965_v62  ;;  %1140 = vst.msk [vmem:[#allocation2 + $0x198] sm:$0x1] %vm1108_vm4, %v8965_v62  ;;  %v95_v5 = vld [vmem:[%s10351_s0 + $0x1f0] sm:$0xff]  ;;  %v96_v6 = vld [vmem:[%s10351_s0 + $0x1f8] sm:$0xff] }
  0x2d   :  { %8020 = vmatprep.mubr.msk.f32.mxu0 %vm108_vm1, %v51_v24  ;;  %1141 = vst.msk [vmem:[#allocation2 + $0x1a0] sm:$0x1] %vm1108_vm4, %v8965_v62  ;;  %1142 = vst.msk [vmem:[#allocation2 + $0x1a8] sm:$0x1] %vm1108_vm4, %v8965_v62  ;;  %v1430_v7 = vld [vmem:[%s10354_s3] sm:$0xf] }
  0x2e   :  { %1145 = vst.msk [vmem:[#allocation2 + $0x1c0] sm:$0x1] %vm1108_vm4, %v8965_v62  ;;  %1146 = vst.msk [vmem:[#allocation2 + $0x1c8] sm:$0x1] %vm1108_vm4, %v8965_v62  ;;  %v7417_v8 = vld [vmem:[%s10354_s3 + $0x10] sm:$0xf]  ;;  %8089 = vmatprep.subr.msk.mxu0 %vm1452_vm6, %v1430_v7 }
  0x2f   :  { %1147 = vst.msk [vmem:[#allocation2 + $0x1d0] sm:$0x1] %vm1108_vm4, %v8965_v62  ;;  %1149 = vst.msk [vmem:[#allocation2 + $0x280] sm:$0x1] %vm1108_vm4, %v8965_v62  ;;  %8121 = vmatprep.subr.msk.mxu1 %vm1452_vm6, %v7417_v8  ;;  %8090 = vmatpush3.msk.msra.mxu0 %vm1452_vm6, %v1430_v7  ;;  %v9492_v9 = vld [vmem:[%s10354_s3 + $0x4] sm:$0xf] }
  0x30   :  { %8021 = vmatmul.mubr.msk.f32.gmra.mrb[18].mxu0 %vm108_vm1, %v52_v25  ;;  %1150 = vst.msk [vmem:[#allocation2 + $0x288] sm:$0x1] %vm1108_vm4, %v8965_v62  ;;  %1151 = vst.msk [vmem:[#allocation2 + $0x290] sm:$0x1] %vm1108_vm4, %v8965_v62  ;;  %8122 = vmatpush3.msk.msra.mxu1 %vm1452_vm6, %v7417_v8  ;;  %v9499_v10 = vld [vmem:[%s10353_s2] ss:$0 sm:$0xff] }
  0x31   :  { %8023 = vmatprep.mubr.msk.f32.mxu0 %vm108_vm1, %v53_v26  ;;  %1152 = vst.msk [vmem:[#allocation2 + $0x298] sm:$0x1] %vm1108_vm4, %v8965_v62  ;;  %1154 = vst.msk [vmem:[#allocation2 + $0x2a8] sm:$0x1] %vm1108_vm4, %v8965_v62  ;;  %8097 = vmatprep.subr.msk.mxu0 %vm1452_vm6, %v9492_v9  ;;  %v9505_v14 = vld [vmem:[%s10354_s3 + $0x14] sm:$0xf] }
  0x32   :  { %1155 = vst.msk [vmem:[#allocation2 + $0x2b0] sm:$0x1] %vm1108_vm4, %v8965_v62  ;;  %1156 = vst.msk [vmem:[#allocation2 + $0x2b8] sm:$0x1] %vm1108_vm4, %v8965_v62  ;;  %8129 = vmatprep.subr.msk.mxu1 %vm1452_vm6, %v9505_v14  ;;  %s8977_s0 = smov 16   ;;  %s8985_s18 = smov 72  }
  0x33   :  { %1157 = vst.msk [vmem:[#allocation2 + $0x2c0] sm:$0x1] %vm1108_vm4, %v8965_v62  ;;  %1159 = vst.msk [vmem:[#allocation2 + $0x2d0] sm:$0x1] %vm1108_vm4, %v8965_v62  ;;  %s8986_s19 = smov 76   ;;  %s8987_s20 = smov 80  }
  0x34   :  { %8024 = vmatmul.mubr.msk.f32.gmra.mrb[20].mxu0 %vm108_vm1, %v54_v27  ;;  %1160 = vst.msk [vmem:[#allocation2 + $0x2d8] sm:$0x1] %vm1108_vm4, %v8965_v62  ;;  %1161 = vst.msk [vmem:[#allocation2 + $0x2e0] sm:$0x1] %vm1108_vm4, %v8965_v62  ;;  %s8988_s21 = smov 84   ;;  %s8989_s22 = smov [#allocation5]  }
  0x35   :  { %8026 = vmatprep.mubr.msk.f32.mxu0 %vm108_vm1, %v55_v28  ;;  %1162 = vst.msk [vmem:[#allocation2 + $0x2e8] sm:$0x1] %vm1108_vm4, %v8965_v62  ;;  %1164 = vst.msk [vmem:[#allocation2 + $0x2f8] sm:$0x1] %vm1108_vm4, %v8965_v62  ;;  %s7319_s1 = sshll.u32 %s8989_s22, 4  ;;  %s7320_s1 = int_to_ptr.vmem [resolvable:$true] %s7319_s1 }
  0x36   :  { %1165 = vst.msk [vmem:[#allocation2 + $0x300] sm:$0x1] %vm1108_vm4, %v8965_v62  ;;  %1166 = vst.msk [vmem:[#allocation2 + $0x308] sm:$0x1] %vm1108_vm4, %v8965_v62  ;;  %s8940_s23 = scalar_lea.vmem %s7320_s1, 32  ;;  %p8945_p1 = scmp.lt.s32.totalorder %s7320_s1, %s7320_s1 }
  0x37   :  { %1167 = vst.msk [vmem:[#allocation2 + $0x310] sm:$0x1] %vm1108_vm4, %v8965_v62  ;;  %1169 = vst.msk [vmem:[#allocation2 + $0x3c0] sm:$0x1] %vm1108_vm4, %v8965_v62  ;;  %p8941_p0 = scmp.ne.s32.totalorder %s7320_s1, %s8940_s23  ;;  %p8946_p2 = scmp.lt.s32.totalorder %s8940_s23, %s8940_s23 }
  0x38   :  { %8027 = vmatmul.mubr.msk.f32.gmra.mrb[22].mxu0 %vm108_vm1, %v56_v29  ;;  %1170 = vst.msk [vmem:[#allocation2 + $0x3c8] sm:$0x1] %vm1108_vm4, %v8965_v62  ;;  %1171 = vst.msk [vmem:[#allocation2 + $0x3d0] sm:$0x1] %vm1108_vm4, %v8965_v62 }
  0x39   :  { %8029 = vmatprep.mubr.msk.f32.mxu0 %vm108_vm1, %v57_v30  ;;  %1172 = vst.msk [vmem:[#allocation2 + $0x3d8] sm:$0x1] %vm1108_vm4, %v8965_v62  ;;  %1174 = vst.msk [vmem:[#allocation2 + $0x3e8] sm:$0x1] %vm1108_vm4, %v8965_v62  ;;  %p8947_p3 = por %p8946_p2, %p8945_p1 }
  0x3a   :  { %1175 = vst.msk [vmem:[#allocation2 + $0x3f0] sm:$0x1] %vm1108_vm4, %v8965_v62  ;;  %1176 = vst.msk [vmem:[#allocation2 + $0x3f8] sm:$0x1] %vm1108_vm4, %v8965_v62 }
  0x3b   :  { %1177 = vst.msk [vmem:[#allocation2 + $0x400] sm:$0x1] %vm1108_vm4, %v8965_v62  ;;  %1179 = vst.msk [vmem:[#allocation2 + $0x410] sm:$0x1] %vm1108_vm4, %v8965_v62  ;;  %p8948_p4 = pnand %p8947_p3, %p8941_p0 }
  0x3c   :  { %8030 = vmatmul.mubr.msk.f32.gmra.mrb[24].mxu0 %vm108_vm1, %v58_v31  ;;  %1180 = vst.msk [vmem:[#allocation2 + $0x418] sm:$0x1] %vm1108_vm4, %v8965_v62  ;;  %1181 = vst.msk [vmem:[#allocation2 + $0x420] sm:$0x1] %vm1108_vm4, %v8965_v62 }
  0x3d   :  { %8032 = vmatprep.mubr.msk.f32.mxu0 %vm108_vm1, %v59_v32  ;;  %1182 = vst.msk [vmem:[#allocation2 + $0x428] sm:$0x1] %vm1108_vm4, %v8965_v62  ;;  %1184 = vst.msk [vmem:[#allocation2 + $0x438] sm:$0x1] %vm1108_vm4, %v8965_v62 }
  0x3e   :  { %1185 = vst.msk [vmem:[#allocation2 + $0x440] sm:$0x1] %vm1108_vm4, %v8965_v62  ;;  %1186 = vst.msk [vmem:[#allocation2 + $0x448] sm:$0x1] %vm1108_vm4, %v8965_v62 }
  0x3f   :  { %1187 = vst.msk [vmem:[#allocation2 + $0x450] sm:$0x1] %vm1108_vm4, %v8965_v62 }
  0x40   :  { %8033 = vmatmul.mubr.msk.f32.gmra.mrb[26].mxu0 %vm108_vm1, %v60_v33  ;;  %1075 = vst.msk [vmem:[#allocation2] sm:$0x1f] %vm1074_vm5, %v8965_v62  ;;  %1076 = vst.msk [vmem:[#allocation2 + $0x28] sm:$0x1f] %vm1074_vm5, %v8965_v62 }
  0x41   :  { %8035 = vmatprep.mubr.msk.f32.mxu0 %vm108_vm1, %v61_v34  ;;  %1077 = vst.msk [vmem:[#allocation2 + $0x50] sm:$0x1f] %vm1074_vm5, %v8965_v62  ;;  %1078 = vst.msk [vmem:[#allocation2 + $0x78] sm:$0x1f] %vm1074_vm5, %v8965_v62 }
  0x42   :  { %1079 = vst.msk [vmem:[#allocation2 + $0xa0] sm:$0x1f] %vm1074_vm5, %v8965_v62  ;;  %1080 = vst.msk [vmem:[#allocation2 + $0xc8] sm:$0x1f] %vm1074_vm5, %v8965_v62 }
  0x43   :  { %1081 = vst.msk [vmem:[#allocation2 + $0xf0] sm:$0x1f] %vm1074_vm5, %v8965_v62  ;;  %1082 = vst.msk [vmem:[#allocation2 + $0x118] sm:$0x1f] %vm1074_vm5, %v8965_v62 }
  0x44   :  { %8036 = vmatmul.mubr.msk.f32.gmra.mrb[28].mxu0 %vm108_vm1, %v62_v35  ;;  %1083 = vst.msk [vmem:[#allocation2 + $0x140] sm:$0x1f] %vm1074_vm5, %v8965_v62  ;;  %1084 = vst.msk [vmem:[#allocation2 + $0x168] sm:$0x1f] %vm1074_vm5, %v8965_v62 }
  0x45   :  { %8038 = vmatprep.mubr.msk.f32.mxu0 %vm108_vm1, %v63_v36  ;;  %1085 = vst.msk [vmem:[#allocation2 + $0x190] sm:$0x1f] %vm1074_vm5, %v8965_v62  ;;  %1086 = vst.msk [vmem:[#allocation2 + $0x1b8] sm:$0x1f] %vm1074_vm5, %v8965_v62 }
  0x46   :  { %1087 = vst.msk [vmem:[#allocation2 + $0x1e0] sm:$0x1f] %vm1074_vm5, %v8965_v62  ;;  %1088 = vst.msk [vmem:[#allocation2 + $0x208] sm:$0x1f] %vm1074_vm5, %v8965_v62 }
  0x47   :  { %1089 = vst.msk [vmem:[#allocation2 + $0x230] sm:$0x1f] %vm1074_vm5, %v8965_v62  ;;  %1090 = vst.msk [vmem:[#allocation2 + $0x258] sm:$0x1f] %vm1074_vm5, %v8965_v62 }
  0x48   :  { %8039 = vmatmul.mubr.msk.f32.gmra.mrb[30].mxu0 %vm108_vm1, %v64_v37  ;;  %1109 = vst.msk [vmem:[#allocation2] sm:$0x1] %vm1108_vm4, %v8965_v62  ;;  %1114 = vst.msk [vmem:[#allocation2 + $0x28] sm:$0x1] %vm1108_vm4, %v8965_v62 }
  0x49   :  { %8041 = vmatprep.mubr.msk.f32.mxu0 %vm108_vm1, %v65_v38  ;;  %1119 = vst.msk [vmem:[#allocation2 + $0x50] sm:$0x1] %vm1108_vm4, %v8965_v62  ;;  %1124 = vst.msk [vmem:[#allocation2 + $0x78] sm:$0x1] %vm1108_vm4, %v8965_v62 }
  0x4a   :  { %1129 = vst.msk [vmem:[#allocation2 + $0x140] sm:$0x1] %vm1108_vm4, %v8965_v62  ;;  %1134 = vst.msk [vmem:[#allocation2 + $0x168] sm:$0x1] %vm1108_vm4, %v8965_v62 }
  0x4b   :  { %1139 = vst.msk [vmem:[#allocation2 + $0x190] sm:$0x1] %vm1108_vm4, %v8965_v62  ;;  %1144 = vst.msk [vmem:[#allocation2 + $0x1b8] sm:$0x1] %vm1108_vm4, %v8965_v62 }
  0x4c   :  { %8042 = vmatmul.mubr.msk.f32.gmra.mrb[32].mxu0 %vm108_vm1, %v66_v39 }
  0x4d   :  { %8044 = vmatprep.mubr.msk.f32.mxu0 %vm108_vm1, %v67_v40 }
  0x50   :  { %8045 = vmatmul.mubr.msk.f32.gmra.mrb[34].mxu0 %vm108_vm1, %v68_v41 }
  0x51   :  { %8047 = vmatprep.mubr.msk.f32.mxu0 %vm108_vm1, %v69_v42 }
  0x54   :  { %8048 = vmatmul.mubr.msk.f32.gmra.mrb[36].mxu0 %vm108_vm1, %v70_v43 }
  0x55   :  { %8050 = vmatprep.mubr.msk.f32.mxu0 %vm108_vm1, %v71_v44 }
  0x58   :  { %8051 = vmatmul.mubr.msk.f32.gmra.mrb[38].mxu0 %vm108_vm1, %v72_v45 }
  0x59   :  { %8053 = vmatprep.mubr.msk.f32.mxu0 %vm108_vm1, %v73_v46 }
  0x5c   :  { %8054 = vmatmul.mubr.msk.f32.gmra.mrb[40].mxu0 %vm108_vm1, %v74_v47 }
  0x5d   :  { %8056 = vmatprep.mubr.msk.f32.mxu0 %vm108_vm1, %v75_v48 }
  0x60   :  { %8057 = vmatmul.mubr.msk.f32.gmra.mrb[42].mxu0 %vm108_vm1, %v76_v49 }
  0x61   :  { %8059 = vmatprep.mubr.msk.f32.mxu0 %vm108_vm1, %v77_v50 }
  0x64   :  { %8060 = vmatmul.mubr.msk.f32.gmra.mrb[44].mxu0 %vm108_vm1, %v78_v51 }
  0x65   :  { %8062 = vmatprep.mubr.msk.f32.mxu0 %vm108_vm1, %v79_v52 }
  0x68   :  { %8063 = vmatmul.mubr.msk.f32.gmra.mrb[46].mxu0 %vm108_vm1, %v80_v53 }
  0x69   :  { %8065 = vmatprep.mubr.msk.f32.mxu0 %vm108_vm1, %v81_v54 }
  0x6c   :  { %8066 = vmatmul.mubr.msk.f32.gmra.mrb[48].mxu0 %vm108_vm1, %v82_v55 }
  0x6d   :  { %8068 = vmatprep.mubr.msk.f32.mxu0 %vm108_vm1, %v83_v56 }
  0x70   :  { %8069 = vmatmul.mubr.msk.f32.gmra.mrb[50].mxu0 %vm108_vm1, %v84_v57 }
  0x71   :  { %8071 = vmatprep.mubr.msk.f32.mxu0 %vm108_vm1, %v85_v58 }
  0x74   :  { %8072 = vmatmul.mubr.msk.f32.gmra.mrb[52].mxu0 %vm108_vm1, %v86_v59 }
  0x75   :  { %8074 = vmatprep.mubr.msk.f32.mxu0 %vm108_vm1, %v87_v60 }
  0x78   :  { %8075 = vmatmul.mubr.msk.f32.gmra.mrb[54].mxu0 %vm108_vm1, %v9275_v61 }
  0x79   :  { %8077 = vmatprep.mubr.msk.f32.mxu0 %vm108_vm1, %v89_v63 }
  0x7c   :  { %8078 = vmatmul.mubr.msk.f32.gmra.mrb[56].mxu0 %vm108_vm1, %v90_v0 }
  0x7d   :  { %8080 = vmatprep.mubr.msk.f32.mxu0 %vm108_vm1, %v91_v1 }
  0x80   :  { %8081 = vmatmul.mubr.msk.f32.gmra.mrb[58].mxu0 %vm108_vm1, %v92_v2 }
  0x81   :  { %8083 = vmatprep.mubr.msk.f32.mxu0 %vm108_vm1, %v93_v3 }
  0x84   :  { %8084 = vmatmul.mubr.msk.f32.gmra.mrb[60].mxu0 %vm108_vm1, %v94_v4 }
  0x85   :  { %8086 = vmatprep.mubr.msk.f32.mxu0 %vm108_vm1, %v95_v5 }
  0x88   :  { %8087 = vmatmul.mubr.msk.f32.gmra.mrb[62].mxu0 %vm108_vm1, %v96_v6 }
  0xdf   :  { %v7995_v11 = vpop.f32.mrb[0].mxu0 }
  0xe0   :  { %v377_v12 = vadd.f32 %v7995_v11, %v9499_v10  ;;  %v371_v13 = vpop.f32.mrb[1].mxu0 }
  0xe1   :  { %v372_v15 = vadd.f32 %v9499_v10, %v371_v13 }
  0xe2   :  { %vm691_vm7 = vcmp.gt.f32.partialorder %v377_v12, 0.0  ;;  %v755_v16 = vmul.f32 0.05, %v377_v12 }
  0xe3   :  { %vm690_vm9 = vcmp.gt.f32.partialorder %v372_v15, 0.0  ;;  %v754_v17 = vmul.f32 0.05, %v372_v15  ;;  %v7998_v18 = vpop.f32.mrb[2].mxu0 }
  0xe4   :  { %v819_v19 = vsel %vm691_vm7, %v377_v12, %v755_v16  ;;  %v387_v20 = vadd.f32 %v7998_v18, %v9499_v10  ;;  %v381_v21 = vpop.f32.mrb[3].mxu0 }
  0xe5   :  { %v947_v22 = vcombine.high %v819_v19, %v819_v19  ;;  %1274 = vst.msk [vmem:[#allocation2 + $0x330] sm:$0xf] %vm1271_vm8, %v819_v19  ;;  %v818_v23 = vsel %vm690_vm9, %v372_v15, %v754_v17  ;;  %v382_v24 = vadd.f32 %v9499_v10, %v381_v21 }
  0xe6   :  { %v946_v25 = vcombine.high %v818_v23, %v818_v23  ;;  %1272 = vst.msk [vmem:[#allocation2 + $0x320] sm:$0xf] %vm1271_vm8, %v818_v23  ;;  %vm693_vm10 = vcmp.gt.f32.partialorder %v387_v20, 0.0  ;;  %v757_v26 = vmul.f32 0.05, %v387_v20 }
  0xe7   :  { %1275 = vst.msk [vmem:[#allocation2 + $0x338] sm:$0xf] %vm1271_vm8, %v947_v22  ;;  %vm692_vm11 = vcmp.gt.f32.partialorder %v382_v24, 0.0  ;;  %v756_v27 = vmul.f32 0.05, %v382_v24  ;;  %v8001_v28 = vpop.f32.mrb[4].mxu0 }
  0xe8   :  { %1273 = vst.msk [vmem:[#allocation2 + $0x328] sm:$0xf] %vm1271_vm8, %v946_v25  ;;  %v821_v29 = vsel %vm693_vm10, %v387_v20, %v757_v26  ;;  %v397_v30 = vadd.f32 %v8001_v28, %v9499_v10  ;;  %v391_v31 = vpop.f32.mrb[5].mxu0 }
  0xe9   :  { %v949_v32 = vcombine.high %v821_v29, %v821_v29  ;;  %1278 = vst.msk [vmem:[#allocation2 + $0x358] sm:$0xf] %vm1271_vm8, %v821_v29  ;;  %v820_v33 = vsel %vm692_vm11, %v382_v24, %v756_v27  ;;  %v392_v34 = vadd.f32 %v9499_v10, %v391_v31 }
  0xea   :  { %v948_v35 = vcombine.high %v820_v33, %v820_v33  ;;  %1276 = vst.msk [vmem:[#allocation2 + $0x348] sm:$0xf] %vm1271_vm8, %v820_v33  ;;  %vm695_vm12 = vcmp.gt.f32.partialorder %v397_v30, 0.0  ;;  %v759_v36 = vmul.f32 0.05, %v397_v30 }
  0xeb   :  { %1279 = vst.msk [vmem:[#allocation2 + $0x360] sm:$0xf] %vm1271_vm8, %v949_v32  ;;  %vm694_vm13 = vcmp.gt.f32.partialorder %v392_v34, 0.0  ;;  %v758_v37 = vmul.f32 0.05, %v392_v34  ;;  %v8004_v38 = vpop.f32.mrb[6].mxu0 }
  0xec   :  { %1277 = vst.msk [vmem:[#allocation2 + $0x350] sm:$0xf] %vm1271_vm8, %v948_v35  ;;  %v823_v39 = vsel %vm695_vm12, %v397_v30, %v759_v36  ;;  %v407_v40 = vadd.f32 %v8004_v38, %v9499_v10  ;;  %v401_v41 = vpop.f32.mrb[7].mxu0 }
  0xed   :  { %v951_v42 = vcombine.high %v823_v39, %v823_v39  ;;  %1283 = vst.msk [vmem:[#allocation2 + $0x380] sm:$0xf] %vm1271_vm8, %v823_v39  ;;  %v822_v43 = vsel %vm694_vm13, %v392_v34, %v758_v37  ;;  %v402_v44 = vadd.f32 %v9499_v10, %v401_v41 }
  0xee   :  { %v950_v45 = vcombine.high %v822_v43, %v822_v43  ;;  %1281 = vst.msk [vmem:[#allocation2 + $0x370] sm:$0xf] %vm1271_vm8, %v822_v43  ;;  %vm697_vm14 = vcmp.gt.f32.partialorder %v407_v40, 0.0  ;;  %v761_v46 = vmul.f32 0.05, %v407_v40 }
  0xef   :  { %1284 = vst.msk [vmem:[#allocation2 + $0x388] sm:$0xf] %vm1271_vm8, %v951_v42  ;;  %vm696_vm15 = vcmp.gt.f32.partialorder %v402_v44, 0.0  ;;  %v760_v47 = vmul.f32 0.05, %v402_v44  ;;  %v8007_v48 = vpop.f32.mrb[8].mxu0 }
  0xf0   :  { %1282 = vst.msk [vmem:[#allocation2 + $0x378] sm:$0xf] %vm1271_vm8, %v950_v45  ;;  %v825_v49 = vsel %vm697_vm14, %v407_v40, %v761_v46  ;;  %v417_v50 = vadd.f32 %v8007_v48, %v9499_v10  ;;  %v411_v51 = vpop.f32.mrb[9].mxu0 }
  0xf1   :  { %v953_v52 = vcombine.high %v825_v49, %v825_v49  ;;  %1287 = vst.msk [vmem:[#allocation2 + $0x3a8] sm:$0xf] %vm1271_vm8, %v825_v49  ;;  %v824_v53 = vsel %vm696_vm15, %v402_v44, %v760_v47  ;;  %v412_v54 = vadd.f32 %v9499_v10, %v411_v51 }
  0xf2   :  { %v952_v55 = vcombine.high %v824_v53, %v824_v53  ;;  %1285 = vst.msk [vmem:[#allocation2 + $0x398] sm:$0xf] %vm1271_vm8, %v824_v53  ;;  %vm699_vm0 = vcmp.gt.f32.partialorder %v417_v50, 0.0  ;;  %v763_v56 = vmul.f32 0.05, %v417_v50 }
  0xf3   :  { %1288 = vst.msk [vmem:[#allocation2 + $0x3b0] sm:$0xf] %vm1271_vm8, %v953_v52  ;;  %vm698_vm1 = vcmp.gt.f32.partialorder %v412_v54, 0.0  ;;  %v762_v57 = vmul.f32 0.05, %v412_v54  ;;  %v8010_v58 = vpop.f32.mrb[10].mxu0 }
  0xf4   :  { %1286 = vst.msk [vmem:[#allocation2 + $0x3a0] sm:$0xf] %vm1271_vm8, %v952_v55  ;;  %v827_v59 = vsel %vm699_vm0, %v417_v50, %v763_v56  ;;  %v427_v60 = vadd.f32 %v8010_v58, %v9499_v10  ;;  %v421_v61 = vpop.f32.mrb[11].mxu0 }
  0xf5   :  { %v955_v63 = vcombine.high %v827_v59, %v827_v59  ;;  %1292 = vst.msk [vmem:[#allocation2 + $0x291] sm:$0xf] %vm1271_vm8, %v827_v59  ;;  %v826_v0 = vsel %vm698_vm1, %v412_v54, %v762_v57  ;;  %v422_v1 = vadd.f32 %v9499_v10, %v421_v61 }
  0xf6   :  { %v954_v2 = vcombine.high %v826_v0, %v826_v0  ;;  %1290 = vst.msk [vmem:[#allocation2 + $0x281] sm:$0xf] %vm1271_vm8, %v826_v0  ;;  %vm701_vm2 = vcmp.gt.f32.partialorder %v427_v60, 0.0  ;;  %v765_v3 = vmul.f32 0.05, %v427_v60 }
  0xf7   :  { %1293 = vst.msk [vmem:[#allocation2 + $0x299] sm:$0xf] %vm1271_vm8, %v955_v63  ;;  %vm700_vm3 = vcmp.gt.f32.partialorder %v422_v1, 0.0  ;;  %v764_v4 = vmul.f32 0.05, %v422_v1  ;;  %v8013_v5 = vpop.f32.mrb[12].mxu0 }
  0xf8   :  { %1291 = vst.msk [vmem:[#allocation2 + $0x289] sm:$0xf] %vm1271_vm8, %v954_v2  ;;  %v829_v6 = vsel %vm701_vm2, %v427_v60, %v765_v3  ;;  %v437_v7 = vadd.f32 %v8013_v5, %v9499_v10  ;;  %v431_v8 = vpop.f32.mrb[13].mxu0 }
  0xf9   :  { %v957_v11 = vcombine.high %v829_v6, %v829_v6  ;;  %1296 = vst.msk [vmem:[#allocation2 + $0x2b9] sm:$0xf] %vm1271_vm8, %v829_v6  ;;  %v828_v12 = vsel %vm700_vm3, %v422_v1, %v764_v4  ;;  %v432_v13 = vadd.f32 %v9499_v10, %v431_v8 }
  0xfa   :  { %v956_v15 = vcombine.high %v828_v12, %v828_v12  ;;  %1294 = vst.msk [vmem:[#allocation2 + $0x2a9] sm:$0xf] %vm1271_vm8, %v828_v12  ;;  %vm703_vm4 = vcmp.gt.f32.partialorder %v437_v7, 0.0  ;;  %v767_v16 = vmul.f32 0.05, %v437_v7 }
  0xfb   :  { %1297 = vst.msk [vmem:[#allocation2 + $0x2c1] sm:$0xf] %vm1271_vm8, %v957_v11  ;;  %vm702_vm5 = vcmp.gt.f32.partialorder %v432_v13, 0.0  ;;  %v766_v17 = vmul.f32 0.05, %v432_v13  ;;  %v8016_v18 = vpop.f32.mrb[14].mxu0 }
  0xfc   :  { %1295 = vst.msk [vmem:[#allocation2 + $0x2b1] sm:$0xf] %vm1271_vm8, %v956_v15  ;;  %v831_v19 = vsel %vm703_vm4, %v437_v7, %v767_v16  ;;  %v447_v20 = vadd.f32 %v8016_v18, %v9499_v10  ;;  %v441_v21 = vpop.f32.mrb[15].mxu0 }
  0xfd   :  { %v959_v22 = vcombine.high %v831_v19, %v831_v19  ;;  %1301 = vst.msk [vmem:[#allocation2 + $0x2e1] sm:$0xf] %vm1271_vm8, %v831_v19  ;;  %v830_v23 = vsel %vm702_vm5, %v432_v13, %v766_v17  ;;  %v442_v24 = vadd.f32 %v9499_v10, %v441_v21 }
  0xfe   :  { %v958_v25 = vcombine.high %v830_v23, %v830_v23  ;;  %1299 = vst.msk [vmem:[#allocation2 + $0x2d1] sm:$0xf] %vm1271_vm8, %v830_v23  ;;  %vm705_vm7 = vcmp.gt.f32.partialorder %v447_v20, 0.0  ;;  %v769_v26 = vmul.f32 0.05, %v447_v20 }
  0xff   :  { %1302 = vst.msk [vmem:[#allocation2 + $0x2e9] sm:$0xf] %vm1271_vm8, %v959_v22  ;;  %vm704_vm9 = vcmp.gt.f32.partialorder %v442_v24, 0.0  ;;  %v768_v27 = vmul.f32 0.05, %v442_v24  ;;  %v8019_v28 = vpop.f32.mrb[16].mxu0 }
 0x100   :  { %1300 = vst.msk [vmem:[#allocation2 + $0x2d9] sm:$0xf] %vm1271_vm8, %v958_v25  ;;  %v833_v29 = vsel %vm705_vm7, %v447_v20, %v769_v26  ;;  %v457_v30 = vadd.f32 %v8019_v28, %v9499_v10  ;;  %v451_v31 = vpop.f32.mrb[17].mxu0 }
 0x101   :  { %v961_v32 = vcombine.high %v833_v29, %v833_v29  ;;  %1305 = vst.msk [vmem:[#allocation2 + $0x309] sm:$0xf] %vm1271_vm8, %v833_v29  ;;  %v832_v33 = vsel %vm704_vm9, %v442_v24, %v768_v27  ;;  %v452_v34 = vadd.f32 %v9499_v10, %v451_v31 }
 0x102   :  { %v960_v35 = vcombine.high %v832_v33, %v832_v33  ;;  %1303 = vst.msk [vmem:[#allocation2 + $0x2f9] sm:$0xf] %vm1271_vm8, %v832_v33  ;;  %vm707_vm10 = vcmp.gt.f32.partialorder %v457_v30, 0.0  ;;  %v771_v36 = vmul.f32 0.05, %v457_v30 }
 0x103   :  { %1306 = vst.msk [vmem:[#allocation2 + $0x311] sm:$0xf] %vm1271_vm8, %v961_v32  ;;  %vm706_vm11 = vcmp.gt.f32.partialorder %v452_v34, 0.0  ;;  %v770_v37 = vmul.f32 0.05, %v452_v34  ;;  %v8022_v38 = vpop.f32.mrb[18].mxu0 }
 0x104   :  { %1304 = vst.msk [vmem:[#allocation2 + $0x301] sm:$0xf] %vm1271_vm8, %v960_v35  ;;  %v835_v39 = vsel %vm707_vm10, %v457_v30, %v771_v36  ;;  %v467_v40 = vadd.f32 %v8022_v38, %v9499_v10  ;;  %v461_v41 = vpop.f32.mrb[19].mxu0 }
 0x105   :  { %v963_v42 = vcombine.high %v835_v39, %v835_v39  ;;  %1310 = vst.msk [vmem:[#allocation2 + $0x470] sm:$0xf] %vm1271_vm8, %v835_v39  ;;  %v834_v43 = vsel %vm706_vm11, %v452_v34, %v770_v37  ;;  %v462_v44 = vadd.f32 %v9499_v10, %v461_v41 }
 0x106   :  { %v962_v45 = vcombine.high %v834_v43, %v834_v43  ;;  %1308 = vst.msk [vmem:[#allocation2 + $0x460] sm:$0xf] %vm1271_vm8, %v834_v43  ;;  %vm709_vm12 = vcmp.gt.f32.partialorder %v467_v40, 0.0  ;;  %v773_v46 = vmul.f32 0.05, %v467_v40 }
 0x107   :  { %1311 = vst.msk [vmem:[#allocation2 + $0x478] sm:$0xf] %vm1271_vm8, %v963_v42  ;;  %vm708_vm13 = vcmp.gt.f32.partialorder %v462_v44, 0.0  ;;  %v772_v47 = vmul.f32 0.05, %v462_v44  ;;  %v8025_v48 = vpop.f32.mrb[20].mxu0 }
 0x108   :  { %1309 = vst.msk [vmem:[#allocation2 + $0x468] sm:$0xf] %vm1271_vm8, %v962_v45  ;;  %v837_v49 = vsel %vm709_vm12, %v467_v40, %v773_v46  ;;  %v477_v50 = vadd.f32 %v8025_v48, %v9499_v10  ;;  %v471_v51 = vpop.f32.mrb[21].mxu0 }
 0x109   :  { %v965_v52 = vcombine.high %v837_v49, %v837_v49  ;;  %1314 = vst.msk [vmem:[#allocation2 + $0x498] sm:$0xf] %vm1271_vm8, %v837_v49  ;;  %v836_v53 = vsel %vm708_vm13, %v462_v44, %v772_v47  ;;  %v472_v54 = vadd.f32 %v9499_v10, %v471_v51 }
 0x10a   :  { %v964_v55 = vcombine.high %v836_v53, %v836_v53  ;;  %1312 = vst.msk [vmem:[#allocation2 + $0x488] sm:$0xf] %vm1271_vm8, %v836_v53  ;;  %vm711_vm14 = vcmp.gt.f32.partialorder %v477_v50, 0.0  ;;  %v775_v56 = vmul.f32 0.05, %v477_v50 }
 0x10b   :  { %1315 = vst.msk [vmem:[#allocation2 + $0x4a0] sm:$0xf] %vm1271_vm8, %v965_v52  ;;  %vm710_vm15 = vcmp.gt.f32.partialorder %v472_v54, 0.0  ;;  %v774_v57 = vmul.f32 0.05, %v472_v54  ;;  %v8028_v58 = vpop.f32.mrb[22].mxu0 }
 0x10c   :  { %1313 = vst.msk [vmem:[#allocation2 + $0x490] sm:$0xf] %vm1271_vm8, %v964_v55  ;;  %v839_v59 = vsel %vm711_vm14, %v477_v50, %v775_v56  ;;  %v487_v60 = vadd.f32 %v8028_v58, %v9499_v10  ;;  %v481_v61 = vpop.f32.mrb[23].mxu0 }
 0x10d   :  { %v967_v63 = vcombine.high %v839_v59, %v839_v59  ;;  %1319 = vst.msk [vmem:[#allocation2 + $0x4c0] sm:$0xf] %vm1271_vm8, %v839_v59  ;;  %v838_v0 = vsel %vm710_vm15, %v472_v54, %v774_v57  ;;  %v482_v1 = vadd.f32 %v9499_v10, %v481_v61 }
 0x10e   :  { %v966_v2 = vcombine.high %v838_v0, %v838_v0  ;;  %1317 = vst.msk [vmem:[#allocation2 + $0x4b0] sm:$0xf] %vm1271_vm8, %v838_v0  ;;  %vm713_vm0 = vcmp.gt.f32.partialorder %v487_v60, 0.0  ;;  %v777_v3 = vmul.f32 0.05, %v487_v60 }
 0x10f   :  { %1320 = vst.msk [vmem:[#allocation2 + $0x4c8] sm:$0xf] %vm1271_vm8, %v967_v63  ;;  %vm712_vm1 = vcmp.gt.f32.partialorder %v482_v1, 0.0  ;;  %v776_v4 = vmul.f32 0.05, %v482_v1  ;;  %v8031_v5 = vpop.f32.mrb[24].mxu0 }
 0x110   :  { %1318 = vst.msk [vmem:[#allocation2 + $0x4b8] sm:$0xf] %vm1271_vm8, %v966_v2  ;;  %v841_v6 = vsel %vm713_vm0, %v487_v60, %v777_v3  ;;  %v497_v7 = vadd.f32 %v8031_v5, %v9499_v10  ;;  %v491_v8 = vpop.f32.mrb[25].mxu0 }
 0x111   :  { %v969_v11 = vcombine.high %v841_v6, %v841_v6  ;;  %1323 = vst.msk [vmem:[#allocation2 + $0x4e8] sm:$0xf] %vm1271_vm8, %v841_v6  ;;  %v840_v12 = vsel %vm712_vm1, %v482_v1, %v776_v4  ;;  %v492_v13 = vadd.f32 %v9499_v10, %v491_v8 }
 0x112   :  { %v968_v15 = vcombine.high %v840_v12, %v840_v12  ;;  %1321 = vst.msk [vmem:[#allocation2 + $0x4d8] sm:$0xf] %vm1271_vm8, %v840_v12  ;;  %vm715_vm2 = vcmp.gt.f32.partialorder %v497_v7, 0.0  ;;  %v779_v16 = vmul.f32 0.05, %v497_v7 }
 0x113   :  { %1324 = vst.msk [vmem:[#allocation2 + $0x4f0] sm:$0xf] %vm1271_vm8, %v969_v11  ;;  %vm714_vm3 = vcmp.gt.f32.partialorder %v492_v13, 0.0  ;;  %v778_v17 = vmul.f32 0.05, %v492_v13  ;;  %v8034_v18 = vpop.f32.mrb[26].mxu0 }
 0x114   :  { %1322 = vst.msk [vmem:[#allocation2 + $0x4e0] sm:$0xf] %vm1271_vm8, %v968_v15  ;;  %v843_v19 = vsel %vm715_vm2, %v497_v7, %v779_v16  ;;  %v507_v20 = vadd.f32 %v8034_v18, %v9499_v10  ;;  %v501_v21 = vpop.f32.mrb[27].mxu0 }
 0x115   :  { %v971_v22 = vcombine.high %v843_v19, %v843_v19  ;;  %1328 = vst.msk [vmem:[#allocation2 + $0x3d1] sm:$0xf] %vm1271_vm8, %v843_v19  ;;  %v842_v23 = vsel %vm714_vm3, %v492_v13, %v778_v17  ;;  %v502_v24 = vadd.f32 %v9499_v10, %v501_v21 }
 0x116   :  { %v970_v25 = vcombine.high %v842_v23, %v842_v23  ;;  %1326 = vst.msk [vmem:[#allocation2 + $0x3c1] sm:$0xf] %vm1271_vm8, %v842_v23  ;;  %vm717_vm4 = vcmp.gt.f32.partialorder %v507_v20, 0.0  ;;  %v781_v26 = vmul.f32 0.05, %v507_v20 }
 0x117   :  { %1329 = vst.msk [vmem:[#allocation2 + $0x3d9] sm:$0xf] %vm1271_vm8, %v971_v22  ;;  %vm716_vm5 = vcmp.gt.f32.partialorder %v502_v24, 0.0  ;;  %v780_v27 = vmul.f32 0.05, %v502_v24  ;;  %v8037_v28 = vpop.f32.mrb[28].mxu0 }
 0x118   :  { %1327 = vst.msk [vmem:[#allocation2 + $0x3c9] sm:$0xf] %vm1271_vm8, %v970_v25  ;;  %v845_v29 = vsel %vm717_vm4, %v507_v20, %v781_v26  ;;  %v517_v30 = vadd.f32 %v8037_v28, %v9499_v10  ;;  %v511_v31 = vpop.f32.mrb[29].mxu0 }
 0x119   :  { %v973_v32 = vcombine.high %v845_v29, %v845_v29  ;;  %1332 = vst.msk [vmem:[#allocation2 + $0x3f9] sm:$0xf] %vm1271_vm8, %v845_v29  ;;  %v844_v33 = vsel %vm716_vm5, %v502_v24, %v780_v27  ;;  %v512_v34 = vadd.f32 %v9499_v10, %v511_v31 }
 0x11a   :  { %v972_v35 = vcombine.high %v844_v33, %v844_v33  ;;  %1330 = vst.msk [vmem:[#allocation2 + $0x3e9] sm:$0xf] %vm1271_vm8, %v844_v33  ;;  %vm719_vm7 = vcmp.gt.f32.partialorder %v517_v30, 0.0  ;;  %v783_v36 = vmul.f32 0.05, %v517_v30 }
 0x11b   :  { %1333 = vst.msk [vmem:[#allocation2 + $0x401] sm:$0xf] %vm1271_vm8, %v973_v32  ;;  %vm718_vm9 = vcmp.gt.f32.partialorder %v512_v34, 0.0  ;;  %v782_v37 = vmul.f32 0.05, %v512_v34  ;;  %v8040_v38 = vpop.f32.mrb[30].mxu0 }
 0x11c   :  { %1331 = vst.msk [vmem:[#allocation2 + $0x3f1] sm:$0xf] %vm1271_vm8, %v972_v35  ;;  %v847_v39 = vsel %vm719_vm7, %v517_v30, %v783_v36  ;;  %v527_v40 = vadd.f32 %v8040_v38, %v9499_v10  ;;  %v521_v41 = vpop.f32.mrb[31].mxu0 }
 0x11d   :  { %v975_v42 = vcombine.high %v847_v39, %v847_v39  ;;  %1337 = vst.msk [vmem:[#allocation2 + $0x421] sm:$0xf] %vm1271_vm8, %v847_v39  ;;  %v846_v43 = vsel %vm718_vm9, %v512_v34, %v782_v37  ;;  %v522_v44 = vadd.f32 %v9499_v10, %v521_v41 }
 0x11e   :  { %v974_v45 = vcombine.high %v846_v43, %v846_v43  ;;  %1335 = vst.msk [vmem:[#allocation2 + $0x411] sm:$0xf] %vm1271_vm8, %v846_v43  ;;  %vm721_vm10 = vcmp.gt.f32.partialorder %v527_v40, 0.0  ;;  %v785_v46 = vmul.f32 0.05, %v527_v40 }
 0x11f   :  { %1338 = vst.msk [vmem:[#allocation2 + $0x429] sm:$0xf] %vm1271_vm8, %v975_v42  ;;  %vm720_vm11 = vcmp.gt.f32.partialorder %v522_v44, 0.0  ;;  %v784_v47 = vmul.f32 0.05, %v522_v44  ;;  %v8043_v48 = vpop.f32.mrb[32].mxu0 }
 0x120   :  { %1336 = vst.msk [vmem:[#allocation2 + $0x419] sm:$0xf] %vm1271_vm8, %v974_v45  ;;  %v849_v49 = vsel %vm721_vm10, %v527_v40, %v785_v46  ;;  %v537_v50 = vadd.f32 %v8043_v48, %v9499_v10  ;;  %v531_v51 = vpop.f32.mrb[33].mxu0 }
 0x121   :  { %v977_v52 = vcombine.high %v849_v49, %v849_v49  ;;  %1341 = vst.msk [vmem:[#allocation2 + $0x449] sm:$0xf] %vm1271_vm8, %v849_v49  ;;  %v848_v53 = vsel %vm720_vm11, %v522_v44, %v784_v47  ;;  %v532_v54 = vadd.f32 %v9499_v10, %v531_v51 }
 0x122   :  { %v976_v55 = vcombine.high %v848_v53, %v848_v53  ;;  %1339 = vst.msk [vmem:[#allocation2 + $0x439] sm:$0xf] %vm1271_vm8, %v848_v53  ;;  %vm723_vm12 = vcmp.gt.f32.partialorder %v537_v50, 0.0  ;;  %v787_v56 = vmul.f32 0.05, %v537_v50 }
 0x123   :  { %1342 = vst.msk [vmem:[#allocation2 + $0x451] sm:$0xf] %vm1271_vm8, %v977_v52  ;;  %vm722_vm13 = vcmp.gt.f32.partialorder %v532_v54, 0.0  ;;  %v786_v57 = vmul.f32 0.05, %v532_v54  ;;  %v8046_v58 = vpop.f32.mrb[34].mxu0 }
 0x124   :  { %1340 = vst.msk [vmem:[#allocation2 + $0x441] sm:$0xf] %vm1271_vm8, %v976_v55  ;;  %v851_v59 = vsel %vm723_vm12, %v537_v50, %v787_v56  ;;  %v547_v60 = vadd.f32 %v8046_v58, %v9499_v10  ;;  %v541_v61 = vpop.f32.mrb[35].mxu0  ;;  %vm1443_vm12 = vcmask 31744  }
 0x125   :  { %v979_v63 = vcombine.high %v851_v59, %v851_v59  ;;  %1346 = vst.msk [vmem:[#allocation2 + $0xb8] sm:$0xf] %vm1271_vm8, %v851_v59  ;;  %v850_v0 = vsel %vm722_vm13, %v532_v54, %v786_v57  ;;  %v542_v1 = vadd.f32 %v9499_v10, %v541_v61 }
 0x126   :  { %v978_v2 = vcombine.high %v850_v0, %v850_v0  ;;  %1344 = vst.msk [vmem:[#allocation2 + $0xa8] sm:$0xf] %vm1271_vm8, %v850_v0  ;;  %vm725_vm14 = vcmp.gt.f32.partialorder %v547_v60, 0.0  ;;  %v789_v3 = vmul.f32 0.05, %v547_v60 }
 0x127   :  { %1347 = vst.msk [vmem:[#allocation2 + $0xc0] sm:$0xf] %vm1271_vm8, %v979_v63  ;;  %vm724_vm15 = vcmp.gt.f32.partialorder %v542_v1, 0.0  ;;  %v788_v4 = vmul.f32 0.05, %v542_v1  ;;  %v8049_v5 = vpop.f32.mrb[36].mxu0 }
 0x128   :  { %1345 = vst.msk [vmem:[#allocation2 + $0xb0] sm:$0xf] %vm1271_vm8, %v978_v2  ;;  %v853_v6 = vsel %vm725_vm14, %v547_v60, %v789_v3  ;;  %v557_v7 = vadd.f32 %v8049_v5, %v9499_v10  ;;  %v551_v8 = vpop.f32.mrb[37].mxu0 }
 0x129   :  { %v981_v11 = vcombine.high %v853_v6, %v853_v6  ;;  %1350 = vst.msk [vmem:[#allocation2 + $0xe0] sm:$0xf] %vm1271_vm8, %v853_v6  ;;  %v852_v12 = vsel %vm724_vm15, %v542_v1, %v788_v4  ;;  %v552_v13 = vadd.f32 %v9499_v10, %v551_v8 }
 0x12a   :  { %v980_v15 = vcombine.high %v852_v12, %v852_v12  ;;  %1348 = vst.msk [vmem:[#allocation2 + $0xd0] sm:$0xf] %vm1271_vm8, %v852_v12  ;;  %vm727_vm0 = vcmp.gt.f32.partialorder %v557_v7, 0.0  ;;  %v791_v16 = vmul.f32 0.05, %v557_v7 }
 0x12b   :  { %1351 = vst.msk [vmem:[#allocation2 + $0xe8] sm:$0xf] %vm1271_vm8, %v981_v11  ;;  %vm726_vm1 = vcmp.gt.f32.partialorder %v552_v13, 0.0  ;;  %v790_v17 = vmul.f32 0.05, %v552_v13  ;;  %v8052_v18 = vpop.f32.mrb[38].mxu0 }
 0x12c   :  { %1349 = vst.msk [vmem:[#allocation2 + $0xd8] sm:$0xf] %vm1271_vm8, %v980_v15  ;;  %v855_v19 = vsel %vm727_vm0, %v557_v7, %v791_v16  ;;  %v567_v20 = vadd.f32 %v8052_v18, %v9499_v10  ;;  %v561_v21 = vpop.f32.mrb[39].mxu0  ;;  %v9654_v15 = vld [vmem:[%s10354_s3 + $0x8] sm:$0xf] }
 0x12d   :  { %v983_v22 = vcombine.high %v855_v19, %v855_v19  ;;  %1355 = vst.msk [vmem:[#allocation2 + $0x108] sm:$0xf] %vm1271_vm8, %v855_v19  ;;  %v854_v23 = vsel %vm726_vm1, %v552_v13, %v790_v17  ;;  %v562_v24 = vadd.f32 %v9499_v10, %v561_v21  ;;  %v9661_v21 = vld [vmem:[%s10354_s3 + $0x18] sm:$0xf] }
 0x12e   :  { %v982_v25 = vcombine.high %v854_v23, %v854_v23  ;;  %1353 = vst.msk [vmem:[#allocation2 + $0xf8] sm:$0xf] %vm1271_vm8, %v854_v23  ;;  %vm729_vm2 = vcmp.gt.f32.partialorder %v567_v20, 0.0  ;;  %v793_v26 = vmul.f32 0.05, %v567_v20 }
 0x12f   :  { %1356 = vst.msk [vmem:[#allocation2 + $0x110] sm:$0xf] %vm1271_vm8, %v983_v22  ;;  %vm728_vm3 = vcmp.gt.f32.partialorder %v562_v24, 0.0  ;;  %v792_v27 = vmul.f32 0.05, %v562_v24  ;;  %v8055_v28 = vpop.f32.mrb[40].mxu0 }
 0x130   :  { %1354 = vst.msk [vmem:[#allocation2 + $0x100] sm:$0xf] %vm1271_vm8, %v982_v25  ;;  %v857_v29 = vsel %vm729_vm2, %v567_v20, %v793_v26  ;;  %v577_v30 = vadd.f32 %v8055_v28, %v9499_v10  ;;  %v571_v31 = vpop.f32.mrb[41].mxu0 }
 0x131   :  { %v985_v32 = vcombine.high %v857_v29, %v857_v29  ;;  %1359 = vst.msk [vmem:[#allocation2 + $0x130] sm:$0xf] %vm1271_vm8, %v857_v29  ;;  %v856_v33 = vsel %vm728_vm3, %v562_v24, %v792_v27  ;;  %v572_v34 = vadd.f32 %v9499_v10, %v571_v31  ;;  %v9678_v31 = vld [vmem:[%s10353_s2] ss:$0 sm:$0xff]  ;;  %s8969_s2 = smov 4  }
 0x132   :  { %v984_v35 = vcombine.high %v856_v33, %v856_v33  ;;  %1357 = vst.msk [vmem:[#allocation2 + $0x120] sm:$0xf] %vm1271_vm8, %v856_v33  ;;  %vm731_vm4 = vcmp.gt.f32.partialorder %v577_v30, 0.0  ;;  %v795_v36 = vmul.f32 0.05, %v577_v30 }
 0x133   :  { %1360 = vst.msk [vmem:[#allocation2 + $0x138] sm:$0xf] %vm1271_vm8, %v985_v32  ;;  %vm730_vm5 = vcmp.gt.f32.partialorder %v572_v34, 0.0  ;;  %v794_v37 = vmul.f32 0.05, %v572_v34  ;;  %v8058_v38 = vpop.f32.mrb[42].mxu0 }
 0x134   :  { %1358 = vst.msk [vmem:[#allocation2 + $0x128] sm:$0xf] %vm1271_vm8, %v984_v35  ;;  %v859_v39 = vsel %vm731_vm4, %v577_v30, %v795_v36  ;;  %v587_v40 = vadd.f32 %v8058_v38, %v9499_v10  ;;  %v581_v41 = vpop.f32.mrb[43].mxu0 }
 0x135   :  { %v987_v42 = vcombine.high %v859_v39, %v859_v39  ;;  %1364 = vst.msk [vmem:[#allocation2 + $0x19] sm:$0xf] %vm1271_vm8, %v859_v39  ;;  %v858_v43 = vsel %vm730_vm5, %v572_v34, %v794_v37  ;;  %v582_v44 = vadd.f32 %v9499_v10, %v581_v41 }
 0x136   :  { %v986_v45 = vcombine.high %v858_v43, %v858_v43  ;;  %1362 = vst.msk [vmem:[#allocation2 + $0x9] sm:$0xf] %vm1271_vm8, %v858_v43  ;;  %vm733_vm7 = vcmp.gt.f32.partialorder %v587_v40, 0.0  ;;  %v797_v46 = vmul.f32 0.05, %v587_v40 }
 0x137   :  { %1365 = vst.msk [vmem:[#allocation2 + $0x21] sm:$0xf] %vm1271_vm8, %v987_v42  ;;  %vm732_vm9 = vcmp.gt.f32.partialorder %v582_v44, 0.0  ;;  %v796_v47 = vmul.f32 0.05, %v582_v44  ;;  %v8061_v48 = vpop.f32.mrb[44].mxu0 }
 0x138   :  { %1363 = vst.msk [vmem:[#allocation2 + $0x11] sm:$0xf] %vm1271_vm8, %v986_v45  ;;  %v861_v49 = vsel %vm733_vm7, %v587_v40, %v797_v46  ;;  %v597_v50 = vadd.f32 %v8061_v48, %v9499_v10  ;;  %v591_v51 = vpop.f32.mrb[45].mxu0  ;;  %v7411_v40 = vld [vmem:[%s10354_s3 + $0xc] sm:$0xf] }
 0x139   :  { %v989_v52 = vcombine.high %v861_v49, %v861_v49  ;;  %1368 = vst.msk [vmem:[#allocation2 + $0x41] sm:$0xf] %vm1271_vm8, %v861_v49  ;;  %v860_v53 = vsel %vm732_vm9, %v582_v44, %v796_v47  ;;  %v592_v54 = vadd.f32 %v9499_v10, %v591_v51 }
 0x13a   :  { %v988_v55 = vcombine.high %v860_v53, %v860_v53  ;;  %1366 = vst.msk [vmem:[#allocation2 + $0x31] sm:$0xf] %vm1271_vm8, %v860_v53  ;;  %vm735_vm10 = vcmp.gt.f32.partialorder %v597_v50, 0.0  ;;  %v799_v56 = vmul.f32 0.05, %v597_v50 }
 0x13b   :  { %1369 = vst.msk [vmem:[#allocation2 + $0x49] sm:$0xf] %vm1271_vm8, %v989_v52  ;;  %vm734_vm11 = vcmp.gt.f32.partialorder %v592_v54, 0.0  ;;  %v798_v57 = vmul.f32 0.05, %v592_v54  ;;  %v8064_v58 = vpop.f32.mrb[46].mxu0 }
 0x13c   :  { %1367 = vst.msk [vmem:[#allocation2 + $0x39] sm:$0xf] %vm1271_vm8, %v988_v55  ;;  %v863_v59 = vsel %vm735_vm10, %v597_v50, %v799_v56  ;;  %v607_v60 = vadd.f32 %v8064_v58, %v9499_v10  ;;  %v601_v61 = vpop.f32.mrb[47].mxu0  ;;  %v8779_v55 = vld [vmem:[#allocation2 + $0xa0] ss:$8 sps:$4 sm:$0xff]  }
 0x13d   :  { %v991_v63 = vcombine.high %v863_v59, %v863_v59  ;;  %1373 = vst.msk [vmem:[#allocation2 + $0x69] sm:$0xf] %vm1271_vm8, %v863_v59  ;;  %v862_v0 = vsel %vm734_vm11, %v592_v54, %v798_v57  ;;  %v602_v1 = vadd.f32 %v9499_v10, %v601_v61  ;;  %v8767_v2 = vld [vmem:[#allocation2] ss:$8 sps:$4 sm:$0xff]  }
 0x13e   :  { %v990_v3 = vcombine.high %v862_v0, %v862_v0  ;;  %1371 = vst.msk [vmem:[#allocation2 + $0x59] sm:$0xf] %vm1271_vm8, %v862_v0  ;;  %vm737_vm13 = vcmp.gt.f32.partialorder %v607_v60, 0.0  ;;  %v801_v4 = vmul.f32 0.05, %v607_v60  ;;  %8091 = vmatprep.mubr.msk.f32.mxu0 %vm1443_vm12, %v8767_v2 }
 0x13f   :  { %v8768_v5 = vld [vmem:[#allocation2 + $0x1] ss:$8 sps:$4 sm:$0xff]   ;;  %1374 = vst.msk [vmem:[#allocation2 + $0x71] sm:$0xf] %vm1271_vm8, %v991_v63  ;;  %vm736_vm14 = vcmp.gt.f32.partialorder %v602_v1, 0.0  ;;  %v8067_v7 = vpop.f32.mrb[48].mxu0 }
 0x140   :  { %v800_v6 = vmul.f32 0.05, %v602_v1  ;;  %1372 = vst.msk [vmem:[#allocation2 + $0x61] sm:$0xf] %vm1271_vm8, %v990_v3  ;;  %v865_v8 = vsel %vm737_vm13, %v607_v60, %v801_v4  ;;  %v617_v11 = vadd.f32 %v8067_v7, %v9499_v10  ;;  %v611_v12 = vpop.f32.mrb[49].mxu0  ;;  %8123 = vmatprep.mubr.msk.f32.mxu1 %vm1443_vm12, %v8768_v5 }
 0x141   :  { %v8769_v13 = vld [vmem:[#allocation2 + $0x10] ss:$8 sps:$4 sm:$0xff]   ;;  %v993_v16 = vcombine.high %v865_v8, %v865_v8  ;;  %1377 = vst.msk [vmem:[#allocation2 + $0x91] sm:$0xf] %vm1271_vm8, %v865_v8  ;;  %v612_v18 = vadd.f32 %v9499_v10, %v611_v12 }
 0x142   :  { %v864_v17 = vsel %vm736_vm14, %v602_v1, %v800_v6  ;;  %v8770_v19 = vld [vmem:[#allocation2 + $0x11] ss:$8 sps:$4 sm:$0xff]   ;;  %vm739_vm15 = vcmp.gt.f32.partialorder %v617_v11, 0.0  ;;  %v803_v23 = vmul.f32 0.05, %v617_v11  ;;  %8092 = vmatmul.mubr.msk.f32.vlgmr.msra.gmra.mrb[64].mxu0 %vm1443_vm12, %v8769_v13 }
 0x143   :  { %v8771_v20 = vld [vmem:[#allocation2 + $0x28] ss:$8 sps:$4 sm:$0xff]   ;;  %v992_v22 = vcombine.high %v864_v17, %v864_v17  ;;  %1375 = vst.msk [vmem:[#allocation2 + $0x81] sm:$0xf] %vm1271_vm8, %v864_v17  ;;  %1378 = vst.msk [vmem:[#allocation2 + $0x99] sm:$0xf] %vm1271_vm8, %v993_v16  ;;  %8124 = vmatmul.mubr.msk.f32.vlgmr.msra.gmra.mrb[0].mxu1 %vm1443_vm12, %v8770_v19  ;;  %8098 = vmatpush3.msk.msra.mxu0 %vm1452_vm6, %v9492_v9 }
 0x144   :  { %vm738_vm0 = vcmp.gt.f32.partialorder %v612_v18, 0.0  ;;  %v802_v24 = vmul.f32 0.05, %v612_v18  ;;  %v8070_v25 = vpop.f32.mrb[50].mxu0  ;;  %8094 = vmatprep.mubr.msk.f32.mxu0 %vm1443_vm12, %v8771_v20  ;;  %v8772_v26 = vld [vmem:[#allocation2 + $0x29] ss:$8 sps:$4 sm:$0xff]   ;;  %v867_v27 = vsel %vm739_vm15, %v617_v11, %v803_v23  ;;  %8130 = vmatpush3.msk.msra.mxu1 %vm1452_vm6, %v9505_v14 }
 0x145   :  { %1376 = vst.msk [vmem:[#allocation2 + $0x89] sm:$0xf] %vm1271_vm8, %v992_v22  ;;  %v627_v28 = vadd.f32 %v8070_v25, %v9499_v10  ;;  %v621_v29 = vpop.f32.mrb[51].mxu0  ;;  %1382 = vst.msk [vmem:[#allocation2 + $0x1f8] sm:$0xf] %vm1271_vm8, %v867_v27  ;;  %8126 = vmatprep.mubr.msk.f32.mxu1 %vm1443_vm12, %v8772_v26  ;;  %8105 = vmatprep.subr.msk.mxu0 %vm1452_vm6, %v9654_v15 }
 0x146   :  { %v866_v30 = vsel %vm738_vm0, %v612_v18, %v802_v24  ;;  %v622_v32 = vadd.f32 %v9678_v31, %v621_v29  ;;  %v8773_v10 = vld [vmem:[#allocation2 + $0x38] ss:$8 sps:$4 sm:$0xff]   ;;  %8137 = vmatprep.subr.msk.mxu1 %vm1452_vm6, %v9661_v21  ;;  %v8781_v5 = vld [vmem:[#allocation2 + $0xc8] ss:$8 sps:$4 sm:$0xff]  }
 0x147   :  { %v994_v9 = vcombine.high %v866_v30, %v866_v30  ;;  %1380 = vst.msk [vmem:[#allocation2 + $0x1e8] sm:$0xf] %vm1271_vm8, %v866_v30  ;;  %vm741_vm1 = vcmp.gt.f32.partialorder %v627_v28, 0.0  ;;  %v805_v14 = vmul.f32 0.05, %v627_v28  ;;  %8095 = vmatmul.mubr.msk.f32.gmra.mrb[66].mxu0 %vm1443_vm12, %v8773_v10  ;;  %v8073_v35 = vpop.f32.mrb[52].mxu0 }
 0x148   :  { %v8774_v33 = vld [vmem:[#allocation2 + $0x39] ss:$8 sps:$4 sm:$0xff]   ;;  %vm740_vm2 = vcmp.gt.f32.partialorder %v622_v32, 0.0  ;;  %v804_v34 = vmul.f32 0.05, %v622_v32  ;;  %v637_v37 = vadd.f32 %v9678_v31, %v8073_v35  ;;  %v631_v38 = vpop.f32.mrb[53].mxu0 }
 0x149   :  { %1381 = vst.msk [vmem:[#allocation2 + $0x1f0] sm:$0xf] %vm1271_vm8, %v994_v9  ;;  %v869_v36 = vsel %vm741_vm1, %v627_v28, %v805_v14  ;;  %8127 = vmatmul.mubr.msk.f32.gmra.mrb[2].mxu1 %vm1443_vm12, %v8774_v33  ;;  %v8775_v39 = vld [vmem:[#allocation2 + $0x50] ss:$8 sps:$4 sm:$0xff]   ;;  %v632_v42 = vadd.f32 %v9678_v31, %v631_v38  ;;  %v8776_v43 = vld [vmem:[#allocation2 + $0x60] ss:$8 sps:$4 sm:$0xff]  }
 0x14a   :  { %1386 = vst.msk [vmem:[#allocation2 + $0x220] sm:$0xf] %vm1271_vm8, %v869_v36  ;;  %v868_v41 = vsel %vm740_vm2, %v622_v32, %v804_v34  ;;  %vm743_vm3 = vcmp.gt.f32.partialorder %v637_v37, 0.0  ;;  %v807_v45 = vmul.f32 0.05, %v637_v37  ;;  %8099 = vmatprep.mubr.msk.f32.mxu0 %vm1443_vm12, %v8775_v39  ;;  %vm4497_vm2 = vcmask 122880  }
 0x14b   :  { %v996_v44 = vcombine.high %v868_v41, %v868_v41  ;;  %1384 = vst.msk [vmem:[#allocation2 + $0x210] sm:$0xf] %vm1271_vm8, %v868_v41  ;;  %v8777_v46 = vld [vmem:[#allocation2 + $0x78] ss:$8 sps:$4 sm:$0xff]   ;;  %vm742_vm4 = vcmp.gt.f32.partialorder %v632_v42, 0.0  ;;  %8100 = vmatmul.mubr.msk.f32.vlgmr.msra.gmra.mrb[64].mxu0 %vm1443_vm12, %v8776_v43  ;;  %v8076_v48 = vpop.f32.mrb[54].mxu0 }
 0x14c   :  { %v806_v47 = vmul.f32 0.05, %v632_v42  ;;  %v871_v49 = vsel %vm743_vm3, %v637_v37, %v807_v45  ;;  %v647_v50 = vadd.f32 %v9678_v31, %v8076_v48  ;;  %v641_v51 = vpop.f32.mrb[55].mxu0  ;;  %8102 = vmatprep.mubr.msk.f32.mxu0 %vm1443_vm12, %v8777_v46  ;;  %v8778_v52 = vld [vmem:[#allocation2 + $0x88] ss:$8 sps:$4 sm:$0xff]   ;;  %8106 = vmatpush3.msk.msra.mxu0 %vm1452_vm6, %v9654_v15 }
 0x14d   :  { %1385 = vst.msk [vmem:[#allocation2 + $0x218] sm:$0xf] %vm1271_vm8, %v996_v44  ;;  %1391 = vst.msk [vmem:[#allocation2 + $0x248] sm:$0xf] %vm1271_vm8, %v871_v49  ;;  %v642_v54 = vadd.f32 %v9678_v31, %v641_v51  ;;  %8113 = vmatprep.subr.msk.mxu0 %vm1452_vm6, %v7411_v40  ;;  %v8780_v2 = vld [vmem:[#allocation2 + $0xb0] ss:$8 sps:$4 sm:$0xff]  }
 0x14e   :  { %v870_v53 = vsel %vm742_vm4, %v632_v42, %v806_v47  ;;  %vm745_vm5 = vcmp.gt.f32.partialorder %v647_v50, 0.0  ;;  %v809_v57 = vmul.f32 0.05, %v647_v50  ;;  %v8782_v16 = vld [vmem:[#allocation2 + $0xd8] ss:$8 sps:$4 sm:$0xff]   ;;  %vm4535_vm4 = vcmask 125952  }
 0x14f   :  { %v998_v56 = vcombine.high %v870_v53, %v870_v53  ;;  %1389 = vst.msk [vmem:[#allocation2 + $0x238] sm:$0xf] %vm1271_vm8, %v870_v53  ;;  %vm744_vm7 = vcmp.gt.f32.partialorder %v642_v54, 0.0  ;;  %v808_v58 = vmul.f32 0.05, %v642_v54  ;;  %8103 = vmatmul.mubr.msk.f32.gmra.mrb[66].mxu0 %vm1443_vm12, %v8778_v52  ;;  %v8079_v59 = vpop.f32.mrb[56].mxu0 }
 0x150   :  { %v873_v60 = vsel %vm745_vm5, %v647_v50, %v809_v57  ;;  %v657_v61 = vadd.f32 %v9678_v31, %v8079_v59  ;;  %8107 = vmatprep.mubr.msk.f32.mxu0 %vm1443_vm12, %v8779_v55  ;;  %v651_v63 = vpop.f32.mrb[57].mxu0  ;;  %v8783_v17 = vld [vmem:[#allocation2 + $0xf0] ss:$8 sps:$4 sm:$0xff]   ;;  %v8784_v28 = vld [vmem:[#allocation2 + $0x100] ss:$8 sps:$4 sm:$0xff]  }
 0x151   :  { %1390 = vst.msk [vmem:[#allocation2 + $0x240] sm:$0xf] %vm1271_vm8, %v998_v56  ;;  %1395 = vst.msk [vmem:[#allocation2 + $0x270] sm:$0xf] %vm1271_vm8, %v873_v60  ;;  %v872_v0 = vsel %vm744_vm7, %v642_v54, %v808_v58  ;;  %v652_v1 = vadd.f32 %v9678_v31, %v651_v63  ;;  %v8785_v32 = vld [vmem:[#allocation2 + $0x118] ss:$8 sps:$4 sm:$0xff]  }
 0x152   :  { %v1000_v3 = vcombine.high %v872_v0, %v872_v0  ;;  %1393 = vst.msk [vmem:[#allocation2 + $0x260] sm:$0xf] %vm1271_vm8, %v872_v0  ;;  %vm747_vm9 = vcmp.gt.f32.partialorder %v657_v61, 0.0  ;;  %v811_v4 = vmul.f32 0.05, %v657_v61 }
 0x153   :  { %vm746_vm10 = vcmp.gt.f32.partialorder %v652_v1, 0.0  ;;  %v810_v6 = vmul.f32 0.05, %v652_v1  ;;  %8108 = vmatmul.mubr.msk.f32.vlgmr.msra.gmra.mrb[64].mxu0 %vm1443_vm12, %v8780_v2  ;;  %v8082_v7 = vpop.f32.mrb[58].mxu0  ;;  %v8786_v35 = vld [vmem:[#allocation2 + $0x128] ss:$8 sps:$4 sm:$0xff]  }
 0x154   :  { %1394 = vst.msk [vmem:[#allocation2 + $0x268] sm:$0xf] %vm1271_vm8, %v1000_v3  ;;  %v875_v8 = vsel %vm747_vm9, %v657_v61, %v811_v4  ;;  %v667_v11 = vadd.f32 %v9678_v31, %v8082_v7  ;;  %8110 = vmatprep.mubr.msk.f32.mxu0 %vm1443_vm12, %v8781_v5  ;;  %v661_v12 = vpop.f32.mrb[59].mxu0  ;;  %8114 = vmatpush3.msk.msra.mxu0 %vm1452_vm6, %v7411_v40  ;;  %v7435_v42 = vld [vmem:[%s10354_s3 + $0x1c] sm:$0xf] }
 0x155   :  { %1400 = vst.msk [vmem:[#allocation2 + $0x159] sm:$0xf] %vm1271_vm8, %v875_v8  ;;  %v874_v13 = vsel %vm746_vm10, %v652_v1, %v810_v6  ;;  %v662_v15 = vadd.f32 %v9678_v31, %v661_v12  ;;  %v7441_v50 = vld [vmem:[%s10354_s3 + $0x20] sm:$0xf]  ;;  %v8796_v53 = vld [vmem:[#allocation2 + $0x1f0] ss:$8 sps:$4 sm:$0xff]  }
 0x156   :  { %v1002_v18 = vcombine.high %v874_v13, %v874_v13  ;;  %1398 = vst.msk [vmem:[#allocation2 + $0x149] sm:$0xf] %vm1271_vm8, %v874_v13  ;;  %vm749_vm11 = vcmp.gt.f32.partialorder %v667_v11, 0.0  ;;  %v813_v19 = vmul.f32 0.05, %v667_v11  ;;  %vm4573_vm10 = vcmask 130048  }
 0x157   :  { %vm748_vm13 = vcmp.gt.f32.partialorder %v662_v15, 0.0  ;;  %v812_v20 = vmul.f32 0.05, %v662_v15  ;;  %8111 = vmatmul.mubr.msk.f32.gmra.mrb[66].mxu0 %vm1443_vm12, %v8782_v16  ;;  %v8085_v22 = vpop.f32.mrb[60].mxu0  ;;  %v8795_v52 = vld [vmem:[#allocation2 + $0x1e0] ss:$8 sps:$4 sm:$0xff]  }
 0x158   :  { %1399 = vst.msk [vmem:[#allocation2 + $0x151] sm:$0xf] %vm1271_vm8, %v1002_v18  ;;  %v877_v23 = vsel %vm749_vm11, %v667_v11, %v813_v19  ;;  %v677_v24 = vadd.f32 %v9678_v31, %v8085_v22  ;;  %8115 = vmatprep.mubr.msk.f32.mxu0 %vm1443_vm12, %v8783_v17  ;;  %v671_v25 = vpop.f32.mrb[61].mxu0  ;;  %v7447_v54 = vld [vmem:[%s10354_s3 + $0x24] sm:$0xf]  ;;  %vm5644_vm11 = vcmask 160768  }
 0x159   :  { %1404 = vst.msk [vmem:[#allocation2 + $0x181] sm:$0xf] %vm1271_vm8, %v877_v23  ;;  %v876_v26 = vsel %vm748_vm13, %v662_v15, %v812_v20  ;;  %v672_v27 = vadd.f32 %v9678_v31, %v671_v25  ;;  %v8797_v55 = vld [vmem:[#allocation2 + $0x208] ss:$8 sps:$4 sm:$0xff]   ;;  %v8798_v56 = vld [vmem:[#allocation2 + $0x218] ss:$8 sps:$4 sm:$0xff]  }
 0x15a   :  { %v1004_v29 = vcombine.high %v876_v26, %v876_v26  ;;  %1402 = vst.msk [vmem:[#allocation2 + $0x171] sm:$0xf] %vm1271_vm8, %v876_v26  ;;  %vm751_vm14 = vcmp.gt.f32.partialorder %v677_v24, 0.0  ;;  %v815_v30 = vmul.f32 0.05, %v677_v24  ;;  %vm5650_vm13 = vcmask 155648  }
 0x15b   :  { %vm750_vm15 = vcmp.gt.f32.partialorder %v672_v27, 0.0  ;;  %v814_v10 = vmul.f32 0.05, %v672_v27  ;;  %8116 = vmatmul.mubr.msk.f32.vlgmr.msra.gmra.mrb[64].mxu0 %vm1443_vm12, %v8784_v28  ;;  %v8088_v9 = vpop.f32.mrb[62].mxu0  ;;  %v8799_v57 = vld [vmem:[#allocation2 + $0x230] ss:$8 sps:$4 sm:$0xff]  }
 0x15c   :  { %1403 = vst.msk [vmem:[#allocation2 + $0x179] sm:$0xf] %vm1271_vm8, %v1004_v29  ;;  %v879_v14 = vsel %vm751_vm14, %v677_v24, %v815_v30  ;;  %v687_v33 = vadd.f32 %v9678_v31, %v8088_v9  ;;  %8118 = vmatprep.mubr.msk.f32.mxu0 %vm1443_vm12, %v8785_v32  ;;  %v681_v34 = vpop.f32.mrb[63].mxu0  ;;  %v8800_v58 = vld [vmem:[#allocation2 + $0x240] ss:$8 sps:$4 sm:$0xff]  }
 0x15d   :  { %1409 = vst.msk [vmem:[#allocation2 + $0x1a9] sm:$0xf] %vm1271_vm8, %v879_v14  ;;  %v878_v36 = vsel %vm750_vm15, %v672_v27, %v814_v10  ;;  %v682_v37 = vadd.f32 %v9678_v31, %v681_v34  ;;  %v8787_v38 = vld [vmem:[#allocation2 + $0x140] ss:$8 sps:$4 sm:$0xff]   ;;  %v7459_v2 = vld [vmem:[%s10354_s3 + $0x2c] sm:$0xf] }
 0x15e   :  { %v1006_v39 = vcombine.high %v878_v36, %v878_v36  ;;  %1407 = vst.msk [vmem:[#allocation2 + $0x199] sm:$0xf] %vm1271_vm8, %v878_v36  ;;  %vm753_vm0 = vcmp.gt.f32.partialorder %v687_v33, 0.0  ;;  %v817_v40 = vmul.f32 0.05, %v687_v33  ;;  %8131 = vmatprep.mubr.msk.f32.mxu1 %vm1443_vm12, %v8787_v38  ;;  %vm5688_vm15 = vcmask 158720  }
 0x15f   :  { %vm752_vm1 = vcmp.gt.f32.partialorder %v682_v37, 0.0  ;;  %v816_v41 = vmul.f32 0.05, %v682_v37  ;;  %8119 = vmatmul.mubr.msk.f32.gmra.mrb[66].mxu0 %vm1443_vm12, %v8786_v35  ;;  %v8788_v31 = vld [vmem:[#allocation2 + $0x150] ss:$8 sps:$4 sm:$0xff]  }
 0x160   :  { %1408 = vst.msk [vmem:[#allocation2 + $0x1a1] sm:$0xf] %vm1271_vm8, %v1006_v39  ;;  %v881_v43 = vsel %vm753_vm0, %v687_v33, %v817_v40  ;;  %8132 = vmatmul.mubr.msk.f32.vlgmr.msra.gmra.mrb[0].mxu1 %vm1443_vm12, %v8788_v31  ;;  %v8801_v59 = vld [vmem:[#allocation2 + $0x258] ss:$8 sps:$4 sm:$0xff]   ;;  %v7453_v60 = vld [vmem:[%s10354_s3 + $0x28] sm:$0xf] }
 0x161   :  { %1413 = vst.msk [vmem:[#allocation2 + $0x1d1] sm:$0xf] %vm1271_vm8, %v881_v43  ;;  %v880_v44 = vsel %vm752_vm1, %v682_v37, %v816_v41  ;;  %v8789_v45 = vld [vmem:[#allocation2 + $0x168] ss:$8 sps:$4 sm:$0xff]   ;;  %8138 = vmatpush3.msk.msra.mxu1 %vm1452_vm6, %v9661_v21  ;;  %v8810_v8 = vld [vmem:[#allocation2 + $0x2b8] ss:$8 sps:$4 sm:$0xff]  }
 0x162   :  { %v1008_v46 = vcombine.high %v880_v44, %v880_v44  ;;  %1411 = vst.msk [vmem:[#allocation2 + $0x1c1] sm:$0xf] %vm1271_vm8, %v880_v44  ;;  %8134 = vmatprep.mubr.msk.f32.mxu1 %vm1443_vm12, %v8789_v45  ;;  %8145 = vmatprep.subr.msk.mxu1 %vm1452_vm6, %v7435_v42  ;;  %v8802_v61 = vld [vmem:[#allocation2 + $0x268] ss:$8 sps:$4 sm:$0xff]   ;;  %v8813_v13 = vld [vmem:[#allocation2 + $0x2f8] ss:$8 sps:$4 sm:$0xff]  }
 0x163   :  { %v8790_v47 = vld [vmem:[#allocation2 + $0x178] ss:$8 sps:$4 sm:$0xff]   ;;  %v8805_v1 = vld [vmem:[#allocation2 + $0x169] ss:$8 sps:$4 sm:$0xff]   ;;  %v7483_v26 = vld [vmem:[%s10354_s3 + $0x3c] sm:$0xf] }
 0x164   :  { %1412 = vst.msk [vmem:[#allocation2 + $0x1c9] sm:$0xf] %vm1271_vm8, %v1008_v46  ;;  %8135 = vmatmul.mubr.msk.f32.gmra.mrb[2].mxu1 %vm1443_vm12, %v8790_v47  ;;  %v8803_v63 = vld [vmem:[#allocation2 + $0x141] ss:$8 sps:$4 sm:$0xff]   ;;  %v8804_v0 = vld [vmem:[#allocation2 + $0x151] ss:$8 sps:$4 sm:$0xff]  }
 0x165   :  { %v8791_v48 = vld [vmem:[#allocation2 + $0x190] ss:$8 sps:$4 sm:$0xff]   ;;  %v8807_v4 = vld [vmem:[#allocation2 + $0x280] ss:$8 sps:$4 sm:$0xff]   ;;  %v7471_v15 = vld [vmem:[%s10354_s3 + $0x34] sm:$0xf] }
 0x166   :  { %8139 = vmatprep.mubr.msk.f32.mxu1 %vm1443_vm12, %v8791_v48  ;;  %v8806_v3 = vld [vmem:[#allocation2 + $0x179] ss:$8 sps:$4 sm:$0xff]   ;;  %v8809_v6 = vld [vmem:[#allocation2 + $0x2a8] ss:$8 sps:$4 sm:$0xff]   ;;  %v7507_v31 = vld [vmem:[%s10354_s3 + $0x4c] sm:$0xf] }
 0x167   :  { %v8792_v49 = vld [vmem:[#allocation2 + $0x1a0] ss:$8 sps:$4 sm:$0xff]   ;;  %v8808_v5 = vld [vmem:[#allocation2 + $0x290] ss:$8 sps:$4 sm:$0xff]   ;;  %v7495_v34 = vld [vmem:[%s10354_s3 + $0x44] sm:$0xf] }
 0x168   :  { %8140 = vmatmul.mubr.msk.f32.vlgmr.msra.gmra.mrb[0].mxu1 %vm1443_vm12, %v8792_v49  ;;  %v7465_v7 = vld [vmem:[%s10354_s3 + $0x30] sm:$0xf]  ;;  %v8812_v12 = vld [vmem:[#allocation2 + $0x2e0] ss:$8 sps:$4 sm:$0xff]   ;;  %v7477_v20 = vld [vmem:[%s10354_s3 + $0x38] sm:$0xf] }
 0x169   :  { %v8793_v51 = vld [vmem:[#allocation2 + $0x1b8] ss:$8 sps:$4 sm:$0xff]   ;;  %8146 = vmatpush3.msk.msra.mxu1 %vm1452_vm6, %v7435_v42  ;;  %v8814_v16 = vld [vmem:[#allocation2 + $0x308] ss:$8 sps:$4 sm:$0xff]   ;;  %vm4491_vm8 = vcmask 128000  }
 0x16a   :  { %8142 = vmatprep.mubr.msk.f32.mxu1 %vm1443_vm12, %v8793_v51  ;;  %8153 = vmatprep.subr.msk.mxu1 %vm1452_vm6, %v7441_v50  ;;  %v8811_v11 = vld [vmem:[#allocation2 + $0x2d0] ss:$8 sps:$4 sm:$0xff]   ;;  %v8815_v17 = vld [vmem:[#allocation2 + $0x320] ss:$8 sps:$4 sm:$0xff]   ;;  %4492 = vst.msk [vmem:[#allocation3] sm:$0x3f] %vm4491_vm8, %v8965_v62 }
 0x16b   :  { %v8794_v21 = vld [vmem:[#allocation2 + $0x1c8] ss:$8 sps:$4 sm:$0xff]   ;;  %v8818_v22 = vld [vmem:[#allocation2 + $0x358] ss:$8 sps:$4 sm:$0xff]   ;;  %4495 = vst.msk [vmem:[#allocation3 + $0x28] sm:$0x3f] %vm4491_vm8, %v8965_v62 }
 0x16c   :  { %8143 = vmatmul.mubr.msk.f32.gmra.mrb[2].mxu1 %vm1443_vm12, %v8794_v21  ;;  %v8816_v18 = vld [vmem:[#allocation2 + $0x330] ss:$8 sps:$4 sm:$0xff]   ;;  %v8820_v24 = vld [vmem:[#allocation2 + $0x380] ss:$8 sps:$4 sm:$0xff]   ;;  %4499 = vst.msk [vmem:[#allocation3 + $0x8] sm:$0x1] %vm4497_vm2, %v8965_v62 }
 0x16d   :  { %8147 = vmatprep.mubr.msk.f32.mxu1 %vm1443_vm12, %v8795_v52  ;;  %v8817_v19 = vld [vmem:[#allocation2 + $0x348] ss:$8 sps:$4 sm:$0xff]   ;;  %v8821_v25 = vld [vmem:[#allocation2 + $0x398] ss:$8 sps:$4 sm:$0xff]   ;;  %v7519_v52 = vld [vmem:[%s10354_s3 + $0x54] sm:$0xf] }
 0x16e   :  { %v8819_v23 = vld [vmem:[#allocation2 + $0x370] ss:$8 sps:$4 sm:$0xff]   ;;  %v8823_v28 = vld [vmem:[#allocation2 + $0x281] ss:$8 sps:$4 sm:$0xff]   ;;  %4493 = vst.msk [vmem:[#allocation3 + $0x30] sm:$0x3f] %vm4491_vm8, %v8965_v62 }
 0x16f   :  { %v8822_v27 = vld [vmem:[#allocation2 + $0x3a8] ss:$8 sps:$4 sm:$0xff]   ;;  %v7489_v32 = vld [vmem:[%s10354_s3 + $0x40] sm:$0xf]  ;;  %4496 = vst.msk [vmem:[#allocation3 + $0x58] sm:$0x3f] %vm4491_vm8, %v8965_v62 }
 0x170   :  { %8148 = vmatmul.mubr.msk.f32.vlgmr.msra.gmra.mrb[0].mxu1 %vm1443_vm12, %v8796_v53  ;;  %v8824_v29 = vld [vmem:[#allocation2 + $0x291] ss:$8 sps:$4 sm:$0xff]   ;;  %v8827_v9 = vld [vmem:[#allocation2 + $0x3c0] ss:$8 sps:$4 sm:$0xff]   ;;  %4500 = vst.msk [vmem:[#allocation3 + $0x10] sm:$0x1] %vm4497_vm2, %v8965_v62 }
 0x171   :  { %8154 = vmatpush3.msk.msra.mxu1 %vm1452_vm6, %v7441_v50  ;;  %8150 = vmatprep.mubr.msk.f32.mxu1 %vm1443_vm12, %v8797_v55  ;;  %v8825_v30 = vld [vmem:[#allocation2 + $0x2a9] ss:$8 sps:$4 sm:$0xff]   ;;  %v8826_v10 = vld [vmem:[#allocation2 + $0x2b9] ss:$8 sps:$4 sm:$0xff]   ;;  %4501 = vst.msk [vmem:[#allocation3 + $0x18] sm:$0x1] %vm4497_vm2, %v8965_v62 }
 0x172   :  { %8161 = vmatprep.subr.msk.mxu1 %vm1452_vm6, %v7447_v54  ;;  %v8828_v14 = vld [vmem:[#allocation2 + $0x3d0] ss:$8 sps:$4 sm:$0xff]   ;;  %v8832_v37 = vld [vmem:[#allocation2 + $0x420] ss:$8 sps:$4 sm:$0xff]   ;;  %4502 = vst.msk [vmem:[#allocation3 + $0x20] sm:$0x1] %vm4497_vm2, %v8965_v62 }
 0x173   :  { %v8829_v33 = vld [vmem:[#allocation2 + $0x3e8] ss:$8 sps:$4 sm:$0xff]   ;;  %v8830_v35 = vld [vmem:[#allocation2 + $0x3f8] ss:$8 sps:$4 sm:$0xff]   ;;  %4505 = vst.msk [vmem:[#allocation3 + $0x38] sm:$0x1] %vm4497_vm2, %v8965_v62 }
 0x174   :  { %8151 = vmatmul.mubr.msk.f32.gmra.mrb[2].mxu1 %vm1443_vm12, %v8798_v56  ;;  %v8831_v36 = vld [vmem:[#allocation2 + $0x410] ss:$8 sps:$4 sm:$0xff]   ;;  %v7501_v39 = vld [vmem:[%s10354_s3 + $0x48] sm:$0xf]  ;;  %4506 = vst.msk [vmem:[#allocation3 + $0x40] sm:$0x1] %vm4497_vm2, %v8965_v62 }
 0x175   :  { %8155 = vmatprep.mubr.msk.f32.mxu1 %vm1443_vm12, %v8799_v57  ;;  %v8833_v38 = vld [vmem:[#allocation2 + $0x438] ss:$8 sps:$4 sm:$0xff]   ;;  %v8834_v40 = vld [vmem:[#allocation2 + $0x448] ss:$8 sps:$4 sm:$0xff]   ;;  %4507 = vst.msk [vmem:[#allocation3 + $0x48] sm:$0x1] %vm4497_vm2, %v8965_v62 }
 0x176   :  { %v8835_v41 = vld [vmem:[#allocation2 + $0x460] ss:$8 sps:$4 sm:$0xff]   ;;  %v8836_v42 = vld [vmem:[#allocation2 + $0x470] ss:$8 sps:$4 sm:$0xff]   ;;  %4508 = vst.msk [vmem:[#allocation3 + $0x50] sm:$0x1] %vm4497_vm2, %v8965_v62 }
 0x177   :  { %v8837_v43 = vld [vmem:[#allocation2 + $0x488] ss:$8 sps:$4 sm:$0xff]   ;;  %v8838_v44 = vld [vmem:[#allocation2 + $0x498] ss:$8 sps:$4 sm:$0xff]   ;;  %4511 = vst.msk [vmem:[#allocation3 + $0xd] sm:$0x1] %vm4497_vm2, %v8965_v62 }
 0x178   :  { %8156 = vmatmul.mubr.msk.f32.vlgmr.msra.gmra.mrb[0].mxu1 %vm1443_vm12, %v8800_v58  ;;  %v8839_v45 = vld [vmem:[#allocation2 + $0x4b0] ss:$8 sps:$4 sm:$0xff]   ;;  %v8840_v46 = vld [vmem:[#allocation2 + $0x4c0] ss:$8 sps:$4 sm:$0xff]   ;;  %4512 = vst.msk [vmem:[#allocation3 + $0x15] sm:$0x1] %vm4497_vm2, %v8965_v62 }
 0x179   :  { %8162 = vmatpush3.msk.msra.mxu1 %vm1452_vm6, %v7447_v54  ;;  %8158 = vmatprep.mubr.msk.f32.mxu1 %vm1443_vm12, %v8801_v59  ;;  %v8841_v47 = vld [vmem:[#allocation2 + $0x4d8] ss:$8 sps:$4 sm:$0xff]   ;;  %v7513_v48 = vld [vmem:[%s10354_s3 + $0x50] sm:$0xf]  ;;  %4513 = vst.msk [vmem:[#allocation3 + $0x1d] sm:$0x1] %vm4497_vm2, %v8965_v62 }
 0x17a   :  { %8169 = vmatprep.subr.msk.mxu1 %vm1452_vm6, %v7453_v60  ;;  %v8842_v49 = vld [vmem:[#allocation2 + $0x4e8] ss:$8 sps:$4 sm:$0xff]   ;;  %v8846_v53 = vld [vmem:[#allocation2 + $0x3f9] ss:$8 sps:$4 sm:$0xff]   ;;  %4514 = vst.msk [vmem:[#allocation3 + $0x25] sm:$0x1] %vm4497_vm2, %v8965_v62 }
 0x17b   :  { %v8843_v50 = vld [vmem:[#allocation2 + $0x3c1] ss:$8 sps:$4 sm:$0xff]   ;;  %v8844_v51 = vld [vmem:[#allocation2 + $0x3d1] ss:$8 sps:$4 sm:$0xff]   ;;  %4517 = vst.msk [vmem:[#allocation3 + $0x3d] sm:$0x1] %vm4497_vm2, %v8965_v62 }
 0x17c   :  { %8159 = vmatmul.mubr.msk.f32.gmra.mrb[2].mxu1 %vm1443_vm12, %v8802_v61  ;;  %v8845_v21 = vld [vmem:[#allocation2 + $0x3e9] ss:$8 sps:$4 sm:$0xff]   ;;  %v8848_v55 = vld [vmem:[#allocation2 + $0x18] ss:$8 sps:$4 sm:$0xff]   ;;  %4518 = vst.msk [vmem:[#allocation3 + $0x45] sm:$0x1] %vm4497_vm2, %v8965_v62 }
 0x17d   :  { %8163 = vmatprep.mubr.msk.f32.mxu1 %vm1443_vm12, %v8803_v63  ;;  %v8847_v54 = vld [vmem:[#allocation2 + $0x8] ss:$8 sps:$4 sm:$0xff]   ;;  %v7525_v57 = vld [vmem:[%s10354_s3 + $0x58] sm:$0xf]  ;;  %v7531_v63 = vld [vmem:[%s10354_s3 + $0x5c] sm:$0xf] }
 0x17e   :  { %v8849_v56 = vld [vmem:[#allocation2 + $0x30] ss:$8 sps:$4 sm:$0xff]   ;;  %v8850_v58 = vld [vmem:[#allocation2 + $0x40] ss:$8 sps:$4 sm:$0xff]   ;;  %4519 = vst.msk [vmem:[#allocation3 + $0x4d] sm:$0x1] %vm4497_vm2, %v8965_v62 }
 0x17f   :  { %v8851_v59 = vld [vmem:[#allocation2 + $0x58] ss:$8 sps:$4 sm:$0xff]   ;;  %4520 = vst.msk [vmem:[#allocation3 + $0x55] sm:$0x1] %vm4497_vm2, %v8965_v62  ;;  %4498 = vst.msk [vmem:[#allocation3] sm:$0x1] %vm4497_vm2, %v8965_v62 }
 0x180   :  { %8164 = vmatmul.mubr.msk.f32.vlgmr.msra.gmra.mrb[0].mxu1 %vm1443_vm12, %v8804_v0  ;;  %v8853_v61 = vld [vmem:[#allocation2 + $0x80] ss:$8 sps:$4 sm:$0xff]   ;;  %v8854_v0 = vld [vmem:[#allocation2 + $0x90] ss:$8 sps:$4 sm:$0xff]   ;;  %4503 = vst.msk [vmem:[#allocation3 + $0x28] sm:$0x1] %vm4497_vm2, %v8965_v62 }
 0x181   :  { %8170 = vmatpush3.msk.msra.mxu1 %vm1452_vm6, %v7453_v60  ;;  %8166 = vmatprep.mubr.msk.f32.mxu1 %vm1443_vm12, %v8805_v1  ;;  %v8852_v60 = vld [vmem:[#allocation2 + $0x68] ss:$8 sps:$4 sm:$0xff]   ;;  %4510 = vst.msk [vmem:[#allocation3 + $0x5] sm:$0x1] %vm4497_vm2, %v8965_v62  ;;  %4515 = vst.msk [vmem:[#allocation3 + $0x2d] sm:$0x1] %vm4497_vm2, %v8965_v62 }
 0x182   :  { %8177 = vmatprep.subr.msk.mxu1 %vm1452_vm6, %v7459_v2  ;;  %v8855_v1 = vld [vmem:[#allocation2 + $0xa8] ss:$8 sps:$4 sm:$0xff]   ;;  %4504 = vst.msk [vmem:[#allocation3 + $0x30] sm:$0x1] %vm4497_vm2, %v8965_v62  ;;  %4509 = vst.msk [vmem:[#allocation3 + $0x58] sm:$0x1] %vm4497_vm2, %v8965_v62 }
 0x183   :  { %4516 = vst.msk [vmem:[#allocation3 + $0x35] sm:$0x1] %vm4497_vm2, %v8965_v62  ;;  %4521 = vst.msk [vmem:[#allocation3 + $0x5d] sm:$0x1] %vm4497_vm2, %v8965_v62  ;;  %vm5727_vm2 = vcmask 162816  }
 0x184   :  { %8167 = vmatmul.mubr.msk.f32.gmra.mrb[2].mxu1 %vm1443_vm12, %v8806_v3  ;;  %v8857_v3 = vld [vmem:[#allocation2 + $0xd0] ss:$8 sps:$4 sm:$0xff]   ;;  %5645 = vst.msk [vmem:[#allocation4] sm:$0x3f] %vm5644_vm11, %v8965_v62  ;;  %5648 = vst.msk [vmem:[#allocation4 + $0x28] sm:$0x3f] %vm5644_vm11, %v8965_v62 }
 0x185   :  { %8171 = vmatprep.mubr.msk.f32.mxu1 %vm1443_vm12, %v8807_v4  ;;  %v7537_v4 = vld [vmem:[%s10354_s3 + $0x60] sm:$0xf]  ;;  %5652 = vst.msk [vmem:[#allocation4 + $0x8] sm:$0x1] %vm5650_vm13, %v8965_v62  ;;  %5653 = vst.msk [vmem:[#allocation4 + $0x10] sm:$0x1] %vm5650_vm13, %v8965_v62 }
 0x186   :  { %5646 = vst.msk [vmem:[#allocation4 + $0x30] sm:$0x3f] %vm5644_vm11, %v8965_v62  ;;  %5649 = vst.msk [vmem:[#allocation4 + $0x58] sm:$0x3f] %vm5644_vm11, %v8965_v62  ;;  %s8984_s3 = smov 60   ;;  %vm7278_vm11 = vcmask 228352  }
 0x187   :  { %5654 = vst.msk [vmem:[#allocation4 + $0x18] sm:$0x1] %vm5650_vm13, %v8965_v62  ;;  %5655 = vst.msk [vmem:[#allocation4 + $0x20] sm:$0x1] %vm5650_vm13, %v8965_v62 }
 0x188   :  { %8172 = vmatmul.mubr.msk.f32.vlgmr.msra.gmra.mrb[0].mxu1 %vm1443_vm12, %v8808_v5  ;;  %v8858_v5 = vld [vmem:[#allocation2 + $0xe0] ss:$8 sps:$4 sm:$0xff]   ;;  %5658 = vst.msk [vmem:[#allocation4 + $0x38] sm:$0x1] %vm5650_vm13, %v8965_v62  ;;  %5659 = vst.msk [vmem:[#allocation4 + $0x40] sm:$0x1] %vm5650_vm13, %v8965_v62 }
 0x189   :  { %8178 = vmatpush3.msk.msra.mxu1 %vm1452_vm6, %v7459_v2  ;;  %8174 = vmatprep.mubr.msk.f32.mxu1 %vm1443_vm12, %v8809_v6  ;;  %v8856_v2 = vld [vmem:[#allocation2 + $0xb8] ss:$8 sps:$4 sm:$0xff]   ;;  %5660 = vst.msk [vmem:[#allocation4 + $0x48] sm:$0x1] %vm5650_vm13, %v8965_v62  ;;  %5661 = vst.msk [vmem:[#allocation4 + $0x50] sm:$0x1] %vm5650_vm13, %v8965_v62 }
 0x18a   :  { %8185 = vmatprep.subr.msk.mxu1 %vm1452_vm6, %v7465_v7  ;;  %v8859_v6 = vld [vmem:[#allocation2 + $0xf8] ss:$8 sps:$4 sm:$0xff]   ;;  %5664 = vst.msk [vmem:[#allocation4 + $0xd] sm:$0x1] %vm5650_vm13, %v8965_v62  ;;  %5665 = vst.msk [vmem:[#allocation4 + $0x15] sm:$0x1] %vm5650_vm13, %v8965_v62 }
 0x18b   :  { %5666 = vst.msk [vmem:[#allocation4 + $0x1d] sm:$0x1] %vm5650_vm13, %v8965_v62  ;;  %5667 = vst.msk [vmem:[#allocation4 + $0x25] sm:$0x1] %vm5650_vm13, %v8965_v62 }
 0x18c   :  { %8175 = vmatmul.mubr.msk.f32.gmra.mrb[2].mxu1 %vm1443_vm12, %v8810_v8  ;;  %v8861_v8 = vld [vmem:[#allocation2 + $0x120] ss:$8 sps:$4 sm:$0xff]   ;;  %5670 = vst.msk [vmem:[#allocation4 + $0x3d] sm:$0x1] %vm5650_vm13, %v8965_v62  ;;  %5671 = vst.msk [vmem:[#allocation4 + $0x45] sm:$0x1] %vm5650_vm13, %v8965_v62 }
 0x18d   :  { %8179 = vmatprep.mubr.msk.f32.mxu1 %vm1443_vm12, %v8811_v11  ;;  %v8862_v11 = vld [vmem:[#allocation2 + $0x130] ss:$8 sps:$4 sm:$0xff]   ;;  %5672 = vst.msk [vmem:[#allocation4 + $0x4d] sm:$0x1] %vm5650_vm13, %v8965_v62  ;;  %5673 = vst.msk [vmem:[#allocation4 + $0x55] sm:$0x1] %vm5650_vm13, %v8965_v62 }
 0x18e   :  { %5651 = vst.msk [vmem:[#allocation4] sm:$0x1] %vm5650_vm13, %v8965_v62  ;;  %5656 = vst.msk [vmem:[#allocation4 + $0x28] sm:$0x1] %vm5650_vm13, %v8965_v62 }
 0x18f   :  { %5663 = vst.msk [vmem:[#allocation4 + $0x5] sm:$0x1] %vm5650_vm13, %v8965_v62  ;;  %5668 = vst.msk [vmem:[#allocation4 + $0x2d] sm:$0x1] %vm5650_vm13, %v8965_v62 }
 0x190   :  { %8180 = vmatmul.mubr.msk.f32.vlgmr.msra.gmra.mrb[0].mxu1 %vm1443_vm12, %v8812_v12  ;;  %v8863_v12 = vld [vmem:[#allocation2 + $0x9] ss:$8 sps:$4 sm:$0xff]   ;;  %5657 = vst.msk [vmem:[#allocation4 + $0x30] sm:$0x1] %vm5650_vm13, %v8965_v62  ;;  %5662 = vst.msk [vmem:[#allocation4 + $0x58] sm:$0x1] %vm5650_vm13, %v8965_v62 }
 0x191   :  { %8186 = vmatpush3.msk.msra.mxu1 %vm1452_vm6, %v7465_v7  ;;  %8182 = vmatprep.mubr.msk.f32.mxu1 %vm1443_vm12, %v8813_v13  ;;  %v8860_v7 = vld [vmem:[#allocation2 + $0x108] ss:$8 sps:$4 sm:$0xff]   ;;  %v8864_v13 = vld [vmem:[#allocation2 + $0x19] ss:$8 sps:$4 sm:$0xff]   ;;  %5669 = vst.msk [vmem:[#allocation4 + $0x35] sm:$0x1] %vm5650_vm13, %v8965_v62 }
 0x192   :  { %8193 = vmatprep.subr.msk.mxu1 %vm1452_vm6, %v7471_v15  ;;  %5674 = vst.msk [vmem:[#allocation4 + $0x5d] sm:$0x1] %vm5650_vm13, %v8965_v62  ;;  %vm7280_vm13 = vcmask 261120  }
 0x194   :  { %8183 = vmatmul.mubr.msk.f32.gmra.mrb[2].mxu1 %vm1443_vm12, %v8814_v16  ;;  %v8866_v16 = vld [vmem:[#allocation2 + $0x41] ss:$8 sps:$4 sm:$0xff]  }
 0x195   :  { %8187 = vmatprep.mubr.msk.f32.mxu1 %vm1443_vm12, %v8815_v17 }
 0x198   :  { %8188 = vmatmul.mubr.msk.f32.vlgmr.msra.gmra.mrb[0].mxu1 %vm1443_vm12, %v8816_v18 }
 0x199   :  { %8194 = vmatpush3.msk.msra.mxu1 %vm1452_vm6, %v7471_v15  ;;  %8190 = vmatprep.mubr.msk.f32.mxu1 %vm1443_vm12, %v8817_v19  ;;  %v8865_v15 = vld [vmem:[#allocation2 + $0x31] ss:$8 sps:$4 sm:$0xff]  }
 0x19a   :  { %8201 = vmatprep.subr.msk.mxu1 %vm1452_vm6, %v7477_v20 }
 0x19c   :  { %8191 = vmatmul.mubr.msk.f32.gmra.mrb[2].mxu1 %vm1443_vm12, %v8818_v22  ;;  %v4559_v22 = vld [vmem:[%s10356_s5] sm:$0xff] }
 0x19d   :  { %8195 = vmatprep.mubr.msk.f32.mxu1 %vm1443_vm12, %v8819_v23  ;;  %v4560_v23 = vld [vmem:[%s10356_s5 + $0x8] sm:$0xff] }
 0x1a0   :  { %8196 = vmatmul.mubr.msk.f32.vlgmr.msra.gmra.mrb[0].mxu1 %vm1443_vm12, %v8820_v24  ;;  %v8497_v24 = vpack.c.bf16 %v4560_v23, %v4559_v22 }
 0x1a1   :  { %8202 = vmatpush3.msk.msra.mxu1 %vm1452_vm6, %v7477_v20  ;;  %8198 = vmatprep.mubr.msk.f32.mxu1 %vm1443_vm12, %v8821_v25  ;;  %v7548_v25 = vld [vmem:[%s10356_s5 + $0x10] sm:$0xff] }
 0x1a2   :  { %8209 = vmatprep.subr.msk.mxu1 %vm1452_vm6, %v7483_v26  ;;  %8498 = vmatprep.subr.bf16.mxu0 %v8497_v24 }
 0x1a3   :  { %8500 = vmatpush3.bf16.msra.mxu0 %v8497_v24 }
 0x1a4   :  { %8199 = vmatmul.mubr.msk.f32.gmra.mrb[2].mxu1 %vm1443_vm12, %v8822_v27 }
 0x1a5   :  { %8203 = vmatprep.mubr.msk.f32.mxu1 %vm1443_vm12, %v8823_v28  ;;  %v7393_v28 = vld [vmem:[%s10355_s4] ss:$0 sm:$0xff] }
 0x1a8   :  { %8204 = vmatmul.mubr.msk.f32.vlgmr.msra.gmra.mrb[0].mxu1 %vm1443_vm12, %v8824_v29 }
 0x1a9   :  { %8210 = vmatpush3.msk.msra.mxu1 %vm1452_vm6, %v7483_v26  ;;  %8206 = vmatprep.mubr.msk.f32.mxu1 %vm1443_vm12, %v8825_v30  ;;  %v7549_v26 = vld [vmem:[%s10356_s5 + $0x18] sm:$0xff] }
 0x1aa   :  { %8217 = vmatprep.subr.msk.mxu1 %vm1452_vm6, %v7489_v32  ;;  %v8501_v27 = vpack.c.bf16 %v7549_v26, %v7548_v25  ;;  %v7584_v26 = vld [vmem:[%s10356_s5 + $0x70] sm:$0xff] }
 0x1ac   :  { %8207 = vmatmul.mubr.msk.f32.gmra.mrb[2].mxu1 %vm1443_vm12, %v8826_v10  ;;  %8502 = vmatprep.subr.bf16.mxu0 %v8501_v27 }
 0x1ad   :  { %8211 = vmatprep.mubr.msk.f32.mxu1 %vm1443_vm12, %v8827_v9 }
 0x1b0   :  { %8212 = vmatmul.mubr.msk.f32.vlgmr.msra.gmra.mrb[0].mxu1 %vm1443_vm12, %v8828_v14 }
 0x1b1   :  { %8218 = vmatpush3.msk.msra.mxu1 %vm1452_vm6, %v7489_v32  ;;  %8214 = vmatprep.mubr.msk.f32.mxu1 %vm1443_vm12, %v8829_v33 }
 0x1b2   :  { %8225 = vmatprep.subr.msk.mxu1 %vm1452_vm6, %v7495_v34 }
 0x1b4   :  { %8215 = vmatmul.mubr.msk.f32.gmra.mrb[2].mxu1 %vm1443_vm12, %v8830_v35 }
 0x1b5   :  { %8219 = vmatprep.mubr.msk.f32.mxu1 %vm1443_vm12, %v8831_v36 }
 0x1b8   :  { %8220 = vmatmul.mubr.msk.f32.vlgmr.msra.gmra.mrb[0].mxu1 %vm1443_vm12, %v8832_v37 }
 0x1b9   :  { %8226 = vmatpush3.msk.msra.mxu1 %vm1452_vm6, %v7495_v34  ;;  %8222 = vmatprep.mubr.msk.f32.mxu1 %vm1443_vm12, %v8833_v38 }
 0x1ba   :  { %8233 = vmatprep.subr.msk.mxu1 %vm1452_vm6, %v7501_v39 }
 0x1bc   :  { %8223 = vmatmul.mubr.msk.f32.gmra.mrb[2].mxu1 %vm1443_vm12, %v8834_v40 }
 0x1bd   :  { %8227 = vmatprep.mubr.msk.f32.mxu1 %vm1443_vm12, %v8835_v41 }
 0x1c0   :  { %8228 = vmatmul.mubr.msk.f32.vlgmr.msra.gmra.mrb[0].mxu1 %vm1443_vm12, %v8836_v42 }
 0x1c1   :  { %8234 = vmatpush3.msk.msra.mxu1 %vm1452_vm6, %v7501_v39  ;;  %8230 = vmatprep.mubr.msk.f32.mxu1 %vm1443_vm12, %v8837_v43 }
 0x1c2   :  { %8241 = vmatprep.subr.msk.mxu1 %vm1452_vm6, %v7507_v31 }
 0x1c4   :  { %8231 = vmatmul.mubr.msk.f32.gmra.mrb[2].mxu1 %vm1443_vm12, %v8838_v44 }
 0x1c5   :  { %8235 = vmatprep.mubr.msk.f32.mxu1 %vm1443_vm12, %v8839_v45 }
 0x1c8   :  { %8236 = vmatmul.mubr.msk.f32.vlgmr.msra.gmra.mrb[0].mxu1 %vm1443_vm12, %v8840_v46 }
 0x1c9   :  { %8242 = vmatpush3.msk.msra.mxu1 %vm1452_vm6, %v7507_v31  ;;  %8238 = vmatprep.mubr.msk.f32.mxu1 %vm1443_vm12, %v8841_v47 }
 0x1ca   :  { %8249 = vmatprep.subr.msk.mxu1 %vm1452_vm6, %v7513_v48 }
 0x1cc   :  { %8239 = vmatmul.mubr.msk.f32.gmra.mrb[2].mxu1 %vm1443_vm12, %v8842_v49 }
 0x1cd   :  { %8243 = vmatprep.mubr.msk.f32.mxu1 %vm1443_vm12, %v8843_v50  ;;  %v7554_v50 = vld [vmem:[%s10356_s5 + $0x20] sm:$0xff] }
 0x1d0   :  { %8244 = vmatmul.mubr.msk.f32.vlgmr.msra.gmra.mrb[0].mxu1 %vm1443_vm12, %v8844_v51  ;;  %v7555_v51 = vld [vmem:[%s10356_s5 + $0x28] sm:$0xff] }
 0x1d1   :  { %8250 = vmatpush3.msk.msra.mxu1 %vm1452_vm6, %v7513_v48  ;;  %8246 = vmatprep.mubr.msk.f32.mxu1 %vm1443_vm12, %v8845_v21 }
 0x1d2   :  { %8257 = vmatprep.subr.msk.mxu1 %vm1452_vm6, %v7519_v52 }
 0x1d4   :  { %8247 = vmatmul.mubr.msk.f32.gmra.mrb[2].mxu1 %vm1443_vm12, %v8846_v53  ;;  %v8505_v53 = vpack.c.bf16 %v7555_v51, %v7554_v50  ;;  %v7543_v51 = vld [vmem:[%s10357_s6] ss:$0 sm:$0xff]  ;;  %s8980_s6 = smov 28  }
 0x1d5   :  { %8251 = vmatprep.mubr.msk.f32.mxu1 %vm1443_vm12, %v8847_v54 }
 0x1d8   :  { %8252 = vmatmul.mubr.msk.f32.vlgmr.msra.gmra.mrb[0].mxu1 %vm1443_vm12, %v8848_v55  ;;  %v7560_v55 = vld [vmem:[%s10356_s5 + $0x30] sm:$0xff] }
 0x1d9   :  { %8258 = vmatpush3.msk.msra.mxu1 %vm1452_vm6, %v7519_v52  ;;  %8254 = vmatprep.mubr.msk.f32.mxu1 %vm1443_vm12, %v8849_v56 }
 0x1da   :  { %8265 = vmatprep.subr.msk.mxu1 %vm1452_vm6, %v7525_v57 }
 0x1dc   :  { %8255 = vmatmul.mubr.msk.f32.gmra.mrb[2].mxu1 %vm1443_vm12, %v8850_v58  ;;  %v7561_v58 = vld [vmem:[%s10356_s5 + $0x38] sm:$0xff] }
 0x1dd   :  { %8259 = vmatprep.mubr.msk.f32.mxu1 %vm1443_vm12, %v8851_v59 }
 0x1e0   :  { %8260 = vmatmul.mubr.msk.f32.vlgmr.msra.gmra.mrb[0].mxu1 %vm1443_vm12, %v8852_v60  ;;  %v8509_v60 = vpack.c.bf16 %v7561_v58, %v7560_v55 }
 0x1e1   :  { %8266 = vmatpush3.msk.msra.mxu1 %vm1452_vm6, %v7525_v57  ;;  %8262 = vmatprep.mubr.msk.f32.mxu1 %vm1443_vm12, %v8853_v61 }
 0x1e2   :  { %8273 = vmatprep.subr.msk.mxu1 %vm1452_vm6, %v7531_v63 }
 0x1e4   :  { %8263 = vmatmul.mubr.msk.f32.gmra.mrb[2].mxu1 %vm1443_vm12, %v8854_v0  ;;  %v7567_v0 = vld [vmem:[%s10356_s5 + $0x48] sm:$0xff] }
 0x1e5   :  { %8267 = vmatprep.mubr.msk.f32.mxu1 %vm1443_vm12, %v8855_v1 }
 0x1e8   :  { %8268 = vmatmul.mubr.msk.f32.vlgmr.msra.gmra.mrb[0].mxu1 %vm1443_vm12, %v8856_v2 }
 0x1e9   :  { %8274 = vmatpush3.msk.msra.mxu1 %vm1452_vm6, %v7531_v63  ;;  %8270 = vmatprep.mubr.msk.f32.mxu1 %vm1443_vm12, %v8857_v3  ;;  %v7566_v63 = vld [vmem:[%s10356_s5 + $0x40] sm:$0xff] }
 0x1ea   :  { %8281 = vmatprep.subr.msk.mxu1 %vm1452_vm6, %v7537_v4 }
 0x1ec   :  { %8271 = vmatmul.mubr.msk.f32.gmra.mrb[2].mxu1 %vm1443_vm12, %v8858_v5 }
 0x1ed   :  { %8275 = vmatprep.mubr.msk.f32.mxu1 %vm1443_vm12, %v8859_v6  ;;  %v7572_v6 = vld [vmem:[%s10356_s5 + $0x50] sm:$0xff] }
 0x1f0   :  { %8276 = vmatmul.mubr.msk.f32.vlgmr.msra.gmra.mrb[0].mxu1 %vm1443_vm12, %v8860_v7  ;;  %v7573_v7 = vld [vmem:[%s10356_s5 + $0x58] sm:$0xff] }
 0x1f1   :  { %8282 = vmatpush3.msk.msra.mxu1 %vm1452_vm6, %v7537_v4  ;;  %8278 = vmatprep.mubr.msk.f32.mxu1 %vm1443_vm12, %v8861_v8  ;;  %v8513_v4 = vpack.c.bf16 %v7567_v0, %v7566_v63 }
 0x1f4   :  { %8279 = vmatmul.mubr.msk.f32.gmra.mrb[2].mxu1 %vm1443_vm12, %v8862_v11 }
 0x1f5   :  { %8283 = vmatprep.mubr.msk.f32.mxu1 %vm1443_vm12, %v8863_v12 }
 0x1f8   :  { %8284 = vmatmul.mubr.msk.f32.vlgmr.msra.gmra.mrb[0].mxu1 %vm1443_vm12, %v8864_v13  ;;  %v8517_v13 = vpack.c.bf16 %v7573_v7, %v7572_v6 }
 0x1f9   :  { %8286 = vmatprep.mubr.msk.f32.mxu1 %vm1443_vm12, %v8865_v15 }
 0x1fc   :  { %8287 = vmatmul.mubr.msk.f32.gmra.mrb[2].mxu1 %vm1443_vm12, %v8866_v16 }
 0x22e   :  { %v8117_v17 = vpop.f32.mrb[64].mxu0 }
 0x22f   :  { %v1890_v18 = vpop.f32.mrb[65].mxu0  ;;  %v8569_v29 = vadd.f32 %v8117_v17, %v7393_v28 }
 0x230   :  { %v8571_v30 = vadd.f32 %v7393_v28, %v1890_v18  ;;  %v7578_v18 = vld [vmem:[%s10356_s5 + $0x60] sm:$0xff] }
 0x232   :  { %v8120_v19 = vpop.f32.mrb[66].mxu0 }
 0x233   :  { %v1900_v20 = vpop.f32.mrb[67].mxu0  ;;  %v8573_v33 = vadd.f32 %v8120_v19, %v7393_v28  ;;  %v7579_v19 = vld [vmem:[%s10356_s5 + $0x68] sm:$0xff] }
 0x234   :  { %v8575_v35 = vadd.f32 %v7393_v28, %v1900_v20  ;;  %v8521_v22 = vpack.c.bf16 %v7579_v19, %v7578_v18 }
 0x2cb   :  { %v8285_v32 = vpop.f32.mrb[0].mxu1 }
 0x2cc   :  { %v8570_v10 = vadd.f32 %v8569_v29, %v8285_v32  ;;  %v4456_v9 = vpop.f32.mrb[1].mxu1 }
 0x2cd   :  { %v8572_v14 = vadd.f32 %v8571_v30, %v4456_v9  ;;  %v7590_v9 = vld [vmem:[%s10356_s5 + $0x80] sm:$0xff] }
 0x2ce   :  { %vm4480_vm3 = vcmp.gt.f32.partialorder %v8570_v10, 0.0  ;;  %v4484_v34 = vmul.f32 0.05, %v8570_v10 }
 0x2cf   :  { %vm4479_vm5 = vcmp.gt.f32.partialorder %v8572_v14, 0.0  ;;  %v4483_v36 = vmul.f32 0.05, %v8572_v14  ;;  %v8288_v37 = vpop.f32.mrb[2].mxu1 }
 0x2d0   :  { %v4488_v38 = vsel %vm4480_vm3, %v8570_v10, %v4484_v34  ;;  %v8574_v39 = vadd.f32 %v8573_v33, %v8288_v37  ;;  %v4466_v40 = vpop.f32.mrb[3].mxu1  ;;  %vm6996_vm3 = vcmask 15360  }
 0x2d1   :  { %v4527_v41 = vcombine.high %v4488_v38, %v4488_v38  ;;  %4538 = vst.msk [vmem:[#allocation3 + $0x19] sm:$0xf] %vm4535_vm4, %v4488_v38  ;;  %v4487_v42 = vsel %vm4479_vm5, %v8572_v14, %v4483_v36  ;;  %v8576_v43 = vadd.f32 %v8575_v35, %v4466_v40  ;;  %v7591_v14 = vld [vmem:[%s10356_s5 + $0x88] sm:$0xff]  ;;  %vm7270_vm5 = vcmask 64512  }
 0x2d2   :  { %v4526_v31 = vcombine.high %v4487_v42, %v4487_v42  ;;  %4536 = vst.msk [vmem:[#allocation3 + $0x9] sm:$0xf] %vm4535_vm4, %v4487_v42  ;;  %vm4482_vm7 = vcmp.gt.f32.partialorder %v8574_v39, 0.0  ;;  %v4486_v44 = vmul.f32 0.05, %v8574_v39  ;;  %v8529_v34 = vpack.c.bf16 %v7591_v14, %v7590_v9 }
 0x2d3   :  { %4539 = vst.msk [vmem:[#allocation3 + $0x21] sm:$0xf] %vm4535_vm4, %v4527_v41  ;;  %vm4481_vm9 = vcmp.gt.f32.partialorder %v8576_v43, 0.0  ;;  %v4485_v45 = vmul.f32 0.05, %v8576_v43 }
 0x2d4   :  { %4537 = vst.msk [vmem:[#allocation3 + $0x11] sm:$0xf] %vm4535_vm4, %v4526_v31  ;;  %v4490_v46 = vsel %vm4482_vm7, %v8574_v39, %v4486_v44  ;;  %v5712_v44 = vld [vmem:[%s10358_s7] sm:$0xff]  ;;  %vm7272_vm7 = vcmask 97280  }
 0x2d5   :  { %v4529_v47 = vcombine.high %v4490_v46, %v4490_v46  ;;  %4542 = vst.msk [vmem:[#allocation3 + $0x49] sm:$0xf] %vm4535_vm4, %v4490_v46  ;;  %v4489_v48 = vsel %vm4481_vm9, %v8576_v43, %v4485_v45  ;;  %v5713_v45 = vld [vmem:[%s10358_s7 + $0x8] sm:$0xff]  ;;  %vm7276_vm9 = vcmask 195584  }
 0x2d6   :  { %v4528_v49 = vcombine.high %v4489_v48, %v4489_v48  ;;  %4540 = vst.msk [vmem:[#allocation3 + $0x39] sm:$0xf] %vm4535_vm4, %v4489_v48  ;;  %v8533_v46 = vpack.c.bf16 %v5713_v45, %v5712_v44  ;;  %v7602_v48 = vld [vmem:[%s10358_s7 + $0x18] sm:$0xff]  ;;  %v7642_v45 = vld [vmem:[%s10358_s7 + $0x90] sm:$0xff] }
 0x2d7   :  { %4543 = vst.msk [vmem:[#allocation3 + $0x51] sm:$0xf] %vm4535_vm4, %v4529_v47  ;;  %v5714_v47 = vld [vmem:[%s10358_s7 + $0x10] sm:$0xf] }
 0x2d8   :  { %4541 = vst.msk [vmem:[#allocation3 + $0x41] sm:$0xf] %vm4535_vm4, %v4528_v49  ;;  %8534 = vmatprep.subr.bf16.mxu1 %v8533_v46  ;;  %v7603_v49 = vld [vmem:[%s10358_s7 + $0x20] sm:$0xff]  ;;  %vm7003_vm4 = vcmask 23552  }
 0x2d9   :  { %v8867_v21 = vld [vmem:[#allocation3] ss:$8 sps:$4 sm:$0xff]   ;;  %8536 = vmatpush3.bf16.msra.mxu1 %v8533_v46  ;;  %v8537_v50 = vpack.c.bf16 %v7603_v49, %v7602_v48  ;;  %v7643_v46 = vld [vmem:[%s10358_s7 + $0x98] sm:$0xff] }
 0x2da   :  { %8293 = vmatprep.mubr.msk.f32.mxu0 %vm4573_vm10, %v8867_v21  ;;  %v8871_v57 = vld [vmem:[#allocation3 + $0x1] ss:$8 sps:$4 sm:$0xff]   ;;  %8383 = vmatprep.subr.msk.mxu1 %vm1452_vm6, %v5714_v47  ;;  %v8557_v48 = vpack.c.bf16 %v7643_v46, %v7642_v45 }
 0x2db   :  { %v8868_v52 = vld [vmem:[#allocation3 + $0x10] ss:$8 sps:$4 sm:$0xff]   ;;  %v8875_v2 = vld [vmem:[#allocation3 + $0x2] ss:$8 sps:$4 sm:$0xff]  }
 0x2dc   :  { %8294 = vmatmul.mubr.msk.f32.vlgmr.msra.gmra.mrb[68].mxu0 %vm4573_vm10, %v8868_v52  ;;  %v8872_v59 = vld [vmem:[#allocation3 + $0x11] ss:$8 sps:$4 sm:$0xff]   ;;  %v8892_v33 = vld [vmem:[#allocation3 + $0x20] ss:$8 sps:$4 sm:$0xff]  }
 0x2dd   :  { %v8869_v54 = vld [vmem:[#allocation3 + $0x30] ss:$8 sps:$4 sm:$0xff]   ;;  %8504 = vmatpush3.bf16.msra.mxu0 %v8501_v27  ;;  %v8896_v38 = vld [vmem:[#allocation3 + $0x21] ss:$8 sps:$4 sm:$0xff]   ;;  %8384 = vmatpush3.msk.msra.mxu1 %vm1452_vm6, %v5714_v47 }
 0x2de   :  { %8296 = vmatprep.mubr.msk.f32.mxu0 %vm4573_vm10, %v8869_v54  ;;  %8506 = vmatprep.subr.bf16.mxu0 %v8505_v53  ;;  %v8873_v61 = vld [vmem:[#allocation3 + $0x31] ss:$8 sps:$4 sm:$0xff]   ;;  %v8900_v42 = vld [vmem:[#allocation3 + $0x22] ss:$8 sps:$4 sm:$0xff]  }
 0x2df   :  { %v8870_v56 = vld [vmem:[#allocation3 + $0x40] ss:$8 sps:$4 sm:$0xff]   ;;  %v8876_v3 = vld [vmem:[#allocation3 + $0x12] ss:$8 sps:$4 sm:$0xff]   ;;  %8538 = vmatprep.subr.bf16.mxu1 %v8537_v50 }
 0x2e0   :  { %8297 = vmatmul.mubr.msk.f32.gmra.mrb[70].mxu0 %vm4573_vm10, %v8870_v56  ;;  %v8874_v1 = vld [vmem:[#allocation3 + $0x41] ss:$8 sps:$4 sm:$0xff]   ;;  %v8877_v5 = vld [vmem:[#allocation3 + $0x32] ss:$8 sps:$4 sm:$0xff]  }
 0x2e1   :  { %8303 = vmatprep.mubr.msk.f32.mxu0 %vm4573_vm10, %v8871_v57  ;;  %v8878_v8 = vld [vmem:[#allocation3 + $0x42] ss:$8 sps:$4 sm:$0xff]   ;;  %v7585_v27 = vld [vmem:[%s10356_s5 + $0x78] sm:$0xff] }
 0x2e2   :  { %v8879_v11 = vld [vmem:[#allocation3 + $0x8] ss:$8 sps:$4 sm:$0xff]   ;;  %v8880_v12 = vld [vmem:[#allocation3 + $0x18] ss:$8 sps:$4 sm:$0xff]   ;;  %v8525_v29 = vpack.c.bf16 %v7585_v27, %v7584_v26 }
 0x2e3   :  { %v8881_v15 = vld [vmem:[#allocation3 + $0x38] ss:$8 sps:$4 sm:$0xff]   ;;  %v8882_v16 = vld [vmem:[#allocation3 + $0x48] ss:$8 sps:$4 sm:$0xff]  }
 0x2e4   :  { %8304 = vmatmul.mubr.msk.f32.vlgmr.msra.gmra.mrb[68].mxu0 %vm4573_vm10, %v8872_v59  ;;  %v8883_v17 = vld [vmem:[#allocation3 + $0x9] ss:$8 sps:$4 sm:$0xff]   ;;  %v8884_v20 = vld [vmem:[#allocation3 + $0x19] ss:$8 sps:$4 sm:$0xff]  }
 0x2e5   :  { %8508 = vmatpush3.bf16.msra.mxu0 %v8505_v53  ;;  %8306 = vmatprep.mubr.msk.f32.mxu0 %vm4573_vm10, %v8873_v61  ;;  %v8885_v23 = vld [vmem:[#allocation3 + $0x39] ss:$8 sps:$4 sm:$0xff]   ;;  %v8886_v24 = vld [vmem:[#allocation3 + $0x49] ss:$8 sps:$4 sm:$0xff]  }
 0x2e6   :  { %8510 = vmatprep.subr.bf16.mxu0 %v8509_v60  ;;  %v8887_v25 = vld [vmem:[#allocation3 + $0xa] ss:$8 sps:$4 sm:$0xff]   ;;  %v8888_v28 = vld [vmem:[#allocation3 + $0x1a] ss:$8 sps:$4 sm:$0xff]  }
 0x2e7   :  { %v8889_v30 = vld [vmem:[#allocation3 + $0x3a] ss:$8 sps:$4 sm:$0xff]   ;;  %v8890_v32 = vld [vmem:[#allocation3 + $0x4a] ss:$8 sps:$4 sm:$0xff]  }
 0x2e8   :  { %8307 = vmatmul.mubr.msk.f32.gmra.mrb[70].mxu0 %vm4573_vm10, %v8874_v1  ;;  %v8891_v10 = vld [vmem:[#allocation3 + $0x10] ss:$8 sps:$4 sm:$0xff]   ;;  %v8893_v35 = vld [vmem:[#allocation3 + $0x40] ss:$8 sps:$4 sm:$0xff]  }
 0x2e9   :  { %8313 = vmatprep.mubr.msk.f32.mxu0 %vm4573_vm10, %v8875_v2  ;;  %v8894_v36 = vld [vmem:[#allocation3 + $0x50] ss:$8 sps:$4 sm:$0xff]   ;;  %v8897_v39 = vld [vmem:[#allocation3 + $0x41] ss:$8 sps:$4 sm:$0xff]  }
 0x2ea   :  { %v8895_v37 = vld [vmem:[#allocation3 + $0x11] ss:$8 sps:$4 sm:$0xff]   ;;  %v8901_v43 = vld [vmem:[#allocation3 + $0x42] ss:$8 sps:$4 sm:$0xff]  }
 0x2eb   :  { %v8898_v40 = vld [vmem:[#allocation3 + $0x51] ss:$8 sps:$4 sm:$0xff]  }
 0x2ec   :  { %8314 = vmatmul.mubr.msk.f32.vlgmr.msra.gmra.mrb[68].mxu0 %vm4573_vm10, %v8876_v3  ;;  %v8899_v41 = vld [vmem:[#allocation3 + $0x12] ss:$8 sps:$4 sm:$0xff]  }
 0x2ed   :  { %8512 = vmatpush3.bf16.msra.mxu0 %v8509_v60  ;;  %8316 = vmatprep.mubr.msk.f32.mxu0 %vm4573_vm10, %v8877_v5  ;;  %v8902_v31 = vld [vmem:[#allocation3 + $0x52] ss:$8 sps:$4 sm:$0xff]  }
 0x2ee   :  { %8514 = vmatprep.subr.bf16.mxu0 %v8513_v4 }
 0x2f0   :  { %8317 = vmatmul.mubr.msk.f32.gmra.mrb[70].mxu0 %vm4573_vm10, %v8878_v8 }
 0x2f1   :  { %8323 = vmatprep.mubr.msk.f32.mxu0 %vm4573_vm10, %v8879_v11  ;;  %v7604_v11 = vld [vmem:[%s10358_s7 + $0x28] sm:$0xf] }
 0x2f4   :  { %8324 = vmatmul.mubr.msk.f32.vlgmr.msra.gmra.mrb[68].mxu0 %vm4573_vm10, %v8880_v12  ;;  %v7610_v12 = vld [vmem:[%s10358_s7 + $0x30] sm:$0xff] }
 0x2f5   :  { %8516 = vmatpush3.bf16.msra.mxu0 %v8513_v4  ;;  %8326 = vmatprep.mubr.msk.f32.mxu0 %vm4573_vm10, %v8881_v15  ;;  %v7611_v15 = vld [vmem:[%s10358_s7 + $0x38] sm:$0xff] }
 0x2f6   :  { %8518 = vmatprep.subr.bf16.mxu0 %v8517_v13  ;;  %v8541_v18 = vpack.c.bf16 %v7611_v15, %v7610_v12  ;;  %v7596_v12 = vld [vmem:[%s10359_s8] ss:$0 sm:$0xff]  ;;  %s8968_s8 = smov 8  }
 0x2f8   :  { %8327 = vmatmul.mubr.msk.f32.gmra.mrb[70].mxu0 %vm4573_vm10, %v8882_v16 }
 0x2f9   :  { %8333 = vmatprep.mubr.msk.f32.mxu0 %vm4573_vm10, %v8883_v17 }
 0x2fc   :  { %8334 = vmatmul.mubr.msk.f32.vlgmr.msra.gmra.mrb[68].mxu0 %vm4573_vm10, %v8884_v20  ;;  %v7612_v20 = vld [vmem:[%s10358_s7 + $0x40] sm:$0xf] }
 0x2fd   :  { %8520 = vmatpush3.bf16.msra.mxu0 %v8517_v13  ;;  %8336 = vmatprep.mubr.msk.f32.mxu0 %vm4573_vm10, %v8885_v23  ;;  %v7619_v23 = vld [vmem:[%s10358_s7 + $0x50] sm:$0xff] }
 0x2fe   :  { %8522 = vmatprep.subr.bf16.mxu0 %v8521_v22 }
 0x300   :  { %8337 = vmatmul.mubr.msk.f32.gmra.mrb[70].mxu0 %vm4573_vm10, %v8886_v24 }
 0x301   :  { %8343 = vmatprep.mubr.msk.f32.mxu0 %vm4573_vm10, %v8887_v25 }
 0x304   :  { %8344 = vmatmul.mubr.msk.f32.vlgmr.msra.gmra.mrb[68].mxu0 %vm4573_vm10, %v8888_v28 }
 0x305   :  { %8524 = vmatpush3.bf16.msra.mxu0 %v8521_v22  ;;  %8346 = vmatprep.mubr.msk.f32.mxu0 %vm4573_vm10, %v8889_v30  ;;  %v7618_v22 = vld [vmem:[%s10358_s7 + $0x48] sm:$0xff]  ;;  %v7626_v30 = vld [vmem:[%s10358_s7 + $0x60] sm:$0xff] }
 0x306   :  { %8526 = vmatprep.subr.bf16.mxu0 %v8525_v29  ;;  %v8545_v27 = vpack.c.bf16 %v7619_v23, %v7618_v22 }
 0x308   :  { %8347 = vmatmul.mubr.msk.f32.gmra.mrb[70].mxu0 %vm4573_vm10, %v8890_v32  ;;  %v7627_v32 = vld [vmem:[%s10358_s7 + $0x68] sm:$0xff] }
 0x309   :  { %8353 = vmatprep.mubr.msk.f32.mxu0 %vm4573_vm10, %v8891_v10 }
 0x30c   :  { %8354 = vmatmul.mubr.msk.f32.vlgmr.msra.gmra.mrb[68].mxu0 %vm4573_vm10, %v8892_v33  ;;  %v8549_v33 = vpack.c.bf16 %v7627_v32, %v7626_v30 }
 0x30d   :  { %8528 = vmatpush3.bf16.msra.mxu0 %v8525_v29  ;;  %8356 = vmatprep.mubr.msk.f32.mxu0 %vm4573_vm10, %v8893_v35  ;;  %v7620_v29 = vld [vmem:[%s10358_s7 + $0x58] sm:$0xf]  ;;  %v7628_v35 = vld [vmem:[%s10358_s7 + $0x70] sm:$0xf] }
 0x30e   :  { %8530 = vmatprep.subr.bf16.mxu0 %v8529_v34 }
 0x310   :  { %8357 = vmatmul.mubr.msk.f32.gmra.mrb[70].mxu0 %vm4573_vm10, %v8894_v36  ;;  %v7634_v36 = vld [vmem:[%s10358_s7 + $0x78] sm:$0xff] }
 0x311   :  { %8363 = vmatprep.mubr.msk.f32.mxu0 %vm4573_vm10, %v8895_v37  ;;  %v7635_v37 = vld [vmem:[%s10358_s7 + $0x80] sm:$0xff] }
 0x314   :  { %8364 = vmatmul.mubr.msk.f32.vlgmr.msra.gmra.mrb[68].mxu0 %vm4573_vm10, %v8896_v38 }
 0x315   :  { %8532 = vmatpush3.bf16.msra.mxu0 %v8529_v34  ;;  %8366 = vmatprep.mubr.msk.f32.mxu0 %vm4573_vm10, %v8897_v39 }
 0x318   :  { %8367 = vmatmul.mubr.msk.f32.gmra.mrb[70].mxu0 %vm4573_vm10, %v8898_v40 }
 0x319   :  { %8373 = vmatprep.mubr.msk.f32.mxu0 %vm4573_vm10, %v8899_v41  ;;  %v8553_v41 = vpack.c.bf16 %v7635_v37, %v7634_v36 }
 0x31c   :  { %8374 = vmatmul.mubr.msk.f32.vlgmr.msra.gmra.mrb[68].mxu0 %vm4573_vm10, %v8900_v42 }
 0x31d   :  { %8376 = vmatprep.mubr.msk.f32.mxu0 %vm4573_vm10, %v8901_v43 }
 0x320   :  { %8377 = vmatmul.mubr.msk.f32.gmra.mrb[70].mxu0 %vm4573_vm10, %v8902_v31  ;;  %v7636_v31 = vld [vmem:[%s10358_s7 + $0x88] sm:$0xf] }
 0x3ef   :  { %v8375_v21 = vpop.f32.mrb[68].mxu0 }
 0x3f0   :  { %v8577_v52 = vadd.f32 %v8375_v21, %v7543_v51  ;;  %v5609_v53 = vpop.f32.mrb[69].mxu0 }
 0x3f1   :  { %v8578_v54 = vadd.f32 %v7543_v51, %v5609_v53  ;;  %v7651_v53 = vld [vmem:[%s10358_s7 + $0xb0] sm:$0xff] }
 0x3f2   :  { %vm5633_vm14 = vcmp.gt.f32.partialorder %v8577_v52, 0.0  ;;  %v5637_v55 = vmul.f32 0.05, %v8577_v52 }
 0x3f3   :  { %vm5632_vm0 = vcmp.gt.f32.partialorder %v8578_v54, 0.0  ;;  %v5636_v56 = vmul.f32 0.05, %v8578_v54  ;;  %v8378_v57 = vpop.f32.mrb[70].mxu0 }
 0x3f4   :  { %v5641_v58 = vsel %vm5633_vm14, %v8577_v52, %v5637_v55  ;;  %v8579_v59 = vadd.f32 %v8378_v57, %v7543_v51  ;;  %v5619_v60 = vpop.f32.mrb[71].mxu0  ;;  %v7650_v52 = vld [vmem:[%s10358_s7 + $0xa8] sm:$0xff]  ;;  %vm7282_vm14 = vcmask 293888  }
 0x3f5   :  { %v5680_v61 = vcombine.high %v5641_v58, %v5641_v58  ;;  %5691 = vst.msk [vmem:[#allocation4 + $0x19] sm:$0xf] %vm5688_vm15, %v5641_v58  ;;  %v5640_v63 = vsel %vm5632_vm0, %v8578_v54, %v5636_v56  ;;  %v8580_v0 = vadd.f32 %v7543_v51, %v5619_v60  ;;  %v7644_v51 = vld [vmem:[%s10358_s7 + $0xa0] sm:$0xf]  ;;  %v8561_v55 = vpack.c.bf16 %v7651_v53, %v7650_v52  ;;  %v7652_v58 = vld [vmem:[%s10358_s7 + $0xb8] sm:$0xf] }
 0x3f6   :  { %v5679_v1 = vcombine.high %v5640_v63, %v5640_v63  ;;  %5689 = vst.msk [vmem:[#allocation4 + $0x9] sm:$0xf] %vm5688_vm15, %v5640_v63  ;;  %vm5635_vm1 = vcmp.gt.f32.partialorder %v8579_v59, 0.0  ;;  %v5639_v2 = vmul.f32 0.05, %v8579_v59  ;;  %v7658_v60 = vld [vmem:[%s10358_s7 + $0xc0] sm:$0xff] }
 0x3f7   :  { %5692 = vst.msk [vmem:[#allocation4 + $0x21] sm:$0xf] %vm5688_vm15, %v5680_v61  ;;  %vm5634_vm8 = vcmp.gt.f32.partialorder %v8580_v0, 0.0  ;;  %v5638_v3 = vmul.f32 0.05, %v8580_v0  ;;  %v7659_v61 = vld [vmem:[%s10358_s7 + $0xc8] sm:$0xff] }
 0x3f8   :  { %5690 = vst.msk [vmem:[#allocation4 + $0x11] sm:$0xf] %vm5688_vm15, %v5679_v1  ;;  %v5643_v4 = vsel %vm5635_vm1, %v8579_v59, %v5639_v2  ;;  %vm7288_vm0 = vcmask 392192   ;;  %vm7290_vm1 = vcmask 424960  }
 0x3f9   :  { %v5682_v5 = vcombine.high %v5643_v4, %v5643_v4  ;;  %5695 = vst.msk [vmem:[#allocation4 + $0x49] sm:$0xf] %vm5688_vm15, %v5643_v4  ;;  %v5642_v6 = vsel %vm5634_vm8, %v8580_v0, %v5638_v3  ;;  %v8565_v0 = vpack.c.bf16 %v7659_v61, %v7658_v60  ;;  %v7660_v4 = vld [vmem:[%s10358_s7 + $0xd0] sm:$0xf]  ;;  %vm7294_vm8 = vcmask 490496  }
 0x3fa   :  { %v5681_v7 = vcombine.high %v5642_v6, %v5642_v6  ;;  %5693 = vst.msk [vmem:[#allocation4 + $0x39] sm:$0xf] %vm5688_vm15, %v5642_v6 }
 0x3fb   :  { %5696 = vst.msk [vmem:[#allocation4 + $0x51] sm:$0xf] %vm5688_vm15, %v5682_v5 }
 0x3fc   :  { %5694 = vst.msk [vmem:[#allocation4 + $0x41] sm:$0xf] %vm5688_vm15, %v5681_v7  ;;  %vm7286_vm15 = vcmask 359424  }
 0x3fd   :  { %v8903_v8 = vld [vmem:[#allocation4] ss:$8 sps:$4 sm:$0xff]  }
 0x3fe   :  { %8385 = vmatprep.mubr.msk.f32.mxu1 %vm5727_vm2, %v8903_v8  ;;  %v8907_v19 = vld [vmem:[#allocation4 + $0x1] ss:$8 sps:$4 sm:$0xff]  }
 0x3ff   :  { %v8904_v13 = vld [vmem:[#allocation4 + $0x10] ss:$8 sps:$4 sm:$0xff]   ;;  %v8911_v28 = vld [vmem:[#allocation4 + $0x2] ss:$8 sps:$4 sm:$0xff]  }
 0x400   :  { %8386 = vmatmul.mubr.msk.f32.vlgmr.msra.gmra.mrb[4].mxu1 %vm5727_vm2, %v8904_v13  ;;  %v8908_v24 = vld [vmem:[#allocation4 + $0x11] ss:$8 sps:$4 sm:$0xff]   ;;  %v8928_v57 = vld [vmem:[#allocation4 + $0x20] ss:$8 sps:$4 sm:$0xff]   ;;  %v6869_v13 = vlaneseq }
 0x401   :  { %v8905_v16 = vld [vmem:[#allocation4 + $0x30] ss:$8 sps:$4 sm:$0xff]   ;;  %8540 = vmatpush3.bf16.msra.mxu1 %v8537_v50  ;;  %v8932_v2 = vld [vmem:[#allocation4 + $0x21] ss:$8 sps:$4 sm:$0xff]  }
 0x402   :  { %8388 = vmatprep.mubr.msk.f32.mxu1 %vm5727_vm2, %v8905_v16  ;;  %8395 = vmatprep.subr.msk.mxu1 %vm1452_vm6, %v7604_v11  ;;  %v8909_v25 = vld [vmem:[#allocation4 + $0x31] ss:$8 sps:$4 sm:$0xff]   ;;  %v8936_v7 = vld [vmem:[#allocation4 + $0x22] ss:$8 sps:$4 sm:$0xff]  }
 0x403   :  { %v8906_v17 = vld [vmem:[#allocation4 + $0x40] ss:$8 sps:$4 sm:$0xff]   ;;  %v8912_v10 = vld [vmem:[#allocation4 + $0x12] ss:$8 sps:$4 sm:$0xff]  }
 0x404   :  { %8389 = vmatmul.mubr.msk.f32.gmra.mrb[6].mxu1 %vm5727_vm2, %v8906_v17  ;;  %v8910_v26 = vld [vmem:[#allocation4 + $0x41] ss:$8 sps:$4 sm:$0xff]   ;;  %v8913_v9 = vld [vmem:[#allocation4 + $0x32] ss:$8 sps:$4 sm:$0xff]  }
 0x405   :  { %8396 = vmatpush3.msk.msra.mxu1 %vm1452_vm6, %v7604_v11  ;;  %8397 = vmatprep.mubr.msk.f32.mxu1 %vm5727_vm2, %v8907_v19  ;;  %v8914_v14 = vld [vmem:[#allocation4 + $0x42] ss:$8 sps:$4 sm:$0xff]   ;;  %v8927_v56 = vld [vmem:[#allocation4 + $0x10] ss:$8 sps:$4 sm:$0xff]   ;;  %v10268_v19 = vshrl.u32 %v6869_v13, 7 }
 0x406   :  { %8542 = vmatprep.subr.bf16.mxu1 %v8541_v18  ;;  %v8915_v34 = vld [vmem:[#allocation4 + $0x8] ss:$8 sps:$4 sm:$0xff]   ;;  %v8916_v38 = vld [vmem:[#allocation4 + $0x18] ss:$8 sps:$4 sm:$0xff]  }
 0x407   :  { %v8917_v39 = vld [vmem:[#allocation4 + $0x38] ss:$8 sps:$4 sm:$0xff]   ;;  %v8918_v40 = vld [vmem:[#allocation4 + $0x48] ss:$8 sps:$4 sm:$0xff]   ;;  %v6871_v30 = vsub.s32 0, %v10268_v19 }
 0x408   :  { %8398 = vmatmul.mubr.msk.f32.vlgmr.msra.gmra.mrb[4].mxu1 %vm5727_vm2, %v8908_v24  ;;  %v8919_v42 = vld [vmem:[#allocation4 + $0x9] ss:$8 sps:$4 sm:$0xff]   ;;  %v8920_v43 = vld [vmem:[#allocation4 + $0x19] ss:$8 sps:$4 sm:$0xff]  }
 0x409   :  { %8544 = vmatpush3.bf16.msra.mxu1 %v8541_v18  ;;  %8400 = vmatprep.mubr.msk.f32.mxu1 %vm5727_vm2, %v8909_v25  ;;  %v8921_v44 = vld [vmem:[#allocation4 + $0x39] ss:$8 sps:$4 sm:$0xff]   ;;  %v8922_v47 = vld [vmem:[#allocation4 + $0x49] ss:$8 sps:$4 sm:$0xff]  }
 0x40a   :  { %8407 = vmatprep.subr.msk.mxu1 %vm1452_vm6, %v7612_v20  ;;  %v8923_v49 = vld [vmem:[#allocation4 + $0xa] ss:$8 sps:$4 sm:$0xff]   ;;  %v8924_v50 = vld [vmem:[#allocation4 + $0x1a] ss:$8 sps:$4 sm:$0xff]  }
 0x40b   :  { %v8925_v21 = vld [vmem:[#allocation4 + $0x3a] ss:$8 sps:$4 sm:$0xff]   ;;  %v8926_v54 = vld [vmem:[#allocation4 + $0x4a] ss:$8 sps:$4 sm:$0xff]  }
 0x40c   :  { %8401 = vmatmul.mubr.msk.f32.gmra.mrb[6].mxu1 %vm5727_vm2, %v8910_v26  ;;  %v8929_v59 = vld [vmem:[#allocation4 + $0x40] ss:$8 sps:$4 sm:$0xff]   ;;  %v8930_v63 = vld [vmem:[#allocation4 + $0x50] ss:$8 sps:$4 sm:$0xff]  }
 0x40d   :  { %8408 = vmatpush3.msk.msra.mxu1 %vm1452_vm6, %v7612_v20  ;;  %8409 = vmatprep.mubr.msk.f32.mxu1 %vm5727_vm2, %v8911_v28  ;;  %v8931_v1 = vld [vmem:[#allocation4 + $0x11] ss:$8 sps:$4 sm:$0xff]   ;;  %v8933_v3 = vld [vmem:[#allocation4 + $0x41] ss:$8 sps:$4 sm:$0xff]  }
 0x40e   :  { %8546 = vmatprep.subr.bf16.mxu1 %v8545_v27  ;;  %v8934_v5 = vld [vmem:[#allocation4 + $0x51] ss:$8 sps:$4 sm:$0xff]   ;;  %v8937_v8 = vld [vmem:[#allocation4 + $0x42] ss:$8 sps:$4 sm:$0xff]  }
 0x40f   :  { %v8935_v6 = vld [vmem:[#allocation4 + $0x12] ss:$8 sps:$4 sm:$0xff]  }
 0x410   :  { %8410 = vmatmul.mubr.msk.f32.vlgmr.msra.gmra.mrb[4].mxu1 %vm5727_vm2, %v8912_v10  ;;  %v8938_v11 = vld [vmem:[#allocation4 + $0x52] ss:$8 sps:$4 sm:$0xff]  }
 0x411   :  { %8548 = vmatpush3.bf16.msra.mxu1 %v8545_v27  ;;  %8412 = vmatprep.mubr.msk.f32.mxu1 %vm5727_vm2, %v8913_v9 }
 0x412   :  { %8419 = vmatprep.subr.msk.mxu1 %vm1452_vm6, %v7620_v29 }
 0x414   :  { %8413 = vmatmul.mubr.msk.f32.gmra.mrb[6].mxu1 %vm5727_vm2, %v8914_v14 }
 0x415   :  { %8420 = vmatpush3.msk.msra.mxu1 %vm1452_vm6, %v7620_v29  ;;  %8421 = vmatprep.mubr.msk.f32.mxu1 %vm5727_vm2, %v8915_v34 }
 0x416   :  { %8550 = vmatprep.subr.bf16.mxu1 %v8549_v33 }
 0x418   :  { %8422 = vmatmul.mubr.msk.f32.vlgmr.msra.gmra.mrb[4].mxu1 %vm5727_vm2, %v8916_v38 }
 0x419   :  { %8552 = vmatpush3.bf16.msra.mxu1 %v8549_v33  ;;  %8424 = vmatprep.mubr.msk.f32.mxu1 %vm5727_vm2, %v8917_v39 }
 0x41a   :  { %8431 = vmatprep.subr.msk.mxu1 %vm1452_vm6, %v7628_v35 }
 0x41c   :  { %8425 = vmatmul.mubr.msk.f32.gmra.mrb[6].mxu1 %vm5727_vm2, %v8918_v40 }
 0x41d   :  { %8432 = vmatpush3.msk.msra.mxu1 %vm1452_vm6, %v7628_v35  ;;  %8433 = vmatprep.mubr.msk.f32.mxu1 %vm5727_vm2, %v8919_v42  ;;  %v6901_v35 = vsub.s32 2, %v10268_v19 }
 0x41e   :  { %8554 = vmatprep.subr.bf16.mxu1 %v8553_v41 }
 0x420   :  { %8434 = vmatmul.mubr.msk.f32.vlgmr.msra.gmra.mrb[4].mxu1 %vm5727_vm2, %v8920_v43 }
 0x421   :  { %8556 = vmatpush3.bf16.msra.mxu1 %v8553_v41  ;;  %8436 = vmatprep.mubr.msk.f32.mxu1 %vm5727_vm2, %v8921_v44 }
 0x422   :  { %8443 = vmatprep.subr.msk.mxu1 %vm1452_vm6, %v7636_v31 }
 0x424   :  { %8437 = vmatmul.mubr.msk.f32.gmra.mrb[6].mxu1 %vm5727_vm2, %v8922_v47 }
 0x425   :  { %8444 = vmatpush3.msk.msra.mxu1 %vm1452_vm6, %v7636_v31  ;;  %8445 = vmatprep.mubr.msk.f32.mxu1 %vm5727_vm2, %v8923_v49 }
 0x426   :  { %8558 = vmatprep.subr.bf16.mxu1 %v8557_v48 }
 0x428   :  { %8446 = vmatmul.mubr.msk.f32.vlgmr.msra.gmra.mrb[4].mxu1 %vm5727_vm2, %v8924_v50 }
 0x429   :  { %8560 = vmatpush3.bf16.msra.mxu1 %v8557_v48  ;;  %8448 = vmatprep.mubr.msk.f32.mxu1 %vm5727_vm2, %v8925_v21 }
 0x42a   :  { %8455 = vmatprep.subr.msk.mxu1 %vm1452_vm6, %v7644_v51 }
 0x42c   :  { %8449 = vmatmul.mubr.msk.f32.gmra.mrb[6].mxu1 %vm5727_vm2, %v8926_v54 }
 0x42d   :  { %8456 = vmatpush3.msk.msra.mxu1 %vm1452_vm6, %v7644_v51  ;;  %8457 = vmatprep.mubr.msk.f32.mxu1 %vm5727_vm2, %v8927_v56 }
 0x42e   :  { %8562 = vmatprep.subr.bf16.mxu1 %v8561_v55 }
 0x430   :  { %8458 = vmatmul.mubr.msk.f32.vlgmr.msra.gmra.mrb[4].mxu1 %vm5727_vm2, %v8928_v57 }
 0x431   :  { %8564 = vmatpush3.bf16.msra.mxu1 %v8561_v55  ;;  %8460 = vmatprep.mubr.msk.f32.mxu1 %vm5727_vm2, %v8929_v59 }
 0x432   :  { %8467 = vmatprep.subr.msk.mxu1 %vm1452_vm6, %v7652_v58 }
 0x434   :  { %8461 = vmatmul.mubr.msk.f32.gmra.mrb[6].mxu1 %vm5727_vm2, %v8930_v63 }
 0x435   :  { %8468 = vmatpush3.msk.msra.mxu1 %vm1452_vm6, %v7652_v58  ;;  %8469 = vmatprep.mubr.msk.f32.mxu1 %vm5727_vm2, %v8931_v1  ;;  %v8966_v1 = vmov 1983009808  }
 0x436   :  { %8566 = vmatprep.subr.bf16.mxu1 %v8565_v0 }
 0x438   :  { %8470 = vmatmul.mubr.msk.f32.vlgmr.msra.gmra.mrb[4].mxu1 %vm5727_vm2, %v8932_v2  ;;  %v7012_v2 = vunpack.c.l.s4 %v8966_v1 }
 0x439   :  { %8568 = vmatpush3.bf16.msra.mxu1 %v8565_v0  ;;  %8472 = vmatprep.mubr.msk.f32.mxu1 %vm5727_vm2, %v8933_v3 }
 0x43a   :  { %8479 = vmatprep.subr.msk.mxu1 %vm1452_vm6, %v7660_v4 }
 0x43c   :  { %8473 = vmatmul.mubr.msk.f32.gmra.mrb[6].mxu1 %vm5727_vm2, %v8934_v5 }
 0x43d   :  { %8480 = vmatpush3.msk.msra.mxu1 %vm1452_vm6, %v7660_v4  ;;  %8481 = vmatprep.mubr.msk.f32.mxu1 %vm5727_vm2, %v8935_v6  ;;  %vm6989_vm6 = vcmask 7168   ;;  %v7013_v6 = vunpack.c.0.s8 %v7012_v2 }
 0x440   :  { %8482 = vmatmul.mubr.msk.f32.vlgmr.msra.gmra.mrb[4].mxu1 %vm5727_vm2, %v8936_v7  ;;  %v8967_v7 = vmov 1934713408  }
 0x441   :  { %8484 = vmatprep.mubr.msk.f32.mxu1 %vm5727_vm2, %v8937_v8  ;;  %v7043_v8 = vunpack.c.l.s4 %v8967_v7 }
 0x444   :  { %8485 = vmatmul.mubr.msk.f32.gmra.mrb[6].mxu1 %vm5727_vm2, %v8938_v11 }
 0x513   :  { %v8483_v15 = vpop.f32.mrb[4].mxu1 }
 0x514   :  { %v8581_v16 = vadd.f32 %v8483_v15, %v7596_v12  ;;  %v6798_v17 = vpop.f32.mrb[5].mxu1  ;;  %v10275_v15 = vsub.s32 %v7013_v6, %v10268_v19 }
 0x515   :  { %v8582_v18 = vadd.f32 %v7596_v12, %v6798_v17 }
 0x516   :  { %v6826_v20 = vcombine.high %v8581_v16, %v8581_v16  ;;  %v7670_v22 = vrot.slane %v8581_v16, 9 }
 0x517   :  { %v6825_v23 = vcombine.high %v8582_v18, %v8582_v18  ;;  %v7666_v24 = vrot.slane %v8582_v18, 9  ;;  %v8486_v25 = vpop.f32.mrb[6].mxu1 }
 0x518   :  { %v7672_v26 = vrot.slane %v6826_v20, 9  ;;  %v8583_v27 = vadd.f32 %v8486_v25, %v7596_v12  ;;  %v6808_v28 = vpop.f32.mrb[7].mxu1  ;;  %v6857_v32 = vmax.f32 %v8581_v16, %v7670_v22  ;;  %v7044_v16 = vunpack.c.0.s8 %v7043_v8 }
 0x519   :  { %v7668_v29 = vrot.slane %v6825_v23, 9  ;;  %v6839_v33 = vmax.f32 %v8582_v18, %v7666_v24  ;;  %v8584_v31 = vadd.f32 %v7596_v12, %v6808_v28 }
 0x51a   :  { %v6865_v10 = vmax.f32 %v6826_v20, %v7672_v26  ;;  %v6828_v9 = vcombine.high %v8583_v27, %v8583_v27  ;;  %v7671_v14 = vrot.slane %v8583_v27, 9  ;;  %v10282_v25 = vsub.s32 %v7044_v16, %v10268_v19 }
 0x51b   :  { %v6847_v34 = vmax.f32 %v6825_v23, %v7668_v29  ;;  %v6827_v46 = vcombine.high %v8584_v31, %v8584_v31  ;;  %v7667_v50 = vrot.slane %v8584_v31, 9 }
 0x51c   :  { %v7673_v36 = vrot.slane %v6828_v9, 9  ;;  %v6867_v37 = vmax.f32 %v6857_v32, %v6865_v10  ;;  %v6858_v39 = vmax.f32 %v8583_v27, %v7671_v14 }
 0x51d   :  { %v6849_v38 = vmax.f32 %v6839_v33, %v6847_v34  ;;  %v7669_v48 = vrot.slane %v6827_v46, 9  ;;  %v6840_v21 = vmax.f32 %v8584_v31, %v7667_v50 }
 0x51e   :  { %v6866_v40 = vmax.f32 %v6828_v9, %v7673_v36  ;;  %v6932_v41 = vrot.slane %v6867_v37, %v6871_v30  ;;  %v6962_v44 = vrot.slane %v6867_v37, %v6901_v35 }
 0x51f   :  { %v6902_v42 = vrot.slane %v6849_v38, %v6901_v35  ;;  %v6872_v49 = vrot.slane %v6849_v38, %v6871_v30  ;;  %v6848_v51 = vmax.f32 %v6827_v46, %v7669_v48 }
 0x520   :  { %6934 = vbcast.lane.b32.xlu0 %v6932_v41, 256  ;;  %v6868_v43 = vmax.f32 %v6858_v39, %v6866_v40 }
 0x521   :  { %6904 = vbcast.lane.b32.xlu1 %v6902_v42, 256  ;;  %v6850_v52 = vmax.f32 %v6840_v21, %v6848_v51 }
 0x522   :  { %v6947_v45 = vrot.slane %v6868_v43, %v6871_v30  ;;  %v6977_v47 = vrot.slane %v6868_v43, %v6901_v35 }
 0x523   :  { %v6887_v53 = vrot.slane %v6850_v52, %v6871_v30  ;;  %v6917_v54 = vrot.slane %v6850_v52, %v6901_v35 }
 0x524   :  { %6964 = vbcast.lane.b32.xlu0 %v6962_v44, 256 }
 0x525   :  { %6949 = vbcast.lane.b32.xlu1 %v6947_v45, 256 }
 0x528   :  { %6938 = vbcast.lane.b32.xlu0 %v6932_v41, 264 }
 0x529   :  { %6979 = vbcast.lane.b32.xlu1 %v6977_v47, 256 }
 0x52c   :  { %6874 = vbcast.lane.b32.xlu0 %v6872_v49, 256 }
 0x52d   :  { %6953 = vbcast.lane.b32.xlu1 %v6947_v45, 264 }
 0x530   :  { %6878 = vbcast.lane.b32.xlu0 %v6872_v49, 264 }
 0x531   :  { %6983 = vbcast.lane.b32.xlu1 %v6977_v47, 264 }
 0x534   :  { %6908 = vbcast.lane.b32.xlu0 %v6902_v42, 264 }
 0x535   :  { %6957 = vbcast.lane.b32.xlu1 %v6947_v45, 272 }
 0x538   :  { %6889 = vbcast.lane.b32.xlu0 %v6887_v53, 256 }
 0x539   :  { %6919 = vbcast.lane.b32.xlu1 %v6917_v54, 256 }
 0x53c   :  { %6968 = vbcast.lane.b32.xlu0 %v6962_v44, 264 }
 0x53d   :  { %6893 = vbcast.lane.b32.xlu1 %v6887_v53, 264 }
 0x540   :  { %6882 = vbcast.lane.b32.xlu0 %v6872_v49, 272 }
 0x541   :  { %6923 = vbcast.lane.b32.xlu1 %v6917_v54, 264 }
 0x544   :  { %6912 = vbcast.lane.b32.xlu0 %v6902_v42, 272 }
 0x545   :  { %6897 = vbcast.lane.b32.xlu1 %v6887_v53, 272 }
 0x548   :  { %6942 = vbcast.lane.b32.xlu0 %v6932_v41, 272 }
 0x549   :  { %6927 = vbcast.lane.b32.xlu1 %v6917_v54, 272 }
 0x54c   :  { %6972 = vbcast.lane.b32.xlu0 %v6962_v44, 272 }
 0x54d   :  { %6987 = vbcast.lane.b32.xlu1 %v6977_v47, 272 }
 0x592   :  { %v6935_v55 = vpop.permute.xlu0 %6934 }
 0x593   :  { %v6905_v56 = vpop.permute.xlu1 %6904 }
 0x596   :  { %v6965_v57 = vpop.permute.xlu0 %6964 }
 0x597   :  { %v6950_v58 = vpop.permute.xlu1 %6949 }
 0x59a   :  { %v6939_v59 = vpop.permute.xlu0 %6938 }
 0x59b   :  { %v6980_v60 = vpop.permute.xlu1 %6979 }
 0x59e   :  { %v6875_v61 = vpop.permute.xlu0 %6874 }
 0x59f   :  { %v6954_v63 = vpop.permute.xlu1 %6953  ;;  %v6990_v4 = vsel %vm6989_vm6, %v6875_v61, %v6905_v56 }
 0x5a0   :  { %v6997_v12 = vsel %vm6996_vm3, %v6990_v4, %v6935_v55 }
 0x5a1   :  { %v7004_v18 = vsel %vm7003_vm4, %v6997_v12, %v6965_v57 }
 0x5a2   :  { %v6879_v0 = vpop.permute.xlu0 %6878  ;;  %v7017_v26 = vrot.slane %v7004_v18, %v10275_v15  ;;  %v7010_v50 = vcombine.high %v7004_v18, %v8965_v62 }
 0x5a3   :  { %v6984_v3 = vpop.permute.xlu1 %6983 }
 0x5a6   :  { %v6909_v5 = vpop.permute.xlu0 %6908 }
 0x5a7   :  { %v6958_v11 = vpop.permute.xlu1 %6957  ;;  %v6991_v29 = vsel %vm6989_vm6, %v6879_v0, %v6909_v5  ;;  %v7024_v0 = vrot.slane %v7010_v50, %v10275_v15 }
 0x5a8   :  { %v6998_v9 = vsel %vm6996_vm3, %v6991_v29, %v6939_v59 }
 0x5aa   :  { %v6890_v13 = vpop.permute.xlu0 %6889 }
 0x5ab   :  { %v6920_v17 = vpop.permute.xlu1 %6919 }
 0x5ac   :  { %v6993_v20 = vsel %vm6989_vm6, %v6890_v13, %v6920_v17 }
 0x5ad   :  { %v7000_v22 = vsel %vm6996_vm3, %v6993_v20, %v6950_v58 }
 0x5ae   :  { %v7007_v23 = vsel %vm7003_vm4, %v7000_v22, %v6980_v60  ;;  %v6969_v24 = vpop.permute.xlu0 %6968 }
 0x5af   :  { %v7032_v27 = vrot.slane %v7007_v23, %v10275_v15  ;;  %v6894_v28 = vpop.permute.xlu1 %6893  ;;  %v7005_v19 = vsel %vm7003_vm4, %v6998_v9, %v6969_v24  ;;  %v7025_v46 = vcombine.high %v7007_v23, %v8965_v62 }
 0x5b0   :  { %v7083_v40 = vrot.slane %v7005_v19, %v10275_v15  ;;  %v7076_v4 = vcombine.high %v7005_v19, %v8965_v62 }
 0x5b1   :  { %v7041_v30 = vcombine.high %v7017_v26, %v7032_v27  ;;  %v7040_v32 = vcombine.low %v7017_v26, %v7032_v27  ;;  %v7039_v58 = vrot.slane %v7025_v46, %v10275_v15 }
 0x5b2   :  { %v6883_v10 = vpop.permute.xlu0 %6882  ;;  %v7090_v12 = vrot.slane %v7076_v4, %v10275_v15 }
 0x5b3   :  { %v6924_v14 = vpop.permute.xlu1 %6923  ;;  %v7055_v33 = vrot.slane %v7041_v30, %v10282_v25  ;;  %v10290_v34 = vrot.slane %v7040_v32, %v10282_v25  ;;  %v7057_v8 = vcombine.high %v7024_v0, %v7039_v58 }
 0x5b4   :  { %v6994_v35 = vsel %vm6989_vm6, %v6894_v28, %v6924_v14 }
 0x5b5   :  { %v7001_v36 = vsel %vm6996_vm3, %v6994_v35, %v6954_v63  ;;  %7190 = vrot.lane.b32.xlu1 %v7055_v33, %s8968_s8  ;;  %v7072_v37 = vcombine.high %v10290_v34, %v8965_v62  ;;  %v7073_v43 = vcombine.high %v7055_v33, %v8965_v62  ;;  %v7071_v16 = vrot.slane %v7057_v8, %v10282_v25 }
 0x5b6   :  { %v7008_v38 = vsel %vm7003_vm4, %v7001_v36, %v6984_v3  ;;  %v6913_v39 = vpop.permute.xlu0 %6912  ;;  %v7056_v3 = vcombine.low %v7024_v0, %v7039_v58 }
 0x5b7   :  { %v7098_v41 = vrot.slane %v7008_v38, %v10275_v15  ;;  %v6898_v42 = vpop.permute.xlu1 %6897  ;;  %7186 = vrot.lane.b32.xlu0 %v7072_v37, %s8969_s2  ;;  %v6992_v51 = vsel %vm6989_vm6, %v6883_v10, %v6913_v39  ;;  %v7091_v1 = vcombine.high %v7008_v38, %v8965_v62  ;;  %v7075_v18 = vcombine.high %v7071_v16, %v8965_v62 }
 0x5b8   :  { %v7064_v7 = vrot.slane %v7056_v3, %v10282_v25 }
 0x5b9   :  { %v7106_v31 = vcombine.low %v7083_v40, %v7098_v41  ;;  %v7107_v44 = vcombine.high %v7083_v40, %v7098_v41 }
 0x5ba   :  { %v6943_v45 = vpop.permute.xlu0 %6942  ;;  %v7074_v13 = vcombine.high %v7064_v7, %v8965_v62 }
 0x5bb   :  { %v6928_v47 = vpop.permute.xlu1 %6927  ;;  %7194 = vrot.lane.b32.xlu0 %v7073_v43, %s8970_s27  ;;  %v7114_v48 = vrot.slane %v7106_v31, %v10282_v25  ;;  %v7121_v52 = vrot.slane %v7107_v44, %v10282_v25  ;;  %v6999_v53 = vsel %vm6996_vm3, %v6992_v51, %v6943_v45 }
 0x5bc   :  { %v6995_v49 = vsel %vm6989_vm6, %v6898_v42, %v6928_v47  ;;  %vm7298_vm6 = vcmask 556032  }
 0x5bd   :  { %7214 = vrot.lane.b32.xlu1 %v7114_v48, %s8971_s28  ;;  %v7138_v21 = vcombine.high %v7114_v48, %v8965_v62  ;;  %v7002_v56 = vsel %vm6996_vm3, %v6995_v49, %v6958_v11  ;;  %v7139_v63 = vcombine.high %v7121_v52, %v8965_v62  ;;  %v7105_v11 = vrot.slane %v7091_v1, %v10275_v15 }
 0x5be   :  { %v6973_v54 = vpop.permute.xlu0 %6972  ;;  %vm7300_vm3 = vcmask 588800  }
 0x5bf   :  { %v7006_v55 = vsel %vm7003_vm4, %v6999_v53, %v6973_v54  ;;  %v6988_v57 = vpop.permute.xlu1 %6987  ;;  %7218 = vrot.lane.b32.xlu0 %v7138_v21, %s8972_s29  ;;  %v7122_v17 = vcombine.low %v7090_v12, %v7105_v11  ;;  %v7123_v22 = vcombine.high %v7090_v12, %v7105_v11 }
 0x5c0   :  { %v7148_v59 = vrot.slane %v7006_v55, %v10275_v15  ;;  %v7009_v60 = vsel %vm7003_vm4, %v7002_v56, %v6988_v57  ;;  %vm7302_vm4 = vcmask 621568  }
 0x5c1   :  { %v7156_v61 = vrot.slane %v7009_v60, %v10275_v15  ;;  %7222 = vrot.lane.b32.xlu1 %v7121_v52, %s8973_s30  ;;  %v7130_v20 = vrot.slane %v7122_v17, %v10282_v25  ;;  %v7137_v24 = vrot.slane %v7123_v22, %v10282_v25  ;;  %v7674_v26 = vcombine.high %v7006_v55, %v7009_v60 }
 0x5c3   :  { %v7158_v2 = vcombine.low %v7148_v59, %v7156_v61  ;;  %7226 = vrot.lane.b32.xlu0 %v7139_v63, %s8974_s10  ;;  %v7159_v15 = vcombine.high %v7148_v59, %v7156_v61  ;;  %v7140_v23 = vcombine.high %v7130_v20, %v8965_v62  ;;  %v7141_v27 = vcombine.high %v7137_v24, %v8965_v62 }
 0x5c4   :  { %v7181_v30 = vrot.slane %v7674_v26, %v10282_v25 }
 0x5c5   :  { %v7166_v5 = vrot.slane %v7158_v2, %v10282_v25  ;;  %v7173_v28 = vrot.slane %v7159_v15, %v10282_v25 }
 0x5c6   :  { %v7184_v32 = vcombine.high %v7181_v30, %v8965_v62 }
 0x5c7   :  { %7246 = vrot.lane.b32.xlu1 %v7166_v5, %s8975_s11  ;;  %v7182_v6 = vcombine.high %v7166_v5, %v8965_v62  ;;  %v7183_v29 = vcombine.high %v7173_v28, %v8965_v62 }
 0x5c9   :  { %7250 = vrot.lane.b32.xlu0 %v7182_v6, %s8976_s12 }
 0x5cb   :  { %7198 = vrot.lane.b32.xlu1 %v7064_v7, %s8977_s0 }
 0x5cd   :  { %7202 = vrot.lane.b32.xlu0 %v7074_v13, %s8978_s13 }
 0x5cf   :  { %7206 = vrot.lane.b32.xlu1 %v7071_v16, %s8979_s14 }
 0x5d1   :  { %7210 = vrot.lane.b32.xlu0 %v7075_v18, %s8980_s6 }
 0x5d3   :  { %7230 = vrot.lane.b32.xlu1 %v7130_v20, %s8981_s15 }
 0x5d5   :  { %7234 = vrot.lane.b32.xlu0 %v7140_v23, %s8982_s16 }
 0x5d7   :  { %7238 = vrot.lane.b32.xlu1 %v7137_v24, %s8983_s17 }
 0x5d9   :  { %7242 = vrot.lane.b32.xlu0 %v7141_v27, %s8984_s3 }
 0x5db   :  { %7254 = vrot.lane.b32.xlu1 %v7173_v28, %s8985_s18 }
 0x5dd   :  { %7258 = vrot.lane.b32.xlu0 %v7183_v29, %s8986_s19 }
 0x5df   :  { %7262 = vrot.lane.b32.xlu1 %v7181_v30, %s8987_s20 }
 0x5e1   :  { %7266 = vrot.lane.b32.xlu0 %v7184_v32, %s8988_s21 }
 0x627   :  { %v7191_v9 = vpop.permute.xlu1 %7190 }
 0x629   :  { %v7187_v10 = vpop.permute.xlu0 %7186 }
 0x62a   :  { %v7269_v37 = vsel %vm1443_vm12, %v10290_v34, %v7187_v10  ;;  %vm7284_vm12 = vcmask 326656  }
 0x62b   :  { %v7271_v39 = vsel %vm7270_vm5, %v7269_v37, %v7191_v9  ;;  %vm7304_vm5 = vcmask 654336  }
 0x62d   :  { %v7195_v14 = vpop.permute.xlu0 %7194 }
 0x62e   :  { %v7273_v40 = vsel %vm7272_vm7, %v7271_v39, %v7195_v14  ;;  %vm7306_vm7 = vcmask 687104  }
 0x62f   :  { %v7215_v33 = vpop.permute.xlu1 %7214 }
 0x631   :  { %v7219_v19 = vpop.permute.xlu0 %7218 }
 0x633   :  { %v7223_v35 = vpop.permute.xlu1 %7222 }
 0x635   :  { %v7227_v36 = vpop.permute.xlu0 %7226 }
 0x639   :  { %v7247_v25 = vpop.permute.xlu1 %7246 }
 0x63b   :  { %v7251_v38 = vpop.permute.xlu0 %7250 }
 0x63d   :  { %v7199_v41 = vpop.permute.xlu1 %7198 }
 0x63e   :  { %v7274_v62 = vsel %vm4573_vm10, %v7273_v40, %v7199_v41  ;;  %vm7292_vm10 = vcmask 457728  }
 0x63f   :  { %v7203_v42 = vpop.permute.xlu0 %7202 }
 0x640   :  { %v7275_v43 = vsel %vm5727_vm2, %v7274_v62, %v7203_v42  ;;  %vm7296_vm2 = vcmask 523264  }
 0x641   :  { %v7207_v31 = vpop.permute.xlu1 %7206 }
 0x642   :  { %v7277_v44 = vsel %vm7276_vm9, %v7275_v43, %v7207_v31 }
 0x643   :  { %v7211_v45 = vpop.permute.xlu0 %7210 }
 0x644   :  { %v7279_v34 = vsel %vm7278_vm11, %v7277_v44, %v7211_v45  ;;  %vm7311_vm11 = vcmask 713728  }
 0x645   :  { %v7281_v46 = vsel %vm7280_vm13, %v7279_v34, %v7215_v33  ;;  %v7231_v47 = vpop.permute.xlu1 %7230 }
 0x646   :  { %v7283_v48 = vsel %vm7282_vm14, %v7281_v46, %v7219_v19 }
 0x647   :  { %v7285_v49 = vsel %vm7284_vm12, %v7283_v48, %v7223_v35  ;;  %v7235_v50 = vpop.permute.xlu0 %7234 }
 0x648   :  { %v7287_v51 = vsel %vm7286_vm15, %v7285_v49, %v7227_v36 }
 0x649   :  { %v7289_v21 = vsel %vm7288_vm0, %v7287_v51, %v7231_v47  ;;  %v7239_v52 = vpop.permute.xlu1 %7238 }
 0x64a   :  { %v7291_v53 = vsel %vm7290_vm1, %v7289_v21, %v7235_v50 }
 0x64b   :  { %v7293_v54 = vsel %vm7292_vm10, %v7291_v53, %v7239_v52  ;;  %v7243_v55 = vpop.permute.xlu0 %7242 }
 0x64c   :  { %v7295_v56 = vsel %vm7294_vm8, %v7293_v54, %v7243_v55 }
 0x64d   :  { %v7297_v57 = vsel %vm7296_vm2, %v7295_v56, %v7247_v25  ;;  %v7255_v58 = vpop.permute.xlu1 %7254 }
 0x64e   :  { %v7299_v59 = vsel %vm7298_vm6, %v7297_v57, %v7251_v38 }
 0x64f   :  { %v7301_v60 = vsel %vm7300_vm3, %v7299_v59, %v7255_v58  ;;  %v7259_v61 = vpop.permute.xlu0 %7258 }
 0x650   :  { %v7303_v63 = vsel %vm7302_vm4, %v7301_v60, %v7259_v61 }
 0x651   :  { %v7263_v0 = vpop.permute.xlu1 %7262 }
 0x652   :  { %v7305_v1 = vsel %vm7304_vm5, %v7303_v63, %v7263_v0 }
 0x653   :  { %v7267_v2 = vpop.permute.xlu0 %7266 }
 0x654   :  { %v7307_v3 = vsel %vm7306_vm7, %v7305_v1, %v7267_v2 }
 0x655   :  { %vm7308_vm9 = vcmp.gt.f32.partialorder %v7307_v3, 0.0  ;;  %v7309_v4 = vmul.f32 0.05, %v7307_v3 }
 0x657   :  { %v7310_v5 = vsel %vm7308_vm9, %v7307_v3, %v7309_v4 }
 0x658   :  { %7312 = vst.msk [vmem:[#allocation5] sm:$0x3] %vm7311_vm11, %v7310_v5 }
 0x659   :  { %8951 = shalt.err (!%p8948_p4)
}
 0x65a   :  { %s8952_s4 = scalar_lea.hbm %s10360_s9, 32 }
 0x65b   :  { %p8953_p5 = scmp.ne.s32.totalorder %s10360_s9, %s8952_s4  ;;  %p8956_p6 = scmp.lt.u32.totalorder %s8952_s4, %s10360_s9 }
 0x65d   :  { %p8958_p7 = pnand %p8956_p6, %p8953_p5 }
 0x65f   :  { %8961 = shalt.err (!%p8958_p7)
}
 0x660   :  { %7322 = dma.vmem_to_hbm [thread:$0]  %s7320_s1, 32, %s10360_s9, [#allocation6]  }
 0x661   :  { %8962 = dma.done.wait [#allocation6], 32  }
 0x662   :  { %8963 = vsyncadd [#allocation6], 4294967264 }
 0x663   :  { %7326 = vsyncpa [#allocation6], 1 }

</bundles_post_ra>
